<compile_context>
chip_gen: v6e
topology: v6e:2x2x1
jax: 0.10.0
libtpu: 0.0.40
codegen_flags: <defaults>
</compile_context>

<pallas_src>
import numpy as np
import jax
import jax.numpy as jnp
from jax import lax
from jax.experimental import pallas as pl
from jax.experimental.pallas import tpu as pltpu

_NCLS = 6                      # claasifierNet2 output classes
_CPAD = 128                    # lane-dense channel padding for conv2 / head
_VMEM_LIMIT = 32 * 1024 * 1024


# --------------------------------------------------------------------------
# Fused conv1 + ReLU + maxpool + conv3 + ReLU + conv2 + ReLU  (one image/step)
# --------------------------------------------------------------------------
def _make_fused_kernel(H1, W1, P, O, KC):
    """Builds the fused kernel body for static sizes.

    H1, W1 : conv1 output spatial dims
    P      : maxpool / conv3 output spatial dim (square)
    O      : conv2 output spatial dim (square, == 8 for this net)
    KC     : conv1 contraction depth (9 * Cin)
    """
    M1 = H1 * W1               # conv1 output rows
    WP = P + 2                 # pitch of the zero-padded conv3 input grid
    M3 = (P - 1) * WP + P      # row span of conv3 outputs (incl. garbage cols)
    M2 = (O - 1) * WP + O      # row span of conv2 outputs (incl. garbage cols)
    CH = 128                   # conv1 row-block size

    def kernel(p_ref, w1_ref, b1_ref, w3_ref, b3_ref, w2_ref, b2_ref, o_ref,
               s1_ref, x3_ref, a3_ref):
        # ---- conv1 + ReLU: (M1, KC) @ (KC, 128), row-blocked ---------------
        for s in range(0, M1, CH):
            e = min(s + CH, M1)
            acc = jnp.dot(p_ref[0, s:e, :], w1_ref[...],
                          preferred_element_type=jnp.float32)
            s1_ref[s:e, :] = jnp.maximum(acc + b1_ref[...], 0.0)

        # ---- maxpool 3x3, stride 2, pad 1 (fused); writes the zero-padded
        #      conv3 input grid.  Clamped windows == -inf padding because the
        #      pooled values are post-ReLU (>= 0).  One contiguous (P, 128)
        #      store per pooled output row. -----------------------------------
        x3_ref[...] = jnp.zeros_like(x3_ref)
        for i in range(P):
            r0 = max(2 * i - 1, 0)
            r1 = min(2 * i + 1, H1 - 1)
            rm = s1_ref[r0 * W1:r0 * W1 + W1, :]          # running row-max
            for r in range(r0 + 1, r1 + 1):
                rm = jnp.maximum(rm, s1_ref[r * W1:r * W1 + W1, :])
            vals = []
            for j in range(P):
                c0 = max(2 * j - 1, 0)
                c1 = min(2 * j + 1, W1 - 1)
                v = rm[c0:c0 + 1, :]
                for c in range(c0 + 1, c1 + 1):
                    v = jnp.maximum(v, rm[c:c + 1, :])
                vals.append(v)
            row = jnp.concatenate(vals, axis=0)           # (P, 128)
            base = (i + 1) * WP + 1
            x3_ref[base:base + P, :] = row

        # ---- conv3 + ReLU: 9 taps, each a contiguous (M3, 128) ref slice ---
        acc3 = jnp.zeros((M3, 128), jnp.float32)
        for kh in range(3):
            for kw in range(3):
                st = kh * WP + kw
                tap = x3_ref[st:st + M3, :].astype(jnp.bfloat16)
                acc3 = acc3 + jnp.dot(tap, w3_ref[kh, kw],
                                      preferred_element_type=jnp.float32)
        a3_ref[...] = jnp.maximum(acc3 + b3_ref[...], 0.0)

        # ---- conv2 + ReLU (valid conv, Cout zero-padded to 128) ------------
        acc2 = jnp.zeros((M2, _CPAD), jnp.float32)
        for kh in range(3):
            for kw in range(3):
                st = kh * WP + kw
                tap = a3_ref[st:st + M2, :].astype(jnp.bfloat16)
                acc2 = acc2 + jnp.dot(tap, w2_ref[kh, kw],
                                      preferred_element_type=jnp.float32)
        a2 = jnp.maximum(acc2 + b2_ref[...], 0.0)

        # ---- compact the valid O x O rows into the lane-dense output -------
        for r in range(O):
            o_ref[0, r * O:(r + 1) * O, :] = a2[r * WP:r * WP + O, :].astype(o_ref.dtype)

    return kernel, M3


def _fused_conv(patches, w1m, b1m, w3m, b3m, w2m, b2m, H1, W1, P, O):
    N, M1, KC = patches.shape
    kernel, M3 = _make_fused_kernel(H1, W1, P, O, KC)
    return pl.pallas_call(
        kernel,
        out_shape=jax.ShapeDtypeStruct((N, O * O, _CPAD), jnp.float32),
        grid=(N,),
        in_specs=[
            pl.BlockSpec((1, M1, KC), lambda n: (n, 0, 0)),
            pl.BlockSpec((KC, 128), lambda n: (0, 0)),
            pl.BlockSpec((1, 128), lambda n: (0, 0)),
            pl.BlockSpec((3, 3, 128, 128), lambda n: (0, 0, 0, 0)),
            pl.BlockSpec((1, 128), lambda n: (0, 0)),
            pl.BlockSpec((3, 3, 128, _CPAD), lambda n: (0, 0, 0, 0)),
            pl.BlockSpec((1, _CPAD), lambda n: (0, 0)),
        ],
        out_specs=pl.BlockSpec((1, O * O, _CPAD), lambda n: (n, 0, 0)),
        scratch_shapes=[
            pltpu.VMEM((H1 * W1, 128), jnp.float32),            # relu(conv1) map
            pltpu.VMEM(((P + 2) * (P + 2), 128), jnp.float32),  # padded pool out
            pltpu.VMEM((M3, 128), jnp.float32),                 # relu(conv3) map
        ],
        compiler_params=pltpu.CompilerParams(
            dimension_semantics=("parallel",),
            vmem_limit_bytes=_VMEM_LIMIT),
    )(patches, w1m, b1m, w3m, b3m, w2m, b2m)


# --------------------------------------------------------------------------
# Linear + softmax head (class dim padded to 128; pad logits get bias -1e30)
# --------------------------------------------------------------------------
def _head_kernel(x_ref, w_ref, b_ref, o_ref):
    logits = jnp.dot(x_ref[...].astype(jnp.bfloat16), w_ref[...],
                     preferred_element_type=jnp.float32) + b_ref[...]
    m = jnp.max(logits, axis=-1, keepdims=True)
    e = jnp.exp(logits - m)
    o_ref[...] = e * pl.reciprocal(jnp.sum(e, axis=-1, keepdims=True))


def _head(flat, wlm, blm):
    N = flat.shape[0]
    return pl.pallas_call(
        _head_kernel,
        out_shape=jax.ShapeDtypeStruct((N, _CPAD), jnp.float32),
    )(flat, wlm, blm)


# --------------------------------------------------------------------------
# Wrapper glue
# --------------------------------------------------------------------------
def _conv1_patches(x_nhwc):
    """Stride-2, pad-1, 3x3 im2col: (N,H,W,C) -> (N, Ho*Wo, 9*C)."""
    N, H, W, C = x_nhwc.shape
    xp = jnp.pad(x_nhwc, ((0, 0), (1, 1), (1, 1), (0, 0)))
    Ho = (H - 1) // 2 + 1
    Wo = (W - 1) // 2 + 1
    taps = []
    for kh in range(3):
        for kw in range(3):
            taps.append(xp[:, kh:kh + 2 * Ho - 1:2, kw:kw + 2 * Wo - 1:2, :])
    p = jnp.concatenate(taps, axis=-1)            # (N, Ho, Wo, 9C), (kh,kw,c) order
    return p.reshape(N, Ho * Wo, 9 * C), Ho, Wo


def _prep_kernel_params(params):
    """PyTorch-layout weights -> kernel layouts (HWIO, padded, bf16)."""
    w1 = jnp.transpose(params["w1"], (2, 3, 1, 0))             # (3,3,Cin,128)
    kc = w1.shape[0] * w1.shape[1] * w1.shape[2]
    w1m = w1.reshape(kc, 128).astype(jnp.bfloat16)
    b1m = params["b1"].reshape(1, 128).astype(jnp.float32)
    w3m = jnp.transpose(params["w3"], (2, 3, 1, 0)).astype(jnp.bfloat16)
    b3m = params["b3"].reshape(1, 128).astype(jnp.float32)
    w2 = jnp.transpose(params["w2"], (2, 3, 1, 0))             # (3,3,128,6)
    w2m = jnp.pad(w2, ((0, 0), (0, 0), (0, 0), (0, _CPAD - _NCLS))).astype(jnp.bfloat16)
    b2m = jnp.pad(params["b2"], (0, _CPAD - _NCLS)).reshape(1, _CPAD).astype(jnp.float32)
    # PyTorch flattens conv2's output in (c, h, w) order; our feature layout is
    # (h, w, c), so permute the linear weight rows accordingly (exact semantics).
    wl = jnp.transpose(params["wl"].reshape(_NCLS, _NCLS, 8, 8), (2, 3, 1, 0))
    wl = wl.reshape(8 * 8 * _NCLS, _NCLS)
    wlm = jnp.pad(wl, ((0, 0), (0, _CPAD - _NCLS))).astype(jnp.bfloat16)
    blm = jnp.concatenate(
        [params["bl"].astype(jnp.float32),
         jnp.full((_CPAD - _NCLS,), -1e30, jnp.float32)]).reshape(1, _CPAD)
    return w1m, b1m, w3m, b3m, w2m, b2m, wlm, blm


def claasifiernet2_forward(x_nchw, params):
    """Pallas implementation of claasifierNet2.forward; returns (N, 6) softmax."""
    N = x_nchw.shape[0]
    x = jnp.transpose(x_nchw, (0, 2, 3, 1)).astype(jnp.float32)   # NCHW -> NHWC
    patches, H1, W1 = _conv1_patches(x)
    assert H1 == W1, "square inputs expected"
    P = (H1 - 1) // 2 + 1               # maxpool(3, s=2, p=1) output size
    O = P - 2                            # conv2 (valid) output size
    assert O == 8, "claasifierNet2's linear layer requires an 8x8 conv2 output"
    w1m, b1m, w3m, b3m, w2m, b2m, wlm, blm = _prep_kernel_params(params)
    feat = _fused_conv(patches.astype(jnp.bfloat16),
                       w1m, b1m, w3m, b3m, w2m, b2m, H1, W1, P, O)
    flat = feat[:, :, :_NCLS].reshape(N, O * O * _NCLS)
    probs = _head(flat, wlm, blm)
    # F.softmax(x) on a 2-D tensor defaults to dim=1 (over the 6 classes).
    return probs[:, :_NCLS]


# --------------------------------------------------------------------------
# Pure-JAX reference (f32) with identical semantics, for a correctness check.
# --------------------------------------------------------------------------
def ref_forward(x_nchw, params):
    x = jnp.transpose(x_nchw, (0, 2, 3, 1)).astype(jnp.float32)

    def conv(y, w_pt, b, stride, pad):
        w = jnp.transpose(w_pt, (2, 3, 1, 0))                  # HWIO
        z = lax.conv_general_dilated(
            y, w, (stride, stride), [(pad, pad), (pad, pad)],
            dimension_numbers=("NHWC", "HWIO", "NHWC"),
            precision=lax.Precision.HIGHEST)
        return z + b[None, None, None, :]

    y = jax.nn.relu(conv(x, params["w1"], params["b1"], 2, 1))
    y = lax.reduce_window(y, -jnp.inf, lax.max, (1, 3, 3, 1), (1, 2, 2, 1),
                          ((0, 0), (1, 1), (1, 1), (0, 0)))
    y = jax.nn.relu(conv(y, params["w3"], params["b3"], 1, 1))
    y = jax.nn.relu(conv(y, params["w2"], params["b2"], 1, 0))   # (N, 8, 8, 6)
    flat = jnp.transpose(y, (0, 3, 1, 2)).reshape(y.shape[0], -1)  # (c,h,w) order
    logits = jnp.dot(flat, params["wl"].T,
                     precision=lax.Precision.HIGHEST) + params["bl"]
    return jax.nn.softmax(logits, axis=-1)


def init_params(key, input_channel):
    """Deterministic synthetic parameters in PyTorch layouts."""
    ks = jax.random.split(key, 4)

    def conv_init(k, cout, cin):
        k1, k2 = jax.random.split(k)
        w = jax.random.normal(k1, (cout, cin, 3, 3), jnp.float32) / np.sqrt(9.0 * cin)
        b = 0.1 * jax.random.normal(k2, (cout,), jnp.float32)
        return w, b

    w1, b1 = conv_init(ks[0], 128, input_channel)
    w3, b3 = conv_init(ks[1], 128, 128)
    w2, b2 = conv_init(ks[2], _NCLS, 128)
    kl1, kl2 = jax.random.split(ks[3])
    wl = jax.random.normal(kl1, (_NCLS, 8 * 8 * _NCLS), jnp.float32) / np.sqrt(384.0)
    bl = 0.1 * jax.random.normal(kl2, (_NCLS,), jnp.float32)
    return dict(w1=w1, b1=b1, w3=w3, b3=b3, w2=w2, b2=b2, wl=wl, bl=bl)


if __name__ == "__main__":
    key = jax.random.PRNGKey(0)
    kx, kp = jax.random.split(key)
    # claasifierNet2's linear layer hard-codes an 8x8x6 conv2 output, which
    # requires a 39/40-pixel input; use the smallest even size: 40x40, batch=2.
    x = jax.random.normal(kx, (2, 4, 40, 40), jnp.float32)
    params = init_params(kp, input_channel=4)

    fwd = jax.jit(claasifiernet2_forward)
    out = jax.block_until_ready(fwd(x, params))
    assert out.shape == (2, _NCLS), out.shape

    ref = jax.block_until_ready(ref_forward(x, params))
    err = float(jnp.max(jnp.abs(out - ref)))
    rowsum_err = float(jnp.max(jnp.abs(jnp.sum(out, axis=-1) - 1.0)))
    assert err <= 2e-2, f"max abs err {err}"
    assert rowsum_err <= 1e-3, f"softmax rows do not sum to 1: {rowsum_err}"

    print("KERNEL_OK")
</pallas_src>

<mosaic_0001>
module attributes {stable_mosaic.version = 11 : i64} {
  func.func @kernel(%arg0: i32, %arg1: memref<1x400x36xbf16, #tpu.memory_space<vmem>>, %arg2: memref<36x128xbf16, #tpu.memory_space<vmem>>, %arg3: memref<1x128xf32, #tpu.memory_space<vmem>>, %arg4: memref<3x3x128x128xbf16, #tpu.memory_space<vmem>>, %arg5: memref<1x128xf32, #tpu.memory_space<vmem>>, %arg6: memref<3x3x128x128xbf16, #tpu.memory_space<vmem>>, %arg7: memref<1x128xf32, #tpu.memory_space<vmem>>, %arg8: memref<1x64x128xf32, #tpu.memory_space<vmem>>, %arg9: memref<400x128xf32, #tpu.memory_space<vmem>>, %arg10: memref<144x128xf32, #tpu.memory_space<vmem>>, %arg11: memref<118x128xf32, #tpu.memory_space<vmem>>) attributes {dimension_semantics = [#tpu.dimension_semantics<parallel>], iteration_bounds = array<i64: 2>, scalar_prefetch = 0 : i64, scratch_operands = 3 : i64, tpu.core_type = #tpu.core_type<tc>, window_params = [{transform_indices = @transform_0, window_bounds = array<i64: 1, 400, 36>}, {pipeline_mode = #tpu.pipeline_mode<synchronous>, transform_indices = @transform_1, window_bounds = array<i64: 36, 128>}, {pipeline_mode = #tpu.pipeline_mode<synchronous>, transform_indices = @transform_2, window_bounds = array<i64: 1, 128>}, {pipeline_mode = #tpu.pipeline_mode<synchronous>, transform_indices = @transform_3, window_bounds = array<i64: 3, 3, 128, 128>}, {pipeline_mode = #tpu.pipeline_mode<synchronous>, transform_indices = @transform_4, window_bounds = array<i64: 1, 128>}, {pipeline_mode = #tpu.pipeline_mode<synchronous>, transform_indices = @transform_5, window_bounds = array<i64: 3, 3, 128, 128>}, {pipeline_mode = #tpu.pipeline_mode<synchronous>, transform_indices = @transform_6, window_bounds = array<i64: 1, 128>}, {transform_indices = @transform_7, window_bounds = array<i64: 1, 64, 128>}]} {
    %c0 = arith.constant 0 : index
    %c0_0 = arith.constant 0 : index
    %c0_1 = arith.constant 0 : index
    %0 = vector.load %arg1[%c0, %c0_0, %c0_1] : memref<1x400x36xbf16, #tpu.memory_space<vmem>>, vector<1x128x36xbf16>
    %1 = vector.shape_cast %0 : vector<1x128x36xbf16> to vector<128x36xbf16>
    %c0_2 = arith.constant 0 : index
    %c0_3 = arith.constant 0 : index
    %2 = vector.load %arg2[%c0_2, %c0_3] : memref<36x128xbf16, #tpu.memory_space<vmem>>, vector<36x128xbf16>
    %cst = arith.constant dense<0.000000e+00> : vector<128x128xf32>
    %3 = tpu.matmul %1, %2, %cst {dimension_numbers = #tpu.dot_dimension_numbers<[1], [0], [0], [1], [0, 0, 1, 1], [], []>} : vector<128x36xbf16>, vector<36x128xbf16>, vector<128x128xf32> -> vector<128x128xf32>
    %c0_4 = arith.constant 0 : index
    %c0_5 = arith.constant 0 : index
    %4 = vector.load %arg3[%c0_4, %c0_5] : memref<1x128xf32, #tpu.memory_space<vmem>>, vector<1x128xf32>
    %5 = vector.broadcast %4 : vector<1x128xf32> to vector<128x128xf32>
    %6 = arith.addf %3, %5 : vector<128x128xf32>
    %cst_6 = arith.constant 0.000000e+00 : f32
    %7 = vector.broadcast %cst_6 : f32 to vector<128x128xf32>
    %8 = arith.maximumf %6, %7 : vector<128x128xf32>
    %c0_7 = arith.constant 0 : index
    %c0_8 = arith.constant 0 : index
    %9 = vector.load %arg9[%c0_7, %c0_8] : memref<400x128xf32, #tpu.memory_space<vmem>>, vector<128x128xf32>
    tpu.vector_store %arg9[%c0_7, %c0_8], %8 {strides = array<i32>} : memref<400x128xf32, #tpu.memory_space<vmem>>, vector<128x128xf32>,
    %c0_9 = arith.constant 0 : index
    %c128 = arith.constant 128 : index
    %c0_10 = arith.constant 0 : index
    %10 = vector.load %arg1[%c0_9, %c128, %c0_10] : memref<1x400x36xbf16, #tpu.memory_space<vmem>>, vector<1x128x36xbf16>
    %11 = vector.shape_cast %10 : vector<1x128x36xbf16> to vector<128x36xbf16>
    %c0_11 = arith.constant 0 : index
    %c0_12 = arith.constant 0 : index
    %12 = vector.load %arg2[%c0_11, %c0_12] : memref<36x128xbf16, #tpu.memory_space<vmem>>, vector<36x128xbf16>
    %cst_13 = arith.constant dense<0.000000e+00> : vector<128x128xf32>
    %13 = tpu.matmul %11, %12, %cst_13 {dimension_numbers = #tpu.dot_dimension_numbers<[1], [0], [0], [1], [0, 0, 1, 1], [], []>} : vector<128x36xbf16>, vector<36x128xbf16>, vector<128x128xf32> -> vector<128x128xf32>
    %c0_14 = arith.constant 0 : index
    %c0_15 = arith.constant 0 : index
    %14 = vector.load %arg3[%c0_14, %c0_15] : memref<1x128xf32, #tpu.memory_space<vmem>>, vector<1x128xf32>
    %15 = vector.broadcast %14 : vector<1x128xf32> to vector<128x128xf32>
    %16 = arith.addf %13, %15 : vector<128x128xf32>
    %cst_16 = arith.constant 0.000000e+00 : f32
    %17 = vector.broadcast %cst_16 : f32 to vector<128x128xf32>
    %18 = arith.maximumf %16, %17 : vector<128x128xf32>
    %c128_17 = arith.constant 128 : index
    %c0_18 = arith.constant 0 : index
    %19 = vector.load %arg9[%c128_17, %c0_18] : memref<400x128xf32, #tpu.memory_space<vmem>>, vector<128x128xf32>
    tpu.vector_store %arg9[%c128_17, %c0_18], %18 {strides = array<i32>} : memref<400x128xf32, #tpu.memory_space<vmem>>, vector<128x128xf32>,
    %c0_19 = arith.constant 0 : index
    %c256 = arith.constant 256 : index
    %c0_20 = arith.constant 0 : index
    %20 = vector.load %arg1[%c0_19, %c256, %c0_20] : memref<1x400x36xbf16, #tpu.memory_space<vmem>>, vector<1x128x36xbf16>
    %21 = vector.shape_cast %20 : vector<1x128x36xbf16> to vector<128x36xbf16>
    %c0_21 = arith.constant 0 : index
    %c0_22 = arith.constant 0 : index
    %22 = vector.load %arg2[%c0_21, %c0_22] : memref<36x128xbf16, #tpu.memory_space<vmem>>, vector<36x128xbf16>
    %cst_23 = arith.constant dense<0.000000e+00> : vector<128x128xf32>
    %23 = tpu.matmul %21, %22, %cst_23 {dimension_numbers = #tpu.dot_dimension_numbers<[1], [0], [0], [1], [0, 0, 1, 1], [], []>} : vector<128x36xbf16>, vector<36x128xbf16>, vector<128x128xf32> -> vector<128x128xf32>
    %c0_24 = arith.constant 0 : index
    %c0_25 = arith.constant 0 : index
    %24 = vector.load %arg3[%c0_24, %c0_25] : memref<1x128xf32, #tpu.memory_space<vmem>>, vector<1x128xf32>
    %25 = vector.broadcast %24 : vector<1x128xf32> to vector<128x128xf32>
    %26 = arith.addf %23, %25 : vector<128x128xf32>
    %cst_26 = arith.constant 0.000000e+00 : f32
    %27 = vector.broadcast %cst_26 : f32 to vector<128x128xf32>
    %28 = arith.maximumf %26, %27 : vector<128x128xf32>
    %c256_27 = arith.constant 256 : index
    %c0_28 = arith.constant 0 : index
    %29 = vector.load %arg9[%c256_27, %c0_28] : memref<400x128xf32, #tpu.memory_space<vmem>>, vector<128x128xf32>
    tpu.vector_store %arg9[%c256_27, %c0_28], %28 {strides = array<i32>} : memref<400x128xf32, #tpu.memory_space<vmem>>, vector<128x128xf32>,
    %c0_29 = arith.constant 0 : index
    %c384 = arith.constant 384 : index
    %c0_30 = arith.constant 0 : index
    %30 = vector.load %arg1[%c0_29, %c384, %c0_30] : memref<1x400x36xbf16, #tpu.memory_space<vmem>>, vector<1x16x36xbf16>
    %31 = vector.shape_cast %30 : vector<1x16x36xbf16> to vector<16x36xbf16>
    %c0_31 = arith.constant 0 : index
    %c0_32 = arith.constant 0 : index
    %32 = vector.load %arg2[%c0_31, %c0_32] : memref<36x128xbf16, #tpu.memory_space<vmem>>, vector<36x128xbf16>
    %cst_33 = arith.constant dense<0.000000e+00> : vector<16x128xf32>
    %33 = tpu.matmul %31, %32, %cst_33 {dimension_numbers = #tpu.dot_dimension_numbers<[1], [0], [0], [1], [0, 0, 1, 1], [], []>} : vector<16x36xbf16>, vector<36x128xbf16>, vector<16x128xf32> -> vector<16x128xf32>
    %c0_34 = arith.constant 0 : index
    %c0_35 = arith.constant 0 : index
    %34 = vector.load %arg3[%c0_34, %c0_35] : memref<1x128xf32, #tpu.memory_space<vmem>>, vector<1x128xf32>
    %35 = vector.broadcast %34 : vector<1x128xf32> to vector<16x128xf32>
    %36 = arith.addf %33, %35 : vector<16x128xf32>
    %cst_36 = arith.constant 0.000000e+00 : f32
    %37 = vector.broadcast %cst_36 : f32 to vector<16x128xf32>
    %38 = arith.maximumf %36, %37 : vector<16x128xf32>
    %c384_37 = arith.constant 384 : index
    %c0_38 = arith.constant 0 : index
    %39 = vector.load %arg9[%c384_37, %c0_38] : memref<400x128xf32, #tpu.memory_space<vmem>>, vector<16x128xf32>
    tpu.vector_store %arg9[%c384_37, %c0_38], %38 {strides = array<i32>} : memref<400x128xf32, #tpu.memory_space<vmem>>, vector<16x128xf32>,
    %cst_39 = arith.constant 0.000000e+00 : f32
    %40 = vector.broadcast %cst_39 : f32 to vector<144x128xf32>
    %c0_40 = arith.constant 0 : index
    %c0_41 = arith.constant 0 : index
    %41 = vector.load %arg10[%c0_40, %c0_41] : memref<144x128xf32, #tpu.memory_space<vmem>>, vector<144x128xf32>
    tpu.vector_store %arg10[%c0_40, %c0_41], %40 {strides = array<i32>} : memref<144x128xf32, #tpu.memory_space<vmem>>, vector<144x128xf32>,
    %c0_42 = arith.constant 0 : index
    %c0_43 = arith.constant 0 : index
    %42 = vector.load %arg9[%c0_42, %c0_43] : memref<400x128xf32, #tpu.memory_space<vmem>>, vector<20x128xf32>
    %c20 = arith.constant 20 : index
    %c0_44 = arith.constant 0 : index
    %43 = vector.load %arg9[%c20, %c0_44] : memref<400x128xf32, #tpu.memory_space<vmem>>, vector<20x128xf32>
    %44 = arith.maximumf %42, %43 : vector<20x128xf32>
    %45 = vector.extract_strided_slice %44 {offsets = [0, 0], sizes = [1, 128], strides = [1, 1]} : vector<20x128xf32> to vector<1x128xf32>
    %46 = vector.extract_strided_slice %44 {offsets = [1, 0], sizes = [1, 128], strides = [1, 1]} : vector<20x128xf32> to vector<1x128xf32>
    %47 = arith.maximumf %45, %46 : vector<1x128xf32>
    %48 = vector.extract_strided_slice %44 {offsets = [1, 0], sizes = [1, 128], strides = [1, 1]} : vector<20x128xf32> to vector<1x128xf32>
    %49 = vector.extract_strided_slice %44 {offsets = [2, 0], sizes = [1, 128], strides = [1, 1]} : vector<20x128xf32> to vector<1x128xf32>
    %50 = arith.maximumf %48, %49 : vector<1x128xf32>
    %51 = vector.extract_strided_slice %44 {offsets = [3, 0], sizes = [1, 128], strides = [1, 1]} : vector<20x128xf32> to vector<1x128xf32>
    %52 = arith.maximumf %50, %51 : vector<1x128xf32>
    %53 = vector.extract_strided_slice %44 {offsets = [3, 0], sizes = [1, 128], strides = [1, 1]} : vector<20x128xf32> to vector<1x128xf32>
    %54 = vector.extract_strided_slice %44 {offsets = [4, 0], sizes = [1, 128], strides = [1, 1]} : vector<20x128xf32> to vector<1x128xf32>
    %55 = arith.maximumf %53, %54 : vector<1x128xf32>
    %56 = vector.extract_strided_slice %44 {offsets = [5, 0], sizes = [1, 128], strides = [1, 1]} : vector<20x128xf32> to vector<1x128xf32>
    %57 = arith.maximumf %55, %56 : vector<1x128xf32>
    %58 = vector.extract_strided_slice %44 {offsets = [5, 0], sizes = [1, 128], strides = [1, 1]} : vector<20x128xf32> to vector<1x128xf32>
    %59 = vector.extract_strided_slice %44 {offsets = [6, 0], sizes = [1, 128], strides = [1, 1]} : vector<20x128xf32> to vector<1x128xf32>
    %60 = arith.maximumf %58, %59 : vector<1x128xf32>
    %61 = vector.extract_strided_slice %44 {offsets = [7, 0], sizes = [1, 128], strides = [1, 1]} : vector<20x128xf32> to vector<1x128xf32>
    %62 = arith.maximumf %60, %61 : vector<1x128xf32>
    %63 = vector.extract_strided_slice %44 {offsets = [7, 0], sizes = [1, 128], strides = [1, 1]} : vector<20x128xf32> to vector<1x128xf32>
    %64 = vector.extract_strided_slice %44 {offsets = [8, 0], sizes = [1, 128], strides = [1, 1]} : vector<20x128xf32> to vector<1x128xf32>
    %65 = arith.maximumf %63, %64 : vector<1x128xf32>
    %66 = vector.extract_strided_slice %44 {offsets = [9, 0], sizes = [1, 128], strides = [1, 1]} : vector<20x128xf32> to vector<1x128xf32>
    %67 = arith.maximumf %65, %66 : vector<1x128xf32>
    %68 = vector.extract_strided_slice %44 {offsets = [9, 0], sizes = [1, 128], strides = [1, 1]} : vector<20x128xf32> to vector<1x128xf32>
    %69 = vector.extract_strided_slice %44 {offsets = [10, 0], sizes = [1, 128], strides = [1, 1]} : vector<20x128xf32> to vector<1x128xf32>
    %70 = arith.maximumf %68, %69 : vector<1x128xf32>
    %71 = vector.extract_strided_slice %44 {offsets = [11, 0], sizes = [1, 128], strides = [1, 1]} : vector<20x128xf32> to vector<1x128xf32>
    %72 = arith.maximumf %70, %71 : vector<1x128xf32>
    %73 = vector.extract_strided_slice %44 {offsets = [11, 0], sizes = [1, 128], strides = [1, 1]} : vector<20x128xf32> to vector<1x128xf32>
    %74 = vector.extract_strided_slice %44 {offsets = [12, 0], sizes = [1, 128], strides = [1, 1]} : vector<20x128xf32> to vector<1x128xf32>
    %75 = arith.maximumf %73, %74 : vector<1x128xf32>
    %76 = vector.extract_strided_slice %44 {offsets = [13, 0], sizes = [1, 128], strides = [1, 1]} : vector<20x128xf32> to vector<1x128xf32>
    %77 = arith.maximumf %75, %76 : vector<1x128xf32>
    %78 = vector.extract_strided_slice %44 {offsets = [13, 0], sizes = [1, 128], strides = [1, 1]} : vector<20x128xf32> to vector<1x128xf32>
    %79 = vector.extract_strided_slice %44 {offsets = [14, 0], sizes = [1, 128], strides = [1, 1]} : vector<20x128xf32> to vector<1x128xf32>
    %80 = arith.maximumf %78, %79 : vector<1x128xf32>
    %81 = vector.extract_strided_slice %44 {offsets = [15, 0], sizes = [1, 128], strides = [1, 1]} : vector<20x128xf32> to vector<1x128xf32>
    %82 = arith.maximumf %80, %81 : vector<1x128xf32>
    %83 = vector.extract_strided_slice %44 {offsets = [15, 0], sizes = [1, 128], strides = [1, 1]} : vector<20x128xf32> to vector<1x128xf32>
    %84 = vector.extract_strided_slice %44 {offsets = [16, 0], sizes = [1, 128], strides = [1, 1]} : vector<20x128xf32> to vector<1x128xf32>
    %85 = arith.maximumf %83, %84 : vector<1x128xf32>
    %86 = vector.extract_strided_slice %44 {offsets = [17, 0], sizes = [1, 128], strides = [1, 1]} : vector<20x128xf32> to vector<1x128xf32>
    %87 = arith.maximumf %85, %86 : vector<1x128xf32>
    %88 = vector.extract_strided_slice %44 {offsets = [17, 0], sizes = [1, 128], strides = [1, 1]} : vector<20x128xf32> to vector<1x128xf32>
    %89 = vector.extract_strided_slice %44 {offsets = [18, 0], sizes = [1, 128], strides = [1, 1]} : vector<20x128xf32> to vector<1x128xf32>
    %90 = arith.maximumf %88, %89 : vector<1x128xf32>
    %91 = vector.extract_strided_slice %44 {offsets = [19, 0], sizes = [1, 128], strides = [1, 1]} : vector<20x128xf32> to vector<1x128xf32>
    %92 = arith.maximumf %90, %91 : vector<1x128xf32>
    %93 = tpu.concatenate %47, %52, %57, %62, %67, %72, %77, %82, %87, %92 in 0 : vector<1x128xf32>, vector<1x128xf32>, vector<1x128xf32>, vector<1x128xf32>, vector<1x128xf32>, vector<1x128xf32>, vector<1x128xf32>, vector<1x128xf32>, vector<1x128xf32>, vector<1x128xf32> -> vector<10x128xf32>
    %c13 = arith.constant 13 : index
    %c0_45 = arith.constant 0 : index
    %94 = vector.load %arg10[%c13, %c0_45] : memref<144x128xf32, #tpu.memory_space<vmem>>, vector<10x128xf32>
    tpu.vector_store %arg10[%c13, %c0_45], %93 {strides = array<i32>} : memref<144x128xf32, #tpu.memory_space<vmem>>, vector<10x128xf32>,
    %c20_46 = arith.constant 20 : index
    %c0_47 = arith.constant 0 : index
    %95 = vector.load %arg9[%c20_46, %c0_47] : memref<400x128xf32, #tpu.memory_space<vmem>>, vector<20x128xf32>
    %c40 = arith.constant 40 : index
    %c0_48 = arith.constant 0 : index
    %96 = vector.load %arg9[%c40, %c0_48] : memref<400x128xf32, #tpu.memory_space<vmem>>, vector<20x128xf32>
    %97 = arith.maximumf %95, %96 : vector<20x128xf32>
    %c60 = arith.constant 60 : index
    %c0_49 = arith.constant 0 : index
    %98 = vector.load %arg9[%c60, %c0_49] : memref<400x128xf32, #tpu.memory_space<vmem>>, vector<20x128xf32>
    %99 = arith.maximumf %97, %98 : vector<20x128xf32>
    %100 = vector.extract_strided_slice %99 {offsets = [0, 0], sizes = [1, 128], strides = [1, 1]} : vector<20x128xf32> to vector<1x128xf32>
    %101 = vector.extract_strided_slice %99 {offsets = [1, 0], sizes = [1, 128], strides = [1, 1]} : vector<20x128xf32> to vector<1x128xf32>
    %102 = arith.maximumf %100, %101 : vector<1x128xf32>
    %103 = vector.extract_strided_slice %99 {offsets = [1, 0], sizes = [1, 128], strides = [1, 1]} : vector<20x128xf32> to vector<1x128xf32>
    %104 = vector.extract_strided_slice %99 {offsets = [2, 0], sizes = [1, 128], strides = [1, 1]} : vector<20x128xf32> to vector<1x128xf32>
    %105 = arith.maximumf %103, %104 : vector<1x128xf32>
    %106 = vector.extract_strided_slice %99 {offsets = [3, 0], sizes = [1, 128], strides = [1, 1]} : vector<20x128xf32> to vector<1x128xf32>
    %107 = arith.maximumf %105, %106 : vector<1x128xf32>
    %108 = vector.extract_strided_slice %99 {offsets = [3, 0], sizes = [1, 128], strides = [1, 1]} : vector<20x128xf32> to vector<1x128xf32>
    %109 = vector.extract_strided_slice %99 {offsets = [4, 0], sizes = [1, 128], strides = [1, 1]} : vector<20x128xf32> to vector<1x128xf32>
    %110 = arith.maximumf %108, %109 : vector<1x128xf32>
    %111 = vector.extract_strided_slice %99 {offsets = [5, 0], sizes = [1, 128], strides = [1, 1]} : vector<20x128xf32> to vector<1x128xf32>
    %112 = arith.maximumf %110, %111 : vector<1x128xf32>
    %113 = vector.extract_strided_slice %99 {offsets = [5, 0], sizes = [1, 128], strides = [1, 1]} : vector<20x128xf32> to vector<1x128xf32>
    %114 = vector.extract_strided_slice %99 {offsets = [6, 0], sizes = [1, 128], strides = [1, 1]} : vector<20x128xf32> to vector<1x128xf32>
    %115 = arith.maximumf %113, %114 : vector<1x128xf32>
    %116 = vector.extract_strided_slice %99 {offsets = [7, 0], sizes = [1, 128], strides = [1, 1]} : vector<20x128xf32> to vector<1x128xf32>
    %117 = arith.maximumf %115, %116 : vector<1x128xf32>
    %118 = vector.extract_strided_slice %99 {offsets = [7, 0], sizes = [1, 128], strides = [1, 1]} : vector<20x128xf32> to vector<1x128xf32>
    %119 = vector.extract_strided_slice %99 {offsets = [8, 0], sizes = [1, 128], strides = [1, 1]} : vector<20x128xf32> to vector<1x128xf32>
    %120 = arith.maximumf %118, %119 : vector<1x128xf32>
    %121 = vector.extract_strided_slice %99 {offsets = [9, 0], sizes = [1, 128], strides = [1, 1]} : vector<20x128xf32> to vector<1x128xf32>
    %122 = arith.maximumf %120, %121 : vector<1x128xf32>
    %123 = vector.extract_strided_slice %99 {offsets = [9, 0], sizes = [1, 128], strides = [1, 1]} : vector<20x128xf32> to vector<1x128xf32>
    %124 = vector.extract_strided_slice %99 {offsets = [10, 0], sizes = [1, 128], strides = [1, 1]} : vector<20x128xf32> to vector<1x128xf32>
    %125 = arith.maximumf %123, %124 : vector<1x128xf32>
    %126 = vector.extract_strided_slice %99 {offsets = [11, 0], sizes = [1, 128], strides = [1, 1]} : vector<20x128xf32> to vector<1x128xf32>
    %127 = arith.maximumf %125, %126 : vector<1x128xf32>
    %128 = vector.extract_strided_slice %99 {offsets = [11, 0], sizes = [1, 128], strides = [1, 1]} : vector<20x128xf32> to vector<1x128xf32>
    %129 = vector.extract_strided_slice %99 {offsets = [12, 0], sizes = [1, 128], strides = [1, 1]} : vector<20x128xf32> to vector<1x128xf32>
    %130 = arith.maximumf %128, %129 : vector<1x128xf32>
    %131 = vector.extract_strided_slice %99 {offsets = [13, 0], sizes = [1, 128], strides = [1, 1]} : vector<20x128xf32> to vector<1x128xf32>
    %132 = arith.maximumf %130, %131 : vector<1x128xf32>
    %133 = vector.extract_strided_slice %99 {offsets = [13, 0], sizes = [1, 128], strides = [1, 1]} : vector<20x128xf32> to vector<1x128xf32>
    %134 = vector.extract_strided_slice %99 {offsets = [14, 0], sizes = [1, 128], strides = [1, 1]} : vector<20x128xf32> to vector<1x128xf32>
    %135 = arith.maximumf %133, %134 : vector<1x128xf32>
    %136 = vector.extract_strided_slice %99 {offsets = [15, 0], sizes = [1, 128], strides = [1, 1]} : vector<20x128xf32> to vector<1x128xf32>
    %137 = arith.maximumf %135, %136 : vector<1x128xf32>
    %138 = vector.extract_strided_slice %99 {offsets = [15, 0], sizes = [1, 128], strides = [1, 1]} : vector<20x128xf32> to vector<1x128xf32>
    %139 = vector.extract_strided_slice %99 {offsets = [16, 0], sizes = [1, 128], strides = [1, 1]} : vector<20x128xf32> to vector<1x128xf32>
    %140 = arith.maximumf %138, %139 : vector<1x128xf32>
    %141 = vector.extract_strided_slice %99 {offsets = [17, 0], sizes = [1, 128], strides = [1, 1]} : vector<20x128xf32> to vector<1x128xf32>
    %142 = arith.maximumf %140, %141 : vector<1x128xf32>
    %143 = vector.extract_strided_slice %99 {offsets = [17, 0], sizes = [1, 128], strides = [1, 1]} : vector<20x128xf32> to vector<1x128xf32>
    %144 = vector.extract_strided_slice %99 {offsets = [18, 0], sizes = [1, 128], strides = [1, 1]} : vector<20x128xf32> to vector<1x128xf32>
    %145 = arith.maximumf %143, %144 : vector<1x128xf32>
    %146 = vector.extract_strided_slice %99 {offsets = [19, 0], sizes = [1, 128], strides = [1, 1]} : vector<20x128xf32> to vector<1x128xf32>
    %147 = arith.maximumf %145, %146 : vector<1x128xf32>
    %148 = tpu.concatenate %102, %107, %112, %117, %122, %127, %132, %137, %142, %147 in 0 : vector<1x128xf32>, vector<1x128xf32>, vector<1x128xf32>, vector<1x128xf32>, vector<1x128xf32>, vector<1x128xf32>, vector<1x128xf32>, vector<1x128xf32>, vector<1x128xf32>, vector<1x128xf32> -> vector<10x128xf32>
    %c25 = arith.constant 25 : index
    %c0_50 = arith.constant 0 : index
    %149 = vector.load %arg10[%c25, %c0_50] : memref<144x128xf32, #tpu.memory_space<vmem>>, vector<10x128xf32>
    tpu.vector_store %arg10[%c25, %c0_50], %148 {strides = array<i32>} : memref<144x128xf32, #tpu.memory_space<vmem>>, vector<10x128xf32>,
    %c60_51 = arith.constant 60 : index
    %c0_52 = arith.constant 0 : index
    %150 = vector.load %arg9[%c60_51, %c0_52] : memref<400x128xf32, #tpu.memory_space<vmem>>, vector<20x128xf32>
    %c80 = arith.constant 80 : index
    %c0_53 = arith.constant 0 : index
    %151 = vector.load %arg9[%c80, %c0_53] : memref<400x128xf32, #tpu.memory_space<vmem>>, vector<20x128xf32>
    %152 = arith.maximumf %150, %151 : vector<20x128xf32>
    %c100 = arith.constant 100 : index
    %c0_54 = arith.constant 0 : index
    %153 = vector.load %arg9[%c100, %c0_54] : memref<400x128xf32, #tpu.memory_space<vmem>>, vector<20x128xf32>
    %154 = arith.maximumf %152, %153 : vector<20x128xf32>
    %155 = vector.extract_strided_slice %154 {offsets = [0, 0], sizes = [1, 128], strides = [1, 1]} : vector<20x128xf32> to vector<1x128xf32>
    %156 = vector.extract_strided_slice %154 {offsets = [1, 0], sizes = [1, 128], strides = [1, 1]} : vector<20x128xf32> to vector<1x128xf32>
    %157 = arith.maximumf %155, %156 : vector<1x128xf32>
    %158 = vector.extract_strided_slice %154 {offsets = [1, 0], sizes = [1, 128], strides = [1, 1]} : vector<20x128xf32> to vector<1x128xf32>
    %159 = vector.extract_strided_slice %154 {offsets = [2, 0], sizes = [1, 128], strides = [1, 1]} : vector<20x128xf32> to vector<1x128xf32>
    %160 = arith.maximumf %158, %159 : vector<1x128xf32>
    %161 = vector.extract_strided_slice %154 {offsets = [3, 0], sizes = [1, 128], strides = [1, 1]} : vector<20x128xf32> to vector<1x128xf32>
    %162 = arith.maximumf %160, %161 : vector<1x128xf32>
    %163 = vector.extract_strided_slice %154 {offsets = [3, 0], sizes = [1, 128], strides = [1, 1]} : vector<20x128xf32> to vector<1x128xf32>
    %164 = vector.extract_strided_slice %154 {offsets = [4, 0], sizes = [1, 128], strides = [1, 1]} : vector<20x128xf32> to vector<1x128xf32>
    %165 = arith.maximumf %163, %164 : vector<1x128xf32>
    %166 = vector.extract_strided_slice %154 {offsets = [5, 0], sizes = [1, 128], strides = [1, 1]} : vector<20x128xf32> to vector<1x128xf32>
    %167 = arith.maximumf %165, %166 : vector<1x128xf32>
    %168 = vector.extract_strided_slice %154 {offsets = [5, 0], sizes = [1, 128], strides = [1, 1]} : vector<20x128xf32> to vector<1x128xf32>
    %169 = vector.extract_strided_slice %154 {offsets = [6, 0], sizes = [1, 128], strides = [1, 1]} : vector<20x128xf32> to vector<1x128xf32>
    %170 = arith.maximumf %168, %169 : vector<1x128xf32>
    %171 = vector.extract_strided_slice %154 {offsets = [7, 0], sizes = [1, 128], strides = [1, 1]} : vector<20x128xf32> to vector<1x128xf32>
    %172 = arith.maximumf %170, %171 : vector<1x128xf32>
    %173 = vector.extract_strided_slice %154 {offsets = [7, 0], sizes = [1, 128], strides = [1, 1]} : vector<20x128xf32> to vector<1x128xf32>
    %174 = vector.extract_strided_slice %154 {offsets = [8, 0], sizes = [1, 128], strides = [1, 1]} : vector<20x128xf32> to vector<1x128xf32>
    %175 = arith.maximumf %173, %174 : vector<1x128xf32>
    %176 = vector.extract_strided_slice %154 {offsets = [9, 0], sizes = [1, 128], strides = [1, 1]} : vector<20x128xf32> to vector<1x128xf32>
    %177 = arith.maximumf %175, %176 : vector<1x128xf32>
    %178 = vector.extract_strided_slice %154 {offsets = [9, 0], sizes = [1, 128], strides = [1, 1]} : vector<20x128xf32> to vector<1x128xf32>
    %179 = vector.extract_strided_slice %154 {offsets = [10, 0], sizes = [1, 128], strides = [1, 1]} : vector<20x128xf32> to vector<1x128xf32>
    %180 = arith.maximumf %178, %179 : vector<1x128xf32>
    %181 = vector.extract_strided_slice %154 {offsets = [11, 0], sizes = [1, 128], strides = [1, 1]} : vector<20x128xf32> to vector<1x128xf32>
    %182 = arith.maximumf %180, %181 : vector<1x128xf32>
    %183 = vector.extract_strided_slice %154 {offsets = [11, 0], sizes = [1, 128], strides = [1, 1]} : vector<20x128xf32> to vector<1x128xf32>
    %184 = vector.extract_strided_slice %154 {offsets = [12, 0], sizes = [1, 128], strides = [1, 1]} : vector<20x128xf32> to vector<1x128xf32>
    %185 = arith.maximumf %183, %184 : vector<1x128xf32>
    %186 = vector.extract_strided_slice %154 {offsets = [13, 0], sizes = [1, 128], strides = [1, 1]} : vector<20x128xf32> to vector<1x128xf32>
    %187 = arith.maximumf %185, %186 : vector<1x128xf32>
    %188 = vector.extract_strided_slice %154 {offsets = [13, 0], sizes = [1, 128], strides = [1, 1]} : vector<20x128xf32> to vector<1x128xf32>
    %189 = vector.extract_strided_slice %154 {offsets = [14, 0], sizes = [1, 128], strides = [1, 1]} : vector<20x128xf32> to vector<1x128xf32>
    %190 = arith.maximumf %188, %189 : vector<1x128xf32>
    %191 = vector.extract_strided_slice %154 {offsets = [15, 0], sizes = [1, 128], strides = [1, 1]} : vector<20x128xf32> to vector<1x128xf32>
    %192 = arith.maximumf %190, %191 : vector<1x128xf32>
    %193 = vector.extract_strided_slice %154 {offsets = [15, 0], sizes = [1, 128], strides = [1, 1]} : vector<20x128xf32> to vector<1x128xf32>
    %194 = vector.extract_strided_slice %154 {offsets = [16, 0], sizes = [1, 128], strides = [1, 1]} : vector<20x128xf32> to vector<1x128xf32>
    %195 = arith.maximumf %193, %194 : vector<1x128xf32>
    %196 = vector.extract_strided_slice %154 {offsets = [17, 0], sizes = [1, 128], strides = [1, 1]} : vector<20x128xf32> to vector<1x128xf32>
    %197 = arith.maximumf %195, %196 : vector<1x128xf32>
    %198 = vector.extract_strided_slice %154 {offsets = [17, 0], sizes = [1, 128], strides = [1, 1]} : vector<20x128xf32> to vector<1x128xf32>
    %199 = vector.extract_strided_slice %154 {offsets = [18, 0], sizes = [1, 128], strides = [1, 1]} : vector<20x128xf32> to vector<1x128xf32>
    %200 = arith.maximumf %198, %199 : vector<1x128xf32>
    %201 = vector.extract_strided_slice %154 {offsets = [19, 0], sizes = [1, 128], strides = [1, 1]} : vector<20x128xf32> to vector<1x128xf32>
    %202 = arith.maximumf %200, %201 : vector<1x128xf32>
    %203 = tpu.concatenate %157, %162, %167, %172, %177, %182, %187, %192, %197, %202 in 0 : vector<1x128xf32>, vector<1x128xf32>, vector<1x128xf32>, vector<1x128xf32>, vector<1x128xf32>, vector<1x128xf32>, vector<1x128xf32>, vector<1x128xf32>, vector<1x128xf32>, vector<1x128xf32> -> vector<10x128xf32>
    %c37 = arith.constant 37 : index
    %c0_55 = arith.constant 0 : index
    %204 = vector.load %arg10[%c37, %c0_55] : memref<144x128xf32, #tpu.memory_space<vmem>>, vector<10x128xf32>
    tpu.vector_store %arg10[%c37, %c0_55], %203 {strides = array<i32>} : memref<144x128xf32, #tpu.memory_space<vmem>>, vector<10x128xf32>,
    %c100_56 = arith.constant 100 : index
    %c0_57 = arith.constant 0 : index
    %205 = vector.load %arg9[%c100_56, %c0_57] : memref<400x128xf32, #tpu.memory_space<vmem>>, vector<20x128xf32>
    %c120 = arith.constant 120 : index
    %c0_58 = arith.constant 0 : index
    %206 = vector.load %arg9[%c120, %c0_58] : memref<400x128xf32, #tpu.memory_space<vmem>>, vector<20x128xf32>
    %207 = arith.maximumf %205, %206 : vector<20x128xf32>
    %c140 = arith.constant 140 : index
    %c0_59 = arith.constant 0 : index
    %208 = vector.load %arg9[%c140, %c0_59] : memref<400x128xf32, #tpu.memory_space<vmem>>, vector<20x128xf32>
    %209 = arith.maximumf %207, %208 : vector<20x128xf32>
    %210 = vector.extract_strided_slice %209 {offsets = [0, 0], sizes = [1, 128], strides = [1, 1]} : vector<20x128xf32> to vector<1x128xf32>
    %211 = vector.extract_strided_slice %209 {offsets = [1, 0], sizes = [1, 128], strides = [1, 1]} : vector<20x128xf32> to vector<1x128xf32>
    %212 = arith.maximumf %210, %211 : vector<1x128xf32>
    %213 = vector.extract_strided_slice %209 {offsets = [1, 0], sizes = [1, 128], strides = [1, 1]} : vector<20x128xf32> to vector<1x128xf32>
    %214 = vector.extract_strided_slice %209 {offsets = [2, 0], sizes = [1, 128], strides = [1, 1]} : vector<20x128xf32> to vector<1x128xf32>
    %215 = arith.maximumf %213, %214 : vector<1x128xf32>
    %216 = vector.extract_strided_slice %209 {offsets = [3, 0], sizes = [1, 128], strides = [1, 1]} : vector<20x128xf32> to vector<1x128xf32>
    %217 = arith.maximumf %215, %216 : vector<1x128xf32>
    %218 = vector.extract_strided_slice %209 {offsets = [3, 0], sizes = [1, 128], strides = [1, 1]} : vector<20x128xf32> to vector<1x128xf32>
    %219 = vector.extract_strided_slice %209 {offsets = [4, 0], sizes = [1, 128], strides = [1, 1]} : vector<20x128xf32> to vector<1x128xf32>
    %220 = arith.maximumf %218, %219 : vector<1x128xf32>
    %221 = vector.extract_strided_slice %209 {offsets = [5, 0], sizes = [1, 128], strides = [1, 1]} : vector<20x128xf32> to vector<1x128xf32>
    %222 = arith.maximumf %220, %221 : vector<1x128xf32>
    %223 = vector.extract_strided_slice %209 {offsets = [5, 0], sizes = [1, 128], strides = [1, 1]} : vector<20x128xf32> to vector<1x128xf32>
    %224 = vector.extract_strided_slice %209 {offsets = [6, 0], sizes = [1, 128], strides = [1, 1]} : vector<20x128xf32> to vector<1x128xf32>
    %225 = arith.maximumf %223, %224 : vector<1x128xf32>
    %226 = vector.extract_strided_slice %209 {offsets = [7, 0], sizes = [1, 128], strides = [1, 1]} : vector<20x128xf32> to vector<1x128xf32>
    %227 = arith.maximumf %225, %226 : vector<1x128xf32>
    %228 = vector.extract_strided_slice %209 {offsets = [7, 0], sizes = [1, 128], strides = [1, 1]} : vector<20x128xf32> to vector<1x128xf32>
    %229 = vector.extract_strided_slice %209 {offsets = [8, 0], sizes = [1, 128], strides = [1, 1]} : vector<20x128xf32> to vector<1x128xf32>
    %230 = arith.maximumf %228, %229 : vector<1x128xf32>
    %231 = vector.extract_strided_slice %209 {offsets = [9, 0], sizes = [1, 128], strides = [1, 1]} : vector<20x128xf32> to vector<1x128xf32>
    %232 = arith.maximumf %230, %231 : vector<1x128xf32>
    %233 = vector.extract_strided_slice %209 {offsets = [9, 0], sizes = [1, 128], strides = [1, 1]} : vector<20x128xf32> to vector<1x128xf32>
    %234 = vector.extract_strided_slice %209 {offsets = [10, 0], sizes = [1, 128], strides = [1, 1]} : vector<20x128xf32> to vector<1x128xf32>
    %235 = arith.maximumf %233, %234 : vector<1x128xf32>
    %236 = vector.extract_strided_slice %209 {offsets = [11, 0], sizes = [1, 128], strides = [1, 1]} : vector<20x128xf32> to vector<1x128xf32>
    %237 = arith.maximumf %235, %236 : vector<1x128xf32>
    %238 = vector.extract_strided_slice %209 {offsets = [11, 0], sizes = [1, 128], strides = [1, 1]} : vector<20x128xf32> to vector<1x128xf32>
    %239 = vector.extract_strided_slice %209 {offsets = [12, 0], sizes = [1, 128], strides = [1, 1]} : vector<20x128xf32> to vector<1x128xf32>
    %240 = arith.maximumf %238, %239 : vector<1x128xf32>
    %241 = vector.extract_strided_slice %209 {offsets = [13, 0], sizes = [1, 128], strides = [1, 1]} : vector<20x128xf32> to vector<1x128xf32>
    %242 = arith.maximumf %240, %241 : vector<1x128xf32>
    %243 = vector.extract_strided_slice %209 {offsets = [13, 0], sizes = [1, 128], strides = [1, 1]} : vector<20x128xf32> to vector<1x128xf32>
    %244 = vector.extract_strided_slice %209 {offsets = [14, 0], sizes = [1, 128], strides = [1, 1]} : vector<20x128xf32> to vector<1x128xf32>
    %245 = arith.maximumf %243, %244 : vector<1x128xf32>
    %246 = vector.extract_strided_slice %209 {offsets = [15, 0], sizes = [1, 128], strides = [1, 1]} : vector<20x128xf32> to vector<1x128xf32>
    %247 = arith.maximumf %245, %246 : vector<1x128xf32>
    %248 = vector.extract_strided_slice %209 {offsets = [15, 0], sizes = [1, 128], strides = [1, 1]} : vector<20x128xf32> to vector<1x128xf32>
    %249 = vector.extract_strided_slice %209 {offsets = [16, 0], sizes = [1, 128], strides = [1, 1]} : vector<20x128xf32> to vector<1x128xf32>
    %250 = arith.maximumf %248, %249 : vector<1x128xf32>
    %251 = vector.extract_strided_slice %209 {offsets = [17, 0], sizes = [1, 128], strides = [1, 1]} : vector<20x128xf32> to vector<1x128xf32>
    %252 = arith.maximumf %250, %251 : vector<1x128xf32>
    %253 = vector.extract_strided_slice %209 {offsets = [17, 0], sizes = [1, 128], strides = [1, 1]} : vector<20x128xf32> to vector<1x128xf32>
    %254 = vector.extract_strided_slice %209 {offsets = [18, 0], sizes = [1, 128], strides = [1, 1]} : vector<20x128xf32> to vector<1x128xf32>
    %255 = arith.maximumf %253, %254 : vector<1x128xf32>
    %256 = vector.extract_strided_slice %209 {offsets = [19, 0], sizes = [1, 128], strides = [1, 1]} : vector<20x128xf32> to vector<1x128xf32>
    %257 = arith.maximumf %255, %256 : vector<1x128xf32>
    %258 = tpu.concatenate %212, %217, %222, %227, %232, %237, %242, %247, %252, %257 in 0 : vector<1x128xf32>, vector<1x128xf32>, vector<1x128xf32>, vector<1x128xf32>, vector<1x128xf32>, vector<1x128xf32>, vector<1x128xf32>, vector<1x128xf32>, vector<1x128xf32>, vector<1x128xf32> -> vector<10x128xf32>
    %c49 = arith.constant 49 : index
    %c0_60 = arith.constant 0 : index
    %259 = vector.load %arg10[%c49, %c0_60] : memref<144x128xf32, #tpu.memory_space<vmem>>, vector<10x128xf32>
    tpu.vector_store %arg10[%c49, %c0_60], %258 {strides = array<i32>} : memref<144x128xf32, #tpu.memory_space<vmem>>, vector<10x128xf32>,
    %c140_61 = arith.constant 140 : index
    %c0_62 = arith.constant 0 : index
    %260 = vector.load %arg9[%c140_61, %c0_62] : memref<400x128xf32, #tpu.memory_space<vmem>>, vector<20x128xf32>
    %c160 = arith.constant 160 : index
    %c0_63 = arith.constant 0 : index
    %261 = vector.load %arg9[%c160, %c0_63] : memref<400x128xf32, #tpu.memory_space<vmem>>, vector<20x128xf32>
    %262 = arith.maximumf %260, %261 : vector<20x128xf32>
    %c180 = arith.constant 180 : index
    %c0_64 = arith.constant 0 : index
    %263 = vector.load %arg9[%c180, %c0_64] : memref<400x128xf32, #tpu.memory_space<vmem>>, vector<20x128xf32>
    %264 = arith.maximumf %262, %263 : vector<20x128xf32>
    %265 = vector.extract_strided_slice %264 {offsets = [0, 0], sizes = [1, 128], strides = [1, 1]} : vector<20x128xf32> to vector<1x128xf32>
    %266 = vector.extract_strided_slice %264 {offsets = [1, 0], sizes = [1, 128], strides = [1, 1]} : vector<20x128xf32> to vector<1x128xf32>
    %267 = arith.maximumf %265, %266 : vector<1x128xf32>
    %268 = vector.extract_strided_slice %264 {offsets = [1, 0], sizes = [1, 128], strides = [1, 1]} : vector<20x128xf32> to vector<1x128xf32>
    %269 = vector.extract_strided_slice %264 {offsets = [2, 0], sizes = [1, 128], strides = [1, 1]} : vector<20x128xf32> to vector<1x128xf32>
    %270 = arith.maximumf %268, %269 : vector<1x128xf32>
    %271 = vector.extract_strided_slice %264 {offsets = [3, 0], sizes = [1, 128], strides = [1, 1]} : vector<20x128xf32> to vector<1x128xf32>
    %272 = arith.maximumf %270, %271 : vector<1x128xf32>
    %273 = vector.extract_strided_slice %264 {offsets = [3, 0], sizes = [1, 128], strides = [1, 1]} : vector<20x128xf32> to vector<1x128xf32>
    %274 = vector.extract_strided_slice %264 {offsets = [4, 0], sizes = [1, 128], strides = [1, 1]} : vector<20x128xf32> to vector<1x128xf32>
    %275 = arith.maximumf %273, %274 : vector<1x128xf32>
    %276 = vector.extract_strided_slice %264 {offsets = [5, 0], sizes = [1, 128], strides = [1, 1]} : vector<20x128xf32> to vector<1x128xf32>
    %277 = arith.maximumf %275, %276 : vector<1x128xf32>
    %278 = vector.extract_strided_slice %264 {offsets = [5, 0], sizes = [1, 128], strides = [1, 1]} : vector<20x128xf32> to vector<1x128xf32>
    %279 = vector.extract_strided_slice %264 {offsets = [6, 0], sizes = [1, 128], strides = [1, 1]} : vector<20x128xf32> to vector<1x128xf32>
    %280 = arith.maximumf %278, %279 : vector<1x128xf32>
    %281 = vector.extract_strided_slice %264 {offsets = [7, 0], sizes = [1, 128], strides = [1, 1]} : vector<20x128xf32> to vector<1x128xf32>
    %282 = arith.maximumf %280, %281 : vector<1x128xf32>
    %283 = vector.extract_strided_slice %264 {offsets = [7, 0], sizes = [1, 128], strides = [1, 1]} : vector<20x128xf32> to vector<1x128xf32>
    %284 = vector.extract_strided_slice %264 {offsets = [8, 0], sizes = [1, 128], strides = [1, 1]} : vector<20x128xf32> to vector<1x128xf32>
    %285 = arith.maximumf %283, %284 : vector<1x128xf32>
    %286 = vector.extract_strided_slice %264 {offsets = [9, 0], sizes = [1, 128], strides = [1, 1]} : vector<20x128xf32> to vector<1x128xf32>
    %287 = arith.maximumf %285, %286 : vector<1x128xf32>
    %288 = vector.extract_strided_slice %264 {offsets = [9, 0], sizes = [1, 128], strides = [1, 1]} : vector<20x128xf32> to vector<1x128xf32>
    %289 = vector.extract_strided_slice %264 {offsets = [10, 0], sizes = [1, 128], strides = [1, 1]} : vector<20x128xf32> to vector<1x128xf32>
    %290 = arith.maximumf %288, %289 : vector<1x128xf32>
    %291 = vector.extract_strided_slice %264 {offsets = [11, 0], sizes = [1, 128], strides = [1, 1]} : vector<20x128xf32> to vector<1x128xf32>
    %292 = arith.maximumf %290, %291 : vector<1x128xf32>
    %293 = vector.extract_strided_slice %264 {offsets = [11, 0], sizes = [1, 128], strides = [1, 1]} : vector<20x128xf32> to vector<1x128xf32>
    %294 = vector.extract_strided_slice %264 {offsets = [12, 0], sizes = [1, 128], strides = [1, 1]} : vector<20x128xf32> to vector<1x128xf32>
    %295 = arith.maximumf %293, %294 : vector<1x128xf32>
    %296 = vector.extract_strided_slice %264 {offsets = [13, 0], sizes = [1, 128], strides = [1, 1]} : vector<20x128xf32> to vector<1x128xf32>
    %297 = arith.maximumf %295, %296 : vector<1x128xf32>
    %298 = vector.extract_strided_slice %264 {offsets = [13, 0], sizes = [1, 128], strides = [1, 1]} : vector<20x128xf32> to vector<1x128xf32>
    %299 = vector.extract_strided_slice %264 {offsets = [14, 0], sizes = [1, 128], strides = [1, 1]} : vector<20x128xf32> to vector<1x128xf32>
    %300 = arith.maximumf %298, %299 : vector<1x128xf32>
    %301 = vector.extract_strided_slice %264 {offsets = [15, 0], sizes = [1, 128], strides = [1, 1]} : vector<20x128xf32> to vector<1x128xf32>
    %302 = arith.maximumf %300, %301 : vector<1x128xf32>
    %303 = vector.extract_strided_slice %264 {offsets = [15, 0], sizes = [1, 128], strides = [1, 1]} : vector<20x128xf32> to vector<1x128xf32>
    %304 = vector.extract_strided_slice %264 {offsets = [16, 0], sizes = [1, 128], strides = [1, 1]} : vector<20x128xf32> to vector<1x128xf32>
    %305 = arith.maximumf %303, %304 : vector<1x128xf32>
    %306 = vector.extract_strided_slice %264 {offsets = [17, 0], sizes = [1, 128], strides = [1, 1]} : vector<20x128xf32> to vector<1x128xf32>
    %307 = arith.maximumf %305, %306 : vector<1x128xf32>
    %308 = vector.extract_strided_slice %264 {offsets = [17, 0], sizes = [1, 128], strides = [1, 1]} : vector<20x128xf32> to vector<1x128xf32>
    %309 = vector.extract_strided_slice %264 {offsets = [18, 0], sizes = [1, 128], strides = [1, 1]} : vector<20x128xf32> to vector<1x128xf32>
    %310 = arith.maximumf %308, %309 : vector<1x128xf32>
    %311 = vector.extract_strided_slice %264 {offsets = [19, 0], sizes = [1, 128], strides = [1, 1]} : vector<20x128xf32> to vector<1x128xf32>
    %312 = arith.maximumf %310, %311 : vector<1x128xf32>
    %313 = tpu.concatenate %267, %272, %277, %282, %287, %292, %297, %302, %307, %312 in 0 : vector<1x128xf32>, vector<1x128xf32>, vector<1x128xf32>, vector<1x128xf32>, vector<1x128xf32>, vector<1x128xf32>, vector<1x128xf32>, vector<1x128xf32>, vector<1x128xf32>, vector<1x128xf32> -> vector<10x128xf32>
    %c61 = arith.constant 61 : index
    %c0_65 = arith.constant 0 : index
    %314 = vector.load %arg10[%c61, %c0_65] : memref<144x128xf32, #tpu.memory_space<vmem>>, vector<10x128xf32>
    tpu.vector_store %arg10[%c61, %c0_65], %313 {strides = array<i32>} : memref<144x128xf32, #tpu.memory_space<vmem>>, vector<10x128xf32>,
    %c180_66 = arith.constant 180 : index
    %c0_67 = arith.constant 0 : index
    %315 = vector.load %arg9[%c180_66, %c0_67] : memref<400x128xf32, #tpu.memory_space<vmem>>, vector<20x128xf32>
    %c200 = arith.constant 200 : index
    %c0_68 = arith.constant 0 : index
    %316 = vector.load %arg9[%c200, %c0_68] : memref<400x128xf32, #tpu.memory_space<vmem>>, vector<20x128xf32>
    %317 = arith.maximumf %315, %316 : vector<20x128xf32>
    %c220 = arith.constant 220 : index
    %c0_69 = arith.constant 0 : index
    %318 = vector.load %arg9[%c220, %c0_69] : memref<400x128xf32, #tpu.memory_space<vmem>>, vector<20x128xf32>
    %319 = arith.maximumf %317, %318 : vector<20x128xf32>
    %320 = vector.extract_strided_slice %319 {offsets = [0, 0], sizes = [1, 128], strides = [1, 1]} : vector<20x128xf32> to vector<1x128xf32>
    %321 = vector.extract_strided_slice %319 {offsets = [1, 0], sizes = [1, 128], strides = [1, 1]} : vector<20x128xf32> to vector<1x128xf32>
    %322 = arith.maximumf %320, %321 : vector<1x128xf32>
    %323 = vector.extract_strided_slice %319 {offsets = [1, 0], sizes = [1, 128], strides = [1, 1]} : vector<20x128xf32> to vector<1x128xf32>
    %324 = vector.extract_strided_slice %319 {offsets = [2, 0], sizes = [1, 128], strides = [1, 1]} : vector<20x128xf32> to vector<1x128xf32>
    %325 = arith.maximumf %323, %324 : vector<1x128xf32>
    %326 = vector.extract_strided_slice %319 {offsets = [3, 0], sizes = [1, 128], strides = [1, 1]} : vector<20x128xf32> to vector<1x128xf32>
    %327 = arith.maximumf %325, %326 : vector<1x128xf32>
    %328 = vector.extract_strided_slice %319 {offsets = [3, 0], sizes = [1, 128], strides = [1, 1]} : vector<20x128xf32> to vector<1x128xf32>
    %329 = vector.extract_strided_slice %319 {offsets = [4, 0], sizes = [1, 128], strides = [1, 1]} : vector<20x128xf32> to vector<1x128xf32>
    %330 = arith.maximumf %328, %329 : vector<1x128xf32>
    %331 = vector.extract_strided_slice %319 {offsets = [5, 0], sizes = [1, 128], strides = [1, 1]} : vector<20x128xf32> to vector<1x128xf32>
    %332 = arith.maximumf %330, %331 : vector<1x128xf32>
    %333 = vector.extract_strided_slice %319 {offsets = [5, 0], sizes = [1, 128], strides = [1, 1]} : vector<20x128xf32> to vector<1x128xf32>
    %334 = vector.extract_strided_slice %319 {offsets = [6, 0], sizes = [1, 128], strides = [1, 1]} : vector<20x128xf32> to vector<1x128xf32>
    %335 = arith.maximumf %333, %334 : vector<1x128xf32>
    %336 = vector.extract_strided_slice %319 {offsets = [7, 0], sizes = [1, 128], strides = [1, 1]} : vector<20x128xf32> to vector<1x128xf32>
    %337 = arith.maximumf %335, %336 : vector<1x128xf32>
    %338 = vector.extract_strided_slice %319 {offsets = [7, 0], sizes = [1, 128], strides = [1, 1]} : vector<20x128xf32> to vector<1x128xf32>
    %339 = vector.extract_strided_slice %319 {offsets = [8, 0], sizes = [1, 128], strides = [1, 1]} : vector<20x128xf32> to vector<1x128xf32>
    %340 = arith.maximumf %338, %339 : vector<1x128xf32>
    %341 = vector.extract_strided_slice %319 {offsets = [9, 0], sizes = [1, 128], strides = [1, 1]} : vector<20x128xf32> to vector<1x128xf32>
    %342 = arith.maximumf %340, %341 : vector<1x128xf32>
    %343 = vector.extract_strided_slice %319 {offsets = [9, 0], sizes = [1, 128], strides = [1, 1]} : vector<20x128xf32> to vector<1x128xf32>
    %344 = vector.extract_strided_slice %319 {offsets = [10, 0], sizes = [1, 128], strides = [1, 1]} : vector<20x128xf32> to vector<1x128xf32>
    %345 = arith.maximumf %343, %344 : vector<1x128xf32>
    %346 = vector.extract_strided_slice %319 {offsets = [11, 0], sizes = [1, 128], strides = [1, 1]} : vector<20x128xf32> to vector<1x128xf32>
    %347 = arith.maximumf %345, %346 : vector<1x128xf32>
    %348 = vector.extract_strided_slice %319 {offsets = [11, 0], sizes = [1, 128], strides = [1, 1]} : vector<20x128xf32> to vector<1x128xf32>
    %349 = vector.extract_strided_slice %319 {offsets = [12, 0], sizes = [1, 128], strides = [1, 1]} : vector<20x128xf32> to vector<1x128xf32>
    %350 = arith.maximumf %348, %349 : vector<1x128xf32>
    %351 = vector.extract_strided_slice %319 {offsets = [13, 0], sizes = [1, 128], strides = [1, 1]} : vector<20x128xf32> to vector<1x128xf32>
    %352 = arith.maximumf %350, %351 : vector<1x128xf32>
    %353 = vector.extract_strided_slice %319 {offsets = [13, 0], sizes = [1, 128], strides = [1, 1]} : vector<20x128xf32> to vector<1x128xf32>
    %354 = vector.extract_strided_slice %319 {offsets = [14, 0], sizes = [1, 128], strides = [1, 1]} : vector<20x128xf32> to vector<1x128xf32>
    %355 = arith.maximumf %353, %354 : vector<1x128xf32>
    %356 = vector.extract_strided_slice %319 {offsets = [15, 0], sizes = [1, 128], strides = [1, 1]} : vector<20x128xf32> to vector<1x128xf32>
    %357 = arith.maximumf %355, %356 : vector<1x128xf32>
    %358 = vector.extract_strided_slice %319 {offsets = [15, 0], sizes = [1, 128], strides = [1, 1]} : vector<20x128xf32> to vector<1x128xf32>
    %359 = vector.extract_strided_slice %319 {offsets = [16, 0], sizes = [1, 128], strides = [1, 1]} : vector<20x128xf32> to vector<1x128xf32>
    %360 = arith.maximumf %358, %359 : vector<1x128xf32>
    %361 = vector.extract_strided_slice %319 {offsets = [17, 0], sizes = [1, 128], strides = [1, 1]} : vector<20x128xf32> to vector<1x128xf32>
    %362 = arith.maximumf %360, %361 : vector<1x128xf32>
    %363 = vector.extract_strided_slice %319 {offsets = [17, 0], sizes = [1, 128], strides = [1, 1]} : vector<20x128xf32> to vector<1x128xf32>
    %364 = vector.extract_strided_slice %319 {offsets = [18, 0], sizes = [1, 128], strides = [1, 1]} : vector<20x128xf32> to vector<1x128xf32>
    %365 = arith.maximumf %363, %364 : vector<1x128xf32>
    %366 = vector.extract_strided_slice %319 {offsets = [19, 0], sizes = [1, 128], strides = [1, 1]} : vector<20x128xf32> to vector<1x128xf32>
    %367 = arith.maximumf %365, %366 : vector<1x128xf32>
    %368 = tpu.concatenate %322, %327, %332, %337, %342, %347, %352, %357, %362, %367 in 0 : vector<1x128xf32>, vector<1x128xf32>, vector<1x128xf32>, vector<1x128xf32>, vector<1x128xf32>, vector<1x128xf32>, vector<1x128xf32>, vector<1x128xf32>, vector<1x128xf32>, vector<1x128xf32> -> vector<10x128xf32>
    %c73 = arith.constant 73 : index
    %c0_70 = arith.constant 0 : index
    %369 = vector.load %arg10[%c73, %c0_70] : memref<144x128xf32, #tpu.memory_space<vmem>>, vector<10x128xf32>
    tpu.vector_store %arg10[%c73, %c0_70], %368 {strides = array<i32>} : memref<144x128xf32, #tpu.memory_space<vmem>>, vector<10x128xf32>,
    %c220_71 = arith.constant 220 : index
    %c0_72 = arith.constant 0 : index
    %370 = vector.load %arg9[%c220_71, %c0_72] : memref<400x128xf32, #tpu.memory_space<vmem>>, vector<20x128xf32>
    %c240 = arith.constant 240 : index
    %c0_73 = arith.constant 0 : index
    %371 = vector.load %arg9[%c240, %c0_73] : memref<400x128xf32, #tpu.memory_space<vmem>>, vector<20x128xf32>
    %372 = arith.maximumf %370, %371 : vector<20x128xf32>
    %c260 = arith.constant 260 : index
    %c0_74 = arith.constant 0 : index
    %373 = vector.load %arg9[%c260, %c0_74] : memref<400x128xf32, #tpu.memory_space<vmem>>, vector<20x128xf32>
    %374 = arith.maximumf %372, %373 : vector<20x128xf32>
    %375 = vector.extract_strided_slice %374 {offsets = [0, 0], sizes = [1, 128], strides = [1, 1]} : vector<20x128xf32> to vector<1x128xf32>
    %376 = vector.extract_strided_slice %374 {offsets = [1, 0], sizes = [1, 128], strides = [1, 1]} : vector<20x128xf32> to vector<1x128xf32>
    %377 = arith.maximumf %375, %376 : vector<1x128xf32>
    %378 = vector.extract_strided_slice %374 {offsets = [1, 0], sizes = [1, 128], strides = [1, 1]} : vector<20x128xf32> to vector<1x128xf32>
    %379 = vector.extract_strided_slice %374 {offsets = [2, 0], sizes = [1, 128], strides = [1, 1]} : vector<20x128xf32> to vector<1x128xf32>
    %380 = arith.maximumf %378, %379 : vector<1x128xf32>
    %381 = vector.extract_strided_slice %374 {offsets = [3, 0], sizes = [1, 128], strides = [1, 1]} : vector<20x128xf32> to vector<1x128xf32>
    %382 = arith.maximumf %380, %381 : vector<1x128xf32>
    %383 = vector.extract_strided_slice %374 {offsets = [3, 0], sizes = [1, 128], strides = [1, 1]} : vector<20x128xf32> to vector<1x128xf32>
    %384 = vector.extract_strided_slice %374 {offsets = [4, 0], sizes = [1, 128], strides = [1, 1]} : vector<20x128xf32> to vector<1x128xf32>
    %385 = arith.maximumf %383, %384 : vector<1x128xf32>
    %386 = vector.extract_strided_slice %374 {offsets = [5, 0], sizes = [1, 128], strides = [1, 1]} : vector<20x128xf32> to vector<1x128xf32>
    %387 = arith.maximumf %385, %386 : vector<1x128xf32>
    %388 = vector.extract_strided_slice %374 {offsets = [5, 0], sizes = [1, 128], strides = [1, 1]} : vector<20x128xf32> to vector<1x128xf32>
    %389 = vector.extract_strided_slice %374 {offsets = [6, 0], sizes = [1, 128], strides = [1, 1]} : vector<20x128xf32> to vector<1x128xf32>
    %390 = arith.maximumf %388, %389 : vector<1x128xf32>
    %391 = vector.extract_strided_slice %374 {offsets = [7, 0], sizes = [1, 128], strides = [1, 1]} : vector<20x128xf32> to vector<1x128xf32>
    %392 = arith.maximumf %390, %391 : vector<1x128xf32>
    %393 = vector.extract_strided_slice %374 {offsets = [7, 0], sizes = [1, 128], strides = [1, 1]} : vector<20x128xf32> to vector<1x128xf32>
    %394 = vector.extract_strided_slice %374 {offsets = [8, 0], sizes = [1, 128], strides = [1, 1]} : vector<20x128xf32> to vector<1x128xf32>
    %395 = arith.maximumf %393, %394 : vector<1x128xf32>
    %396 = vector.extract_strided_slice %374 {offsets = [9, 0], sizes = [1, 128], strides = [1, 1]} : vector<20x128xf32> to vector<1x128xf32>
    %397 = arith.maximumf %395, %396 : vector<1x128xf32>
    %398 = vector.extract_strided_slice %374 {offsets = [9, 0], sizes = [1, 128], strides = [1, 1]} : vector<20x128xf32> to vector<1x128xf32>
    %399 = vector.extract_strided_slice %374 {offsets = [10, 0], sizes = [1, 128], strides = [1, 1]} : vector<20x128xf32> to vector<1x128xf32>
    %400 = arith.maximumf %398, %399 : vector<1x128xf32>
    %401 = vector.extract_strided_slice %374 {offsets = [11, 0], sizes = [1, 128], strides = [1, 1]} : vector<20x128xf32> to vector<1x128xf32>
    %402 = arith.maximumf %400, %401 : vector<1x128xf32>
    %403 = vector.extract_strided_slice %374 {offsets = [11, 0], sizes = [1, 128], strides = [1, 1]} : vector<20x128xf32> to vector<1x128xf32>
    %404 = vector.extract_strided_slice %374 {offsets = [12, 0], sizes = [1, 128], strides = [1, 1]} : vector<20x128xf32> to vector<1x128xf32>
    %405 = arith.maximumf %403, %404 : vector<1x128xf32>
    %406 = vector.extract_strided_slice %374 {offsets = [13, 0], sizes = [1, 128], strides = [1, 1]} : vector<20x128xf32> to vector<1x128xf32>
    %407 = arith.maximumf %405, %406 : vector<1x128xf32>
    %408 = vector.extract_strided_slice %374 {offsets = [13, 0], sizes = [1, 128], strides = [1, 1]} : vector<20x128xf32> to vector<1x128xf32>
    %409 = vector.extract_strided_slice %374 {offsets = [14, 0], sizes = [1, 128], strides = [1, 1]} : vector<20x128xf32> to vector<1x128xf32>
    %410 = arith.maximumf %408, %409 : vector<1x128xf32>
    %411 = vector.extract_strided_slice %374 {offsets = [15, 0], sizes = [1, 128], strides = [1, 1]} : vector<20x128xf32> to vector<1x128xf32>
    %412 = arith.maximumf %410, %411 : vector<1x128xf32>
    %413 = vector.extract_strided_slice %374 {offsets = [15, 0], sizes = [1, 128], strides = [1, 1]} : vector<20x128xf32> to vector<1x128xf32>
    %414 = vector.extract_strided_slice %374 {offsets = [16, 0], sizes = [1, 128], strides = [1, 1]} : vector<20x128xf32> to vector<1x128xf32>
    %415 = arith.maximumf %413, %414 : vector<1x128xf32>
    %416 = vector.extract_strided_slice %374 {offsets = [17, 0], sizes = [1, 128], strides = [1, 1]} : vector<20x128xf32> to vector<1x128xf32>
    %417 = arith.maximumf %415, %416 : vector<1x128xf32>
    %418 = vector.extract_strided_slice %374 {offsets = [17, 0], sizes = [1, 128], strides = [1, 1]} : vector<20x128xf32> to vector<1x128xf32>
    %419 = vector.extract_strided_slice %374 {offsets = [18, 0], sizes = [1, 128], strides = [1, 1]} : vector<20x128xf32> to vector<1x128xf32>
    %420 = arith.maximumf %418, %419 : vector<1x128xf32>
    %421 = vector.extract_strided_slice %374 {offsets = [19, 0], sizes = [1, 128], strides = [1, 1]} : vector<20x128xf32> to vector<1x128xf32>
    %422 = arith.maximumf %420, %421 : vector<1x128xf32>
    %423 = tpu.concatenate %377, %382, %387, %392, %397, %402, %407, %412, %417, %422 in 0 : vector<1x128xf32>, vector<1x128xf32>, vector<1x128xf32>, vector<1x128xf32>, vector<1x128xf32>, vector<1x128xf32>, vector<1x128xf32>, vector<1x128xf32>, vector<1x128xf32>, vector<1x128xf32> -> vector<10x128xf32>
    %c85 = arith.constant 85 : index
    %c0_75 = arith.constant 0 : index
    %424 = vector.load %arg10[%c85, %c0_75] : memref<144x128xf32, #tpu.memory_space<vmem>>, vector<10x128xf32>
    tpu.vector_store %arg10[%c85, %c0_75], %423 {strides = array<i32>} : memref<144x128xf32, #tpu.memory_space<vmem>>, vector<10x128xf32>,
    %c260_76 = arith.constant 260 : index
    %c0_77 = arith.constant 0 : index
    %425 = vector.load %arg9[%c260_76, %c0_77] : memref<400x128xf32, #tpu.memory_space<vmem>>, vector<20x128xf32>
    %c280 = arith.constant 280 : index
    %c0_78 = arith.constant 0 : index
    %426 = vector.load %arg9[%c280, %c0_78] : memref<400x128xf32, #tpu.memory_space<vmem>>, vector<20x128xf32>
    %427 = arith.maximumf %425, %426 : vector<20x128xf32>
    %c300 = arith.constant 300 : index
    %c0_79 = arith.constant 0 : index
    %428 = vector.load %arg9[%c300, %c0_79] : memref<400x128xf32, #tpu.memory_space<vmem>>, vector<20x128xf32>
    %429 = arith.maximumf %427, %428 : vector<20x128xf32>
    %430 = vector.extract_strided_slice %429 {offsets = [0, 0], sizes = [1, 128], strides = [1, 1]} : vector<20x128xf32> to vector<1x128xf32>
    %431 = vector.extract_strided_slice %429 {offsets = [1, 0], sizes = [1, 128], strides = [1, 1]} : vector<20x128xf32> to vector<1x128xf32>
    %432 = arith.maximumf %430, %431 : vector<1x128xf32>
    %433 = vector.extract_strided_slice %429 {offsets = [1, 0], sizes = [1, 128], strides = [1, 1]} : vector<20x128xf32> to vector<1x128xf32>
    %434 = vector.extract_strided_slice %429 {offsets = [2, 0], sizes = [1, 128], strides = [1, 1]} : vector<20x128xf32> to vector<1x128xf32>
    %435 = arith.maximumf %433, %434 : vector<1x128xf32>
    %436 = vector.extract_strided_slice %429 {offsets = [3, 0], sizes = [1, 128], strides = [1, 1]} : vector<20x128xf32> to vector<1x128xf32>
    %437 = arith.maximumf %435, %436 : vector<1x128xf32>
    %438 = vector.extract_strided_slice %429 {offsets = [3, 0], sizes = [1, 128], strides = [1, 1]} : vector<20x128xf32> to vector<1x128xf32>
    %439 = vector.extract_strided_slice %429 {offsets = [4, 0], sizes = [1, 128], strides = [1, 1]} : vector<20x128xf32> to vector<1x128xf32>
    %440 = arith.maximumf %438, %439 : vector<1x128xf32>
    %441 = vector.extract_strided_slice %429 {offsets = [5, 0], sizes = [1, 128], strides = [1, 1]} : vector<20x128xf32> to vector<1x128xf32>
    %442 = arith.maximumf %440, %441 : vector<1x128xf32>
    %443 = vector.extract_strided_slice %429 {offsets = [5, 0], sizes = [1, 128], strides = [1, 1]} : vector<20x128xf32> to vector<1x128xf32>
    %444 = vector.extract_strided_slice %429 {offsets = [6, 0], sizes = [1, 128], strides = [1, 1]} : vector<20x128xf32> to vector<1x128xf32>
    %445 = arith.maximumf %443, %444 : vector<1x128xf32>
    %446 = vector.extract_strided_slice %429 {offsets = [7, 0], sizes = [1, 128], strides = [1, 1]} : vector<20x128xf32> to vector<1x128xf32>
    %447 = arith.maximumf %445, %446 : vector<1x128xf32>
    %448 = vector.extract_strided_slice %429 {offsets = [7, 0], sizes = [1, 128], strides = [1, 1]} : vector<20x128xf32> to vector<1x128xf32>
    %449 = vector.extract_strided_slice %429 {offsets = [8, 0], sizes = [1, 128], strides = [1, 1]} : vector<20x128xf32> to vector<1x128xf32>
    %450 = arith.maximumf %448, %449 : vector<1x128xf32>
    %451 = vector.extract_strided_slice %429 {offsets = [9, 0], sizes = [1, 128], strides = [1, 1]} : vector<20x128xf32> to vector<1x128xf32>
    %452 = arith.maximumf %450, %451 : vector<1x128xf32>
    %453 = vector.extract_strided_slice %429 {offsets = [9, 0], sizes = [1, 128], strides = [1, 1]} : vector<20x128xf32> to vector<1x128xf32>
    %454 = vector.extract_strided_slice %429 {offsets = [10, 0], sizes = [1, 128], strides = [1, 1]} : vector<20x128xf32> to vector<1x128xf32>
    %455 = arith.maximumf %453, %454 : vector<1x128xf32>
    %456 = vector.extract_strided_slice %429 {offsets = [11, 0], sizes = [1, 128], strides = [1, 1]} : vector<20x128xf32> to vector<1x128xf32>
    %457 = arith.maximumf %455, %456 : vector<1x128xf32>
    %458 = vector.extract_strided_slice %429 {offsets = [11, 0], sizes = [1, 128], strides = [1, 1]} : vector<20x128xf32> to vector<1x128xf32>
    %459 = vector.extract_strided_slice %429 {offsets = [12, 0], sizes = [1, 128], strides = [1, 1]} : vector<20x128xf32> to vector<1x128xf32>
    %460 = arith.maximumf %458, %459 : vector<1x128xf32>
    %461 = vector.extract_strided_slice %429 {offsets = [13, 0], sizes = [1, 128], strides = [1, 1]} : vector<20x128xf32> to vector<1x128xf32>
    %462 = arith.maximumf %460, %461 : vector<1x128xf32>
    %463 = vector.extract_strided_slice %429 {offsets = [13, 0], sizes = [1, 128], strides = [1, 1]} : vector<20x128xf32> to vector<1x128xf32>
    %464 = vector.extract_strided_slice %429 {offsets = [14, 0], sizes = [1, 128], strides = [1, 1]} : vector<20x128xf32> to vector<1x128xf32>
    %465 = arith.maximumf %463, %464 : vector<1x128xf32>
    %466 = vector.extract_strided_slice %429 {offsets = [15, 0], sizes = [1, 128], strides = [1, 1]} : vector<20x128xf32> to vector<1x128xf32>
    %467 = arith.maximumf %465, %466 : vector<1x128xf32>
    %468 = vector.extract_strided_slice %429 {offsets = [15, 0], sizes = [1, 128], strides = [1, 1]} : vector<20x128xf32> to vector<1x128xf32>
    %469 = vector.extract_strided_slice %429 {offsets = [16, 0], sizes = [1, 128], strides = [1, 1]} : vector<20x128xf32> to vector<1x128xf32>
    %470 = arith.maximumf %468, %469 : vector<1x128xf32>
    %471 = vector.extract_strided_slice %429 {offsets = [17, 0], sizes = [1, 128], strides = [1, 1]} : vector<20x128xf32> to vector<1x128xf32>
    %472 = arith.maximumf %470, %471 : vector<1x128xf32>
    %473 = vector.extract_strided_slice %429 {offsets = [17, 0], sizes = [1, 128], strides = [1, 1]} : vector<20x128xf32> to vector<1x128xf32>
    %474 = vector.extract_strided_slice %429 {offsets = [18, 0], sizes = [1, 128], strides = [1, 1]} : vector<20x128xf32> to vector<1x128xf32>
    %475 = arith.maximumf %473, %474 : vector<1x128xf32>
    %476 = vector.extract_strided_slice %429 {offsets = [19, 0], sizes = [1, 128], strides = [1, 1]} : vector<20x128xf32> to vector<1x128xf32>
    %477 = arith.maximumf %475, %476 : vector<1x128xf32>
    %478 = tpu.concatenate %432, %437, %442, %447, %452, %457, %462, %467, %472, %477 in 0 : vector<1x128xf32>, vector<1x128xf32>, vector<1x128xf32>, vector<1x128xf32>, vector<1x128xf32>, vector<1x128xf32>, vector<1x128xf32>, vector<1x128xf32>, vector<1x128xf32>, vector<1x128xf32> -> vector<10x128xf32>
    %c97 = arith.constant 97 : index
    %c0_80 = arith.constant 0 : index
    %479 = vector.load %arg10[%c97, %c0_80] : memref<144x128xf32, #tpu.memory_space<vmem>>, vector<10x128xf32>
    tpu.vector_store %arg10[%c97, %c0_80], %478 {strides = array<i32>} : memref<144x128xf32, #tpu.memory_space<vmem>>, vector<10x128xf32>,
    %c300_81 = arith.constant 300 : index
    %c0_82 = arith.constant 0 : index
    %480 = vector.load %arg9[%c300_81, %c0_82] : memref<400x128xf32, #tpu.memory_space<vmem>>, vector<20x128xf32>
    %c320 = arith.constant 320 : index
    %c0_83 = arith.constant 0 : index
    %481 = vector.load %arg9[%c320, %c0_83] : memref<400x128xf32, #tpu.memory_space<vmem>>, vector<20x128xf32>
    %482 = arith.maximumf %480, %481 : vector<20x128xf32>
    %c340 = arith.constant 340 : index
    %c0_84 = arith.constant 0 : index
    %483 = vector.load %arg9[%c340, %c0_84] : memref<400x128xf32, #tpu.memory_space<vmem>>, vector<20x128xf32>
    %484 = arith.maximumf %482, %483 : vector<20x128xf32>
    %485 = vector.extract_strided_slice %484 {offsets = [0, 0], sizes = [1, 128], strides = [1, 1]} : vector<20x128xf32> to vector<1x128xf32>
    %486 = vector.extract_strided_slice %484 {offsets = [1, 0], sizes = [1, 128], strides = [1, 1]} : vector<20x128xf32> to vector<1x128xf32>
    %487 = arith.maximumf %485, %486 : vector<1x128xf32>
    %488 = vector.extract_strided_slice %484 {offsets = [1, 0], sizes = [1, 128], strides = [1, 1]} : vector<20x128xf32> to vector<1x128xf32>
    %489 = vector.extract_strided_slice %484 {offsets = [2, 0], sizes = [1, 128], strides = [1, 1]} : vector<20x128xf32> to vector<1x128xf32>
    %490 = arith.maximumf %488, %489 : vector<1x128xf32>
    %491 = vector.extract_strided_slice %484 {offsets = [3, 0], sizes = [1, 128], strides = [1, 1]} : vector<20x128xf32> to vector<1x128xf32>
    %492 = arith.maximumf %490, %491 : vector<1x128xf32>
    %493 = vector.extract_strided_slice %484 {offsets = [3, 0], sizes = [1, 128], strides = [1, 1]} : vector<20x128xf32> to vector<1x128xf32>
    %494 = vector.extract_strided_slice %484 {offsets = [4, 0], sizes = [1, 128], strides = [1, 1]} : vector<20x128xf32> to vector<1x128xf32>
    %495 = arith.maximumf %493, %494 : vector<1x128xf32>
    %496 = vector.extract_strided_slice %484 {offsets = [5, 0], sizes = [1, 128], strides = [1, 1]} : vector<20x128xf32> to vector<1x128xf32>
    %497 = arith.maximumf %495, %496 : vector<1x128xf32>
    %498 = vector.extract_strided_slice %484 {offsets = [5, 0], sizes = [1, 128], strides = [1, 1]} : vector<20x128xf32> to vector<1x128xf32>
    %499 = vector.extract_strided_slice %484 {offsets = [6, 0], sizes = [1, 128], strides = [1, 1]} : vector<20x128xf32> to vector<1x128xf32>
    %500 = arith.maximumf %498, %499 : vector<1x128xf32>
    %501 = vector.extract_strided_slice %484 {offsets = [7, 0], sizes = [1, 128], strides = [1, 1]} : vector<20x128xf32> to vector<1x128xf32>
    %502 = arith.maximumf %500, %501 : vector<1x128xf32>
    %503 = vector.extract_strided_slice %484 {offsets = [7, 0], sizes = [1, 128], strides = [1, 1]} : vector<20x128xf32> to vector<1x128xf32>
    %504 = vector.extract_strided_slice %484 {offsets = [8, 0], sizes = [1, 128], strides = [1, 1]} : vector<20x128xf32> to vector<1x128xf32>
    %505 = arith.maximumf %503, %504 : vector<1x128xf32>
    %506 = vector.extract_strided_slice %484 {offsets = [9, 0], sizes = [1, 128], strides = [1, 1]} : vector<20x128xf32> to vector<1x128xf32>
    %507 = arith.maximumf %505, %506 : vector<1x128xf32>
    %508 = vector.extract_strided_slice %484 {offsets = [9, 0], sizes = [1, 128], strides = [1, 1]} : vector<20x128xf32> to vector<1x128xf32>
    %509 = vector.extract_strided_slice %484 {offsets = [10, 0], sizes = [1, 128], strides = [1, 1]} : vector<20x128xf32> to vector<1x128xf32>
    %510 = arith.maximumf %508, %509 : vector<1x128xf32>
    %511 = vector.extract_strided_slice %484 {offsets = [11, 0], sizes = [1, 128], strides = [1, 1]} : vector<20x128xf32> to vector<1x128xf32>
    %512 = arith.maximumf %510, %511 : vector<1x128xf32>
    %513 = vector.extract_strided_slice %484 {offsets = [11, 0], sizes = [1, 128], strides = [1, 1]} : vector<20x128xf32> to vector<1x128xf32>
    %514 = vector.extract_strided_slice %484 {offsets = [12, 0], sizes = [1, 128], strides = [1, 1]} : vector<20x128xf32> to vector<1x128xf32>
    %515 = arith.maximumf %513, %514 : vector<1x128xf32>
    %516 = vector.extract_strided_slice %484 {offsets = [13, 0], sizes = [1, 128], strides = [1, 1]} : vector<20x128xf32> to vector<1x128xf32>
    %517 = arith.maximumf %515, %516 : vector<1x128xf32>
    %518 = vector.extract_strided_slice %484 {offsets = [13, 0], sizes = [1, 128], strides = [1, 1]} : vector<20x128xf32> to vector<1x128xf32>
    %519 = vector.extract_strided_slice %484 {offsets = [14, 0], sizes = [1, 128], strides = [1, 1]} : vector<20x128xf32> to vector<1x128xf32>
    %520 = arith.maximumf %518, %519 : vector<1x128xf32>
    %521 = vector.extract_strided_slice %484 {offsets = [15, 0], sizes = [1, 128], strides = [1, 1]} : vector<20x128xf32> to vector<1x128xf32>
    %522 = arith.maximumf %520, %521 : vector<1x128xf32>
    %523 = vector.extract_strided_slice %484 {offsets = [15, 0], sizes = [1, 128], strides = [1, 1]} : vector<20x128xf32> to vector<1x128xf32>
    %524 = vector.extract_strided_slice %484 {offsets = [16, 0], sizes = [1, 128], strides = [1, 1]} : vector<20x128xf32> to vector<1x128xf32>
    %525 = arith.maximumf %523, %524 : vector<1x128xf32>
    %526 = vector.extract_strided_slice %484 {offsets = [17, 0], sizes = [1, 128], strides = [1, 1]} : vector<20x128xf32> to vector<1x128xf32>
    %527 = arith.maximumf %525, %526 : vector<1x128xf32>
    %528 = vector.extract_strided_slice %484 {offsets = [17, 0], sizes = [1, 128], strides = [1, 1]} : vector<20x128xf32> to vector<1x128xf32>
    %529 = vector.extract_strided_slice %484 {offsets = [18, 0], sizes = [1, 128], strides = [1, 1]} : vector<20x128xf32> to vector<1x128xf32>
    %530 = arith.maximumf %528, %529 : vector<1x128xf32>
    %531 = vector.extract_strided_slice %484 {offsets = [19, 0], sizes = [1, 128], strides = [1, 1]} : vector<20x128xf32> to vector<1x128xf32>
    %532 = arith.maximumf %530, %531 : vector<1x128xf32>
    %533 = tpu.concatenate %487, %492, %497, %502, %507, %512, %517, %522, %527, %532 in 0 : vector<1x128xf32>, vector<1x128xf32>, vector<1x128xf32>, vector<1x128xf32>, vector<1x128xf32>, vector<1x128xf32>, vector<1x128xf32>, vector<1x128xf32>, vector<1x128xf32>, vector<1x128xf32> -> vector<10x128xf32>
    %c109 = arith.constant 109 : index
    %c0_85 = arith.constant 0 : index
    %534 = vector.load %arg10[%c109, %c0_85] : memref<144x128xf32, #tpu.memory_space<vmem>>, vector<10x128xf32>
    tpu.vector_store %arg10[%c109, %c0_85], %533 {strides = array<i32>} : memref<144x128xf32, #tpu.memory_space<vmem>>, vector<10x128xf32>,
    %c340_86 = arith.constant 340 : index
    %c0_87 = arith.constant 0 : index
    %535 = vector.load %arg9[%c340_86, %c0_87] : memref<400x128xf32, #tpu.memory_space<vmem>>, vector<20x128xf32>
    %c360 = arith.constant 360 : index
    %c0_88 = arith.constant 0 : index
    %536 = vector.load %arg9[%c360, %c0_88] : memref<400x128xf32, #tpu.memory_space<vmem>>, vector<20x128xf32>
    %537 = arith.maximumf %535, %536 : vector<20x128xf32>
    %c380 = arith.constant 380 : index
    %c0_89 = arith.constant 0 : index
    %538 = vector.load %arg9[%c380, %c0_89] : memref<400x128xf32, #tpu.memory_space<vmem>>, vector<20x128xf32>
    %539 = arith.maximumf %537, %538 : vector<20x128xf32>
    %540 = vector.extract_strided_slice %539 {offsets = [0, 0], sizes = [1, 128], strides = [1, 1]} : vector<20x128xf32> to vector<1x128xf32>
    %541 = vector.extract_strided_slice %539 {offsets = [1, 0], sizes = [1, 128], strides = [1, 1]} : vector<20x128xf32> to vector<1x128xf32>
    %542 = arith.maximumf %540, %541 : vector<1x128xf32>
    %543 = vector.extract_strided_slice %539 {offsets = [1, 0], sizes = [1, 128], strides = [1, 1]} : vector<20x128xf32> to vector<1x128xf32>
    %544 = vector.extract_strided_slice %539 {offsets = [2, 0], sizes = [1, 128], strides = [1, 1]} : vector<20x128xf32> to vector<1x128xf32>
    %545 = arith.maximumf %543, %544 : vector<1x128xf32>
    %546 = vector.extract_strided_slice %539 {offsets = [3, 0], sizes = [1, 128], strides = [1, 1]} : vector<20x128xf32> to vector<1x128xf32>
    %547 = arith.maximumf %545, %546 : vector<1x128xf32>
    %548 = vector.extract_strided_slice %539 {offsets = [3, 0], sizes = [1, 128], strides = [1, 1]} : vector<20x128xf32> to vector<1x128xf32>
    %549 = vector.extract_strided_slice %539 {offsets = [4, 0], sizes = [1, 128], strides = [1, 1]} : vector<20x128xf32> to vector<1x128xf32>
    %550 = arith.maximumf %548, %549 : vector<1x128xf32>
    %551 = vector.extract_strided_slice %539 {offsets = [5, 0], sizes = [1, 128], strides = [1, 1]} : vector<20x128xf32> to vector<1x128xf32>
    %552 = arith.maximumf %550, %551 : vector<1x128xf32>
    %553 = vector.extract_strided_slice %539 {offsets = [5, 0], sizes = [1, 128], strides = [1, 1]} : vector<20x128xf32> to vector<1x128xf32>
    %554 = vector.extract_strided_slice %539 {offsets = [6, 0], sizes = [1, 128], strides = [1, 1]} : vector<20x128xf32> to vector<1x128xf32>
    %555 = arith.maximumf %553, %554 : vector<1x128xf32>
    %556 = vector.extract_strided_slice %539 {offsets = [7, 0], sizes = [1, 128], strides = [1, 1]} : vector<20x128xf32> to vector<1x128xf32>
    %557 = arith.maximumf %555, %556 : vector<1x128xf32>
    %558 = vector.extract_strided_slice %539 {offsets = [7, 0], sizes = [1, 128], strides = [1, 1]} : vector<20x128xf32> to vector<1x128xf32>
    %559 = vector.extract_strided_slice %539 {offsets = [8, 0], sizes = [1, 128], strides = [1, 1]} : vector<20x128xf32> to vector<1x128xf32>
    %560 = arith.maximumf %558, %559 : vector<1x128xf32>
    %561 = vector.extract_strided_slice %539 {offsets = [9, 0], sizes = [1, 128], strides = [1, 1]} : vector<20x128xf32> to vector<1x128xf32>
    %562 = arith.maximumf %560, %561 : vector<1x128xf32>
    %563 = vector.extract_strided_slice %539 {offsets = [9, 0], sizes = [1, 128], strides = [1, 1]} : vector<20x128xf32> to vector<1x128xf32>
    %564 = vector.extract_strided_slice %539 {offsets = [10, 0], sizes = [1, 128], strides = [1, 1]} : vector<20x128xf32> to vector<1x128xf32>
    %565 = arith.maximumf %563, %564 : vector<1x128xf32>
    %566 = vector.extract_strided_slice %539 {offsets = [11, 0], sizes = [1, 128], strides = [1, 1]} : vector<20x128xf32> to vector<1x128xf32>
    %567 = arith.maximumf %565, %566 : vector<1x128xf32>
    %568 = vector.extract_strided_slice %539 {offsets = [11, 0], sizes = [1, 128], strides = [1, 1]} : vector<20x128xf32> to vector<1x128xf32>
    %569 = vector.extract_strided_slice %539 {offsets = [12, 0], sizes = [1, 128], strides = [1, 1]} : vector<20x128xf32> to vector<1x128xf32>
    %570 = arith.maximumf %568, %569 : vector<1x128xf32>
    %571 = vector.extract_strided_slice %539 {offsets = [13, 0], sizes = [1, 128], strides = [1, 1]} : vector<20x128xf32> to vector<1x128xf32>
    %572 = arith.maximumf %570, %571 : vector<1x128xf32>
    %573 = vector.extract_strided_slice %539 {offsets = [13, 0], sizes = [1, 128], strides = [1, 1]} : vector<20x128xf32> to vector<1x128xf32>
    %574 = vector.extract_strided_slice %539 {offsets = [14, 0], sizes = [1, 128], strides = [1, 1]} : vector<20x128xf32> to vector<1x128xf32>
    %575 = arith.maximumf %573, %574 : vector<1x128xf32>
    %576 = vector.extract_strided_slice %539 {offsets = [15, 0], sizes = [1, 128], strides = [1, 1]} : vector<20x128xf32> to vector<1x128xf32>
    %577 = arith.maximumf %575, %576 : vector<1x128xf32>
    %578 = vector.extract_strided_slice %539 {offsets = [15, 0], sizes = [1, 128], strides = [1, 1]} : vector<20x128xf32> to vector<1x128xf32>
    %579 = vector.extract_strided_slice %539 {offsets = [16, 0], sizes = [1, 128], strides = [1, 1]} : vector<20x128xf32> to vector<1x128xf32>
    %580 = arith.maximumf %578, %579 : vector<1x128xf32>
    %581 = vector.extract_strided_slice %539 {offsets = [17, 0], sizes = [1, 128], strides = [1, 1]} : vector<20x128xf32> to vector<1x128xf32>
    %582 = arith.maximumf %580, %581 : vector<1x128xf32>
    %583 = vector.extract_strided_slice %539 {offsets = [17, 0], sizes = [1, 128], strides = [1, 1]} : vector<20x128xf32> to vector<1x128xf32>
    %584 = vector.extract_strided_slice %539 {offsets = [18, 0], sizes = [1, 128], strides = [1, 1]} : vector<20x128xf32> to vector<1x128xf32>
    %585 = arith.maximumf %583, %584 : vector<1x128xf32>
    %586 = vector.extract_strided_slice %539 {offsets = [19, 0], sizes = [1, 128], strides = [1, 1]} : vector<20x128xf32> to vector<1x128xf32>
    %587 = arith.maximumf %585, %586 : vector<1x128xf32>
    %588 = tpu.concatenate %542, %547, %552, %557, %562, %567, %572, %577, %582, %587 in 0 : vector<1x128xf32>, vector<1x128xf32>, vector<1x128xf32>, vector<1x128xf32>, vector<1x128xf32>, vector<1x128xf32>, vector<1x128xf32>, vector<1x128xf32>, vector<1x128xf32>, vector<1x128xf32> -> vector<10x128xf32>
    %c121 = arith.constant 121 : index
    %c0_90 = arith.constant 0 : index
    %589 = vector.load %arg10[%c121, %c0_90] : memref<144x128xf32, #tpu.memory_space<vmem>>, vector<10x128xf32>
    tpu.vector_store %arg10[%c121, %c0_90], %588 {strides = array<i32>} : memref<144x128xf32, #tpu.memory_space<vmem>>, vector<10x128xf32>,
    %cst_91 = arith.constant 0.000000e+00 : f32
    %590 = vector.broadcast %cst_91 : f32 to vector<118x128xf32>
    %c0_92 = arith.constant 0 : index
    %c0_93 = arith.constant 0 : index
    %591 = vector.load %arg10[%c0_92, %c0_93] : memref<144x128xf32, #tpu.memory_space<vmem>>, vector<118x128xf32>
    %592 = arith.truncf %591 : vector<118x128xf32> to vector<118x128xbf16>
    %c0_94 = arith.constant 0 : index
    %c0_95 = arith.constant 0 : index
    %c0_96 = arith.constant 0 : index
    %c0_97 = arith.constant 0 : index
    %593 = vector.load %arg4[%c0_94, %c0_95, %c0_96, %c0_97] : memref<3x3x128x128xbf16, #tpu.memory_space<vmem>>, vector<1x1x128x128xbf16>
    %594 = vector.shape_cast %593 : vector<1x1x128x128xbf16> to vector<128x128xbf16>
    %cst_98 = arith.constant dense<0.000000e+00> : vector<118x128xf32>
    %595 = tpu.matmul %592, %594, %cst_98 {dimension_numbers = #tpu.dot_dimension_numbers<[1], [0], [0], [1], [0, 0, 1, 1], [], []>} : vector<118x128xbf16>, vector<128x128xbf16>, vector<118x128xf32> -> vector<118x128xf32>
    %596 = arith.addf %590, %595 : vector<118x128xf32>
    %c1 = arith.constant 1 : index
    %c0_99 = arith.constant 0 : index
    %597 = vector.load %arg10[%c1, %c0_99] : memref<144x128xf32, #tpu.memory_space<vmem>>, vector<118x128xf32>
    %598 = arith.truncf %597 : vector<118x128xf32> to vector<118x128xbf16>
    %c0_100 = arith.constant 0 : index
    %c1_101 = arith.constant 1 : index
    %c0_102 = arith.constant 0 : index
    %c0_103 = arith.constant 0 : index
    %599 = vector.load %arg4[%c0_100, %c1_101, %c0_102, %c0_103] : memref<3x3x128x128xbf16, #tpu.memory_space<vmem>>, vector<1x1x128x128xbf16>
    %600 = vector.shape_cast %599 : vector<1x1x128x128xbf16> to vector<128x128xbf16>
    %cst_104 = arith.constant dense<0.000000e+00> : vector<118x128xf32>
    %601 = tpu.matmul %598, %600, %cst_104 {dimension_numbers = #tpu.dot_dimension_numbers<[1], [0], [0], [1], [0, 0, 1, 1], [], []>} : vector<118x128xbf16>, vector<128x128xbf16>, vector<118x128xf32> -> vector<118x128xf32>
    %602 = arith.addf %596, %601 : vector<118x128xf32>
    %c2 = arith.constant 2 : index
    %c0_105 = arith.constant 0 : index
    %603 = vector.load %arg10[%c2, %c0_105] : memref<144x128xf32, #tpu.memory_space<vmem>>, vector<118x128xf32>
    %604 = arith.truncf %603 : vector<118x128xf32> to vector<118x128xbf16>
    %c0_106 = arith.constant 0 : index
    %c2_107 = arith.constant 2 : index
    %c0_108 = arith.constant 0 : index
    %c0_109 = arith.constant 0 : index
    %605 = vector.load %arg4[%c0_106, %c2_107, %c0_108, %c0_109] : memref<3x3x128x128xbf16, #tpu.memory_space<vmem>>, vector<1x1x128x128xbf16>
    %606 = vector.shape_cast %605 : vector<1x1x128x128xbf16> to vector<128x128xbf16>
    %cst_110 = arith.constant dense<0.000000e+00> : vector<118x128xf32>
    %607 = tpu.matmul %604, %606, %cst_110 {dimension_numbers = #tpu.dot_dimension_numbers<[1], [0], [0], [1], [0, 0, 1, 1], [], []>} : vector<118x128xbf16>, vector<128x128xbf16>, vector<118x128xf32> -> vector<118x128xf32>
    %608 = arith.addf %602, %607 : vector<118x128xf32>
    %c12 = arith.constant 12 : index
    %c0_111 = arith.constant 0 : index
    %609 = vector.load %arg10[%c12, %c0_111] : memref<144x128xf32, #tpu.memory_space<vmem>>, vector<118x128xf32>
    %610 = arith.truncf %609 : vector<118x128xf32> to vector<118x128xbf16>
    %c1_112 = arith.constant 1 : index
    %c0_113 = arith.constant 0 : index
    %c0_114 = arith.constant 0 : index
    %c0_115 = arith.constant 0 : index
    %611 = vector.load %arg4[%c1_112, %c0_113, %c0_114, %c0_115] : memref<3x3x128x128xbf16, #tpu.memory_space<vmem>>, vector<1x1x128x128xbf16>
    %612 = vector.shape_cast %611 : vector<1x1x128x128xbf16> to vector<128x128xbf16>
    %cst_116 = arith.constant dense<0.000000e+00> : vector<118x128xf32>
    %613 = tpu.matmul %610, %612, %cst_116 {dimension_numbers = #tpu.dot_dimension_numbers<[1], [0], [0], [1], [0, 0, 1, 1], [], []>} : vector<118x128xbf16>, vector<128x128xbf16>, vector<118x128xf32> -> vector<118x128xf32>
    %614 = arith.addf %608, %613 : vector<118x128xf32>
    %c13_117 = arith.constant 13 : index
    %c0_118 = arith.constant 0 : index
    %615 = vector.load %arg10[%c13_117, %c0_118] : memref<144x128xf32, #tpu.memory_space<vmem>>, vector<118x128xf32>
    %616 = arith.truncf %615 : vector<118x128xf32> to vector<118x128xbf16>
    %c1_119 = arith.constant 1 : index
    %c1_120 = arith.constant 1 : index
    %c0_121 = arith.constant 0 : index
    %c0_122 = arith.constant 0 : index
    %617 = vector.load %arg4[%c1_119, %c1_120, %c0_121, %c0_122] : memref<3x3x128x128xbf16, #tpu.memory_space<vmem>>, vector<1x1x128x128xbf16>
    %618 = vector.shape_cast %617 : vector<1x1x128x128xbf16> to vector<128x128xbf16>
    %cst_123 = arith.constant dense<0.000000e+00> : vector<118x128xf32>
    %619 = tpu.matmul %616, %618, %cst_123 {dimension_numbers = #tpu.dot_dimension_numbers<[1], [0], [0], [1], [0, 0, 1, 1], [], []>} : vector<118x128xbf16>, vector<128x128xbf16>, vector<118x128xf32> -> vector<118x128xf32>
    %620 = arith.addf %614, %619 : vector<118x128xf32>
    %c14 = arith.constant 14 : index
    %c0_124 = arith.constant 0 : index
    %621 = vector.load %arg10[%c14, %c0_124] : memref<144x128xf32, #tpu.memory_space<vmem>>, vector<118x128xf32>
    %622 = arith.truncf %621 : vector<118x128xf32> to vector<118x128xbf16>
    %c1_125 = arith.constant 1 : index
    %c2_126 = arith.constant 2 : index
    %c0_127 = arith.constant 0 : index
    %c0_128 = arith.constant 0 : index
    %623 = vector.load %arg4[%c1_125, %c2_126, %c0_127, %c0_128] : memref<3x3x128x128xbf16, #tpu.memory_space<vmem>>, vector<1x1x128x128xbf16>
    %624 = vector.shape_cast %623 : vector<1x1x128x128xbf16> to vector<128x128xbf16>
    %cst_129 = arith.constant dense<0.000000e+00> : vector<118x128xf32>
    %625 = tpu.matmul %622, %624, %cst_129 {dimension_numbers = #tpu.dot_dimension_numbers<[1], [0], [0], [1], [0, 0, 1, 1], [], []>} : vector<118x128xbf16>, vector<128x128xbf16>, vector<118x128xf32> -> vector<118x128xf32>
    %626 = arith.addf %620, %625 : vector<118x128xf32>
    %c24 = arith.constant 24 : index
    %c0_130 = arith.constant 0 : index
    %627 = vector.load %arg10[%c24, %c0_130] : memref<144x128xf32, #tpu.memory_space<vmem>>, vector<118x128xf32>
    %628 = arith.truncf %627 : vector<118x128xf32> to vector<118x128xbf16>
    %c2_131 = arith.constant 2 : index
    %c0_132 = arith.constant 0 : index
    %c0_133 = arith.constant 0 : index
    %c0_134 = arith.constant 0 : index
    %629 = vector.load %arg4[%c2_131, %c0_132, %c0_133, %c0_134] : memref<3x3x128x128xbf16, #tpu.memory_space<vmem>>, vector<1x1x128x128xbf16>
    %630 = vector.shape_cast %629 : vector<1x1x128x128xbf16> to vector<128x128xbf16>
    %cst_135 = arith.constant dense<0.000000e+00> : vector<118x128xf32>
    %631 = tpu.matmul %628, %630, %cst_135 {dimension_numbers = #tpu.dot_dimension_numbers<[1], [0], [0], [1], [0, 0, 1, 1], [], []>} : vector<118x128xbf16>, vector<128x128xbf16>, vector<118x128xf32> -> vector<118x128xf32>
    %632 = arith.addf %626, %631 : vector<118x128xf32>
    %c25_136 = arith.constant 25 : index
    %c0_137 = arith.constant 0 : index
    %633 = vector.load %arg10[%c25_136, %c0_137] : memref<144x128xf32, #tpu.memory_space<vmem>>, vector<118x128xf32>
    %634 = arith.truncf %633 : vector<118x128xf32> to vector<118x128xbf16>
    %c2_138 = arith.constant 2 : index
    %c1_139 = arith.constant 1 : index
    %c0_140 = arith.constant 0 : index
    %c0_141 = arith.constant 0 : index
    %635 = vector.load %arg4[%c2_138, %c1_139, %c0_140, %c0_141] : memref<3x3x128x128xbf16, #tpu.memory_space<vmem>>, vector<1x1x128x128xbf16>
    %636 = vector.shape_cast %635 : vector<1x1x128x128xbf16> to vector<128x128xbf16>
    %cst_142 = arith.constant dense<0.000000e+00> : vector<118x128xf32>
    %637 = tpu.matmul %634, %636, %cst_142 {dimension_numbers = #tpu.dot_dimension_numbers<[1], [0], [0], [1], [0, 0, 1, 1], [], []>} : vector<118x128xbf16>, vector<128x128xbf16>, vector<118x128xf32> -> vector<118x128xf32>
    %638 = arith.addf %632, %637 : vector<118x128xf32>
    %c26 = arith.constant 26 : index
    %c0_143 = arith.constant 0 : index
    %639 = vector.load %arg10[%c26, %c0_143] : memref<144x128xf32, #tpu.memory_space<vmem>>, vector<118x128xf32>
    %640 = arith.truncf %639 : vector<118x128xf32> to vector<118x128xbf16>
    %c2_144 = arith.constant 2 : index
    %c2_145 = arith.constant 2 : index
    %c0_146 = arith.constant 0 : index
    %c0_147 = arith.constant 0 : index
    %641 = vector.load %arg4[%c2_144, %c2_145, %c0_146, %c0_147] : memref<3x3x128x128xbf16, #tpu.memory_space<vmem>>, vector<1x1x128x128xbf16>
    %642 = vector.shape_cast %641 : vector<1x1x128x128xbf16> to vector<128x128xbf16>
    %cst_148 = arith.constant dense<0.000000e+00> : vector<118x128xf32>
    %643 = tpu.matmul %640, %642, %cst_148 {dimension_numbers = #tpu.dot_dimension_numbers<[1], [0], [0], [1], [0, 0, 1, 1], [], []>} : vector<118x128xbf16>, vector<128x128xbf16>, vector<118x128xf32> -> vector<118x128xf32>
    %644 = arith.addf %638, %643 : vector<118x128xf32>
    %c0_149 = arith.constant 0 : index
    %c0_150 = arith.constant 0 : index
    %645 = vector.load %arg5[%c0_149, %c0_150] : memref<1x128xf32, #tpu.memory_space<vmem>>, vector<1x128xf32>
    %646 = vector.broadcast %645 : vector<1x128xf32> to vector<118x128xf32>
    %647 = arith.addf %644, %646 : vector<118x128xf32>
    %cst_151 = arith.constant 0.000000e+00 : f32
    %648 = vector.broadcast %cst_151 : f32 to vector<118x128xf32>
    %649 = arith.maximumf %647, %648 : vector<118x128xf32>
    %c0_152 = arith.constant 0 : index
    %c0_153 = arith.constant 0 : index
    %650 = vector.load %arg11[%c0_152, %c0_153] : memref<118x128xf32, #tpu.memory_space<vmem>>, vector<118x128xf32>
    tpu.vector_store %arg11[%c0_152, %c0_153], %649 {strides = array<i32>} : memref<118x128xf32, #tpu.memory_space<vmem>>, vector<118x128xf32>,
    %cst_154 = arith.constant 0.000000e+00 : f32
    %651 = vector.broadcast %cst_154 : f32 to vector<92x128xf32>
    %c0_155 = arith.constant 0 : index
    %c0_156 = arith.constant 0 : index
    %652 = vector.load %arg11[%c0_155, %c0_156] : memref<118x128xf32, #tpu.memory_space<vmem>>, vector<92x128xf32>
    %653 = arith.truncf %652 : vector<92x128xf32> to vector<92x128xbf16>
    %c0_157 = arith.constant 0 : index
    %c0_158 = arith.constant 0 : index
    %c0_159 = arith.constant 0 : index
    %c0_160 = arith.constant 0 : index
    %654 = vector.load %arg6[%c0_157, %c0_158, %c0_159, %c0_160] : memref<3x3x128x128xbf16, #tpu.memory_space<vmem>>, vector<1x1x128x128xbf16>
    %655 = vector.shape_cast %654 : vector<1x1x128x128xbf16> to vector<128x128xbf16>
    %cst_161 = arith.constant dense<0.000000e+00> : vector<92x128xf32>
    %656 = tpu.matmul %653, %655, %cst_161 {dimension_numbers = #tpu.dot_dimension_numbers<[1], [0], [0], [1], [0, 0, 1, 1], [], []>} : vector<92x128xbf16>, vector<128x128xbf16>, vector<92x128xf32> -> vector<92x128xf32>
    %657 = arith.addf %651, %656 : vector<92x128xf32>
    %c1_162 = arith.constant 1 : index
    %c0_163 = arith.constant 0 : index
    %658 = vector.load %arg11[%c1_162, %c0_163] : memref<118x128xf32, #tpu.memory_space<vmem>>, vector<92x128xf32>
    %659 = arith.truncf %658 : vector<92x128xf32> to vector<92x128xbf16>
    %c0_164 = arith.constant 0 : index
    %c1_165 = arith.constant 1 : index
    %c0_166 = arith.constant 0 : index
    %c0_167 = arith.constant 0 : index
    %660 = vector.load %arg6[%c0_164, %c1_165, %c0_166, %c0_167] : memref<3x3x128x128xbf16, #tpu.memory_space<vmem>>, vector<1x1x128x128xbf16>
    %661 = vector.shape_cast %660 : vector<1x1x128x128xbf16> to vector<128x128xbf16>
    %cst_168 = arith.constant dense<0.000000e+00> : vector<92x128xf32>
    %662 = tpu.matmul %659, %661, %cst_168 {dimension_numbers = #tpu.dot_dimension_numbers<[1], [0], [0], [1], [0, 0, 1, 1], [], []>} : vector<92x128xbf16>, vector<128x128xbf16>, vector<92x128xf32> -> vector<92x128xf32>
    %663 = arith.addf %657, %662 : vector<92x128xf32>
    %c2_169 = arith.constant 2 : index
    %c0_170 = arith.constant 0 : index
    %664 = vector.load %arg11[%c2_169, %c0_170] : memref<118x128xf32, #tpu.memory_space<vmem>>, vector<92x128xf32>
    %665 = arith.truncf %664 : vector<92x128xf32> to vector<92x128xbf16>
    %c0_171 = arith.constant 0 : index
    %c2_172 = arith.constant 2 : index
    %c0_173 = arith.constant 0 : index
    %c0_174 = arith.constant 0 : index
    %666 = vector.load %arg6[%c0_171, %c2_172, %c0_173, %c0_174] : memref<3x3x128x128xbf16, #tpu.memory_space<vmem>>, vector<1x1x128x128xbf16>
    %667 = vector.shape_cast %666 : vector<1x1x128x128xbf16> to vector<128x128xbf16>
    %cst_175 = arith.constant dense<0.000000e+00> : vector<92x128xf32>
    %668 = tpu.matmul %665, %667, %cst_175 {dimension_numbers = #tpu.dot_dimension_numbers<[1], [0], [0], [1], [0, 0, 1, 1], [], []>} : vector<92x128xbf16>, vector<128x128xbf16>, vector<92x128xf32> -> vector<92x128xf32>
    %669 = arith.addf %663, %668 : vector<92x128xf32>
    %c12_176 = arith.constant 12 : index
    %c0_177 = arith.constant 0 : index
    %670 = vector.load %arg11[%c12_176, %c0_177] : memref<118x128xf32, #tpu.memory_space<vmem>>, vector<92x128xf32>
    %671 = arith.truncf %670 : vector<92x128xf32> to vector<92x128xbf16>
    %c1_178 = arith.constant 1 : index
    %c0_179 = arith.constant 0 : index
    %c0_180 = arith.constant 0 : index
    %c0_181 = arith.constant 0 : index
    %672 = vector.load %arg6[%c1_178, %c0_179, %c0_180, %c0_181] : memref<3x3x128x128xbf16, #tpu.memory_space<vmem>>, vector<1x1x128x128xbf16>
    %673 = vector.shape_cast %672 : vector<1x1x128x128xbf16> to vector<128x128xbf16>
    %cst_182 = arith.constant dense<0.000000e+00> : vector<92x128xf32>
    %674 = tpu.matmul %671, %673, %cst_182 {dimension_numbers = #tpu.dot_dimension_numbers<[1], [0], [0], [1], [0, 0, 1, 1], [], []>} : vector<92x128xbf16>, vector<128x128xbf16>, vector<92x128xf32> -> vector<92x128xf32>
    %675 = arith.addf %669, %674 : vector<92x128xf32>
    %c13_183 = arith.constant 13 : index
    %c0_184 = arith.constant 0 : index
    %676 = vector.load %arg11[%c13_183, %c0_184] : memref<118x128xf32, #tpu.memory_space<vmem>>, vector<92x128xf32>
    %677 = arith.truncf %676 : vector<92x128xf32> to vector<92x128xbf16>
    %c1_185 = arith.constant 1 : index
    %c1_186 = arith.constant 1 : index
    %c0_187 = arith.constant 0 : index
    %c0_188 = arith.constant 0 : index
    %678 = vector.load %arg6[%c1_185, %c1_186, %c0_187, %c0_188] : memref<3x3x128x128xbf16, #tpu.memory_space<vmem>>, vector<1x1x128x128xbf16>
    %679 = vector.shape_cast %678 : vector<1x1x128x128xbf16> to vector<128x128xbf16>
    %cst_189 = arith.constant dense<0.000000e+00> : vector<92x128xf32>
    %680 = tpu.matmul %677, %679, %cst_189 {dimension_numbers = #tpu.dot_dimension_numbers<[1], [0], [0], [1], [0, 0, 1, 1], [], []>} : vector<92x128xbf16>, vector<128x128xbf16>, vector<92x128xf32> -> vector<92x128xf32>
    %681 = arith.addf %675, %680 : vector<92x128xf32>
    %c14_190 = arith.constant 14 : index
    %c0_191 = arith.constant 0 : index
    %682 = vector.load %arg11[%c14_190, %c0_191] : memref<118x128xf32, #tpu.memory_space<vmem>>, vector<92x128xf32>
    %683 = arith.truncf %682 : vector<92x128xf32> to vector<92x128xbf16>
    %c1_192 = arith.constant 1 : index
    %c2_193 = arith.constant 2 : index
    %c0_194 = arith.constant 0 : index
    %c0_195 = arith.constant 0 : index
    %684 = vector.load %arg6[%c1_192, %c2_193, %c0_194, %c0_195] : memref<3x3x128x128xbf16, #tpu.memory_space<vmem>>, vector<1x1x128x128xbf16>
    %685 = vector.shape_cast %684 : vector<1x1x128x128xbf16> to vector<128x128xbf16>
    %cst_196 = arith.constant dense<0.000000e+00> : vector<92x128xf32>
    %686 = tpu.matmul %683, %685, %cst_196 {dimension_numbers = #tpu.dot_dimension_numbers<[1], [0], [0], [1], [0, 0, 1, 1], [], []>} : vector<92x128xbf16>, vector<128x128xbf16>, vector<92x128xf32> -> vector<92x128xf32>
    %687 = arith.addf %681, %686 : vector<92x128xf32>
    %c24_197 = arith.constant 24 : index
    %c0_198 = arith.constant 0 : index
    %688 = vector.load %arg11[%c24_197, %c0_198] : memref<118x128xf32, #tpu.memory_space<vmem>>, vector<92x128xf32>
    %689 = arith.truncf %688 : vector<92x128xf32> to vector<92x128xbf16>
    %c2_199 = arith.constant 2 : index
    %c0_200 = arith.constant 0 : index
    %c0_201 = arith.constant 0 : index
    %c0_202 = arith.constant 0 : index
    %690 = vector.load %arg6[%c2_199, %c0_200, %c0_201, %c0_202] : memref<3x3x128x128xbf16, #tpu.memory_space<vmem>>, vector<1x1x128x128xbf16>
    %691 = vector.shape_cast %690 : vector<1x1x128x128xbf16> to vector<128x128xbf16>
    %cst_203 = arith.constant dense<0.000000e+00> : vector<92x128xf32>
    %692 = tpu.matmul %689, %691, %cst_203 {dimension_numbers = #tpu.dot_dimension_numbers<[1], [0], [0], [1], [0, 0, 1, 1], [], []>} : vector<92x128xbf16>, vector<128x128xbf16>, vector<92x128xf32> -> vector<92x128xf32>
    %693 = arith.addf %687, %692 : vector<92x128xf32>
    %c25_204 = arith.constant 25 : index
    %c0_205 = arith.constant 0 : index
    %694 = vector.load %arg11[%c25_204, %c0_205] : memref<118x128xf32, #tpu.memory_space<vmem>>, vector<92x128xf32>
    %695 = arith.truncf %694 : vector<92x128xf32> to vector<92x128xbf16>
    %c2_206 = arith.constant 2 : index
    %c1_207 = arith.constant 1 : index
    %c0_208 = arith.constant 0 : index
    %c0_209 = arith.constant 0 : index
    %696 = vector.load %arg6[%c2_206, %c1_207, %c0_208, %c0_209] : memref<3x3x128x128xbf16, #tpu.memory_space<vmem>>, vector<1x1x128x128xbf16>
    %697 = vector.shape_cast %696 : vector<1x1x128x128xbf16> to vector<128x128xbf16>
    %cst_210 = arith.constant dense<0.000000e+00> : vector<92x128xf32>
    %698 = tpu.matmul %695, %697, %cst_210 {dimension_numbers = #tpu.dot_dimension_numbers<[1], [0], [0], [1], [0, 0, 1, 1], [], []>} : vector<92x128xbf16>, vector<128x128xbf16>, vector<92x128xf32> -> vector<92x128xf32>
    %699 = arith.addf %693, %698 : vector<92x128xf32>
    %c26_211 = arith.constant 26 : index
    %c0_212 = arith.constant 0 : index
    %700 = vector.load %arg11[%c26_211, %c0_212] : memref<118x128xf32, #tpu.memory_space<vmem>>, vector<92x128xf32>
    %701 = arith.truncf %700 : vector<92x128xf32> to vector<92x128xbf16>
    %c2_213 = arith.constant 2 : index
    %c2_214 = arith.constant 2 : index
    %c0_215 = arith.constant 0 : index
    %c0_216 = arith.constant 0 : index
    %702 = vector.load %arg6[%c2_213, %c2_214, %c0_215, %c0_216] : memref<3x3x128x128xbf16, #tpu.memory_space<vmem>>, vector<1x1x128x128xbf16>
    %703 = vector.shape_cast %702 : vector<1x1x128x128xbf16> to vector<128x128xbf16>
    %cst_217 = arith.constant dense<0.000000e+00> : vector<92x128xf32>
    %704 = tpu.matmul %701, %703, %cst_217 {dimension_numbers = #tpu.dot_dimension_numbers<[1], [0], [0], [1], [0, 0, 1, 1], [], []>} : vector<92x128xbf16>, vector<128x128xbf16>, vector<92x128xf32> -> vector<92x128xf32>
    %705 = arith.addf %699, %704 : vector<92x128xf32>
    %c0_218 = arith.constant 0 : index
    %c0_219 = arith.constant 0 : index
    %706 = vector.load %arg7[%c0_218, %c0_219] : memref<1x128xf32, #tpu.memory_space<vmem>>, vector<1x128xf32>
    %707 = vector.broadcast %706 : vector<1x128xf32> to vector<92x128xf32>
    %708 = arith.addf %705, %707 : vector<92x128xf32>
    %cst_220 = arith.constant 0.000000e+00 : f32
    %709 = vector.broadcast %cst_220 : f32 to vector<92x128xf32>
    %710 = arith.maximumf %708, %709 : vector<92x128xf32>
    %711 = vector.extract_strided_slice %710 {offsets = [0, 0], sizes = [8, 128], strides = [1, 1]} : vector<92x128xf32> to vector<8x128xf32>
    %c0_221 = arith.constant 0 : index
    %c0_222 = arith.constant 0 : index
    %c0_223 = arith.constant 0 : index
    %712 = vector.load %arg8[%c0_221, %c0_222, %c0_223] : memref<1x64x128xf32, #tpu.memory_space<vmem>>, vector<1x8x128xf32>
    %713 = vector.shape_cast %712 : vector<1x8x128xf32> to vector<8x128xf32>
    %714 = vector.shape_cast %711 : vector<8x128xf32> to vector<1x8x128xf32>
    tpu.vector_store %arg8[%c0_221, %c0_222, %c0_223], %714 {strides = array<i32>} : memref<1x64x128xf32, #tpu.memory_space<vmem>>, vector<1x8x128xf32>,
    %715 = vector.extract_strided_slice %710 {offsets = [12, 0], sizes = [8, 128], strides = [1, 1]} : vector<92x128xf32> to vector<8x128xf32>
    %c0_224 = arith.constant 0 : index
    %c8 = arith.constant 8 : index
    %c0_225 = arith.constant 0 : index
    %716 = vector.load %arg8[%c0_224, %c8, %c0_225] : memref<1x64x128xf32, #tpu.memory_space<vmem>>, vector<1x8x128xf32>
    %717 = vector.shape_cast %716 : vector<1x8x128xf32> to vector<8x128xf32>
    %718 = vector.shape_cast %715 : vector<8x128xf32> to vector<1x8x128xf32>
    tpu.vector_store %arg8[%c0_224, %c8, %c0_225], %718 {strides = array<i32>} : memref<1x64x128xf32, #tpu.memory_space<vmem>>, vector<1x8x128xf32>,
    %719 = vector.extract_strided_slice %710 {offsets = [24, 0], sizes = [8, 128], strides = [1, 1]} : vector<92x128xf32> to vector<8x128xf32>
    %c0_226 = arith.constant 0 : index
    %c16 = arith.constant 16 : index
    %c0_227 = arith.constant 0 : index
    %720 = vector.load %arg8[%c0_226, %c16, %c0_227] : memref<1x64x128xf32, #tpu.memory_space<vmem>>, vector<1x8x128xf32>
    %721 = vector.shape_cast %720 : vector<1x8x128xf32> to vector<8x128xf32>
    %722 = vector.shape_cast %719 : vector<8x128xf32> to vector<1x8x128xf32>
    tpu.vector_store %arg8[%c0_226, %c16, %c0_227], %722 {strides = array<i32>} : memref<1x64x128xf32, #tpu.memory_space<vmem>>, vector<1x8x128xf32>,
    %723 = vector.extract_strided_slice %710 {offsets = [36, 0], sizes = [8, 128], strides = [1, 1]} : vector<92x128xf32> to vector<8x128xf32>
    %c0_228 = arith.constant 0 : index
    %c24_229 = arith.constant 24 : index
    %c0_230 = arith.constant 0 : index
    %724 = vector.load %arg8[%c0_228, %c24_229, %c0_230] : memref<1x64x128xf32, #tpu.memory_space<vmem>>, vector<1x8x128xf32>
    %725 = vector.shape_cast %724 : vector<1x8x128xf32> to vector<8x128xf32>
    %726 = vector.shape_cast %723 : vector<8x128xf32> to vector<1x8x128xf32>
    tpu.vector_store %arg8[%c0_228, %c24_229, %c0_230], %726 {strides = array<i32>} : memref<1x64x128xf32, #tpu.memory_space<vmem>>, vector<1x8x128xf32>,
    %727 = vector.extract_strided_slice %710 {offsets = [48, 0], sizes = [8, 128], strides = [1, 1]} : vector<92x128xf32> to vector<8x128xf32>
    %c0_231 = arith.constant 0 : index
    %c32 = arith.constant 32 : index
    %c0_232 = arith.constant 0 : index
    %728 = vector.load %arg8[%c0_231, %c32, %c0_232] : memref<1x64x128xf32, #tpu.memory_space<vmem>>, vector<1x8x128xf32>
    %729 = vector.shape_cast %728 : vector<1x8x128xf32> to vector<8x128xf32>
    %730 = vector.shape_cast %727 : vector<8x128xf32> to vector<1x8x128xf32>
    tpu.vector_store %arg8[%c0_231, %c32, %c0_232], %730 {strides = array<i32>} : memref<1x64x128xf32, #tpu.memory_space<vmem>>, vector<1x8x128xf32>,
    %731 = vector.extract_strided_slice %710 {offsets = [60, 0], sizes = [8, 128], strides = [1, 1]} : vector<92x128xf32> to vector<8x128xf32>
    %c0_233 = arith.constant 0 : index
    %c40_234 = arith.constant 40 : index
    %c0_235 = arith.constant 0 : index
    %732 = vector.load %arg8[%c0_233, %c40_234, %c0_235] : memref<1x64x128xf32, #tpu.memory_space<vmem>>, vector<1x8x128xf32>
    %733 = vector.shape_cast %732 : vector<1x8x128xf32> to vector<8x128xf32>
    %734 = vector.shape_cast %731 : vector<8x128xf32> to vector<1x8x128xf32>
    tpu.vector_store %arg8[%c0_233, %c40_234, %c0_235], %734 {strides = array<i32>} : memref<1x64x128xf32, #tpu.memory_space<vmem>>, vector<1x8x128xf32>,
    %735 = vector.extract_strided_slice %710 {offsets = [72, 0], sizes = [8, 128], strides = [1, 1]} : vector<92x128xf32> to vector<8x128xf32>
    %c0_236 = arith.constant 0 : index
    %c48 = arith.constant 48 : index
    %c0_237 = arith.constant 0 : index
    %736 = vector.load %arg8[%c0_236, %c48, %c0_237] : memref<1x64x128xf32, #tpu.memory_space<vmem>>, vector<1x8x128xf32>
    %737 = vector.shape_cast %736 : vector<1x8x128xf32> to vector<8x128xf32>
    %738 = vector.shape_cast %735 : vector<8x128xf32> to vector<1x8x128xf32>
    tpu.vector_store %arg8[%c0_236, %c48, %c0_237], %738 {strides = array<i32>} : memref<1x64x128xf32, #tpu.memory_space<vmem>>, vector<1x8x128xf32>,
    %739 = vector.extract_strided_slice %710 {offsets = [84, 0], sizes = [8, 128], strides = [1, 1]} : vector<92x128xf32> to vector<8x128xf32>
    %c0_238 = arith.constant 0 : index
    %c56 = arith.constant 56 : index
    %c0_239 = arith.constant 0 : index
    %740 = vector.load %arg8[%c0_238, %c56, %c0_239] : memref<1x64x128xf32, #tpu.memory_space<vmem>>, vector<1x8x128xf32>
    %741 = vector.shape_cast %740 : vector<1x8x128xf32> to vector<8x128xf32>
    %742 = vector.shape_cast %739 : vector<8x128xf32> to vector<1x8x128xf32>
    tpu.vector_store %arg8[%c0_238, %c56, %c0_239], %742 {strides = array<i32>} : memref<1x64x128xf32, #tpu.memory_space<vmem>>, vector<1x8x128xf32>,
    return
  }
  func.func @transform_0(%arg0: i32) -> (i32, i32, i32) {
    %c0_i32 = arith.constant 0 : i32
    %c0_i32_0 = arith.constant 0 : i32
    %c0_i32_1 = arith.constant 0 : i32
    return %arg0, %c0_i32, %c0_i32_0 : i32, i32, i32
  }
  func.func @transform_1(%arg0: i32) -> (i32, i32) {
    %c0_i32 = arith.constant 0 : i32
    %c0_i32_0 = arith.constant 0 : i32
    %c0_i32_1 = arith.constant 0 : i32
    return %c0_i32, %c0_i32_0 : i32, i32
  }
  func.func @transform_2(%arg0: i32) -> (i32, i32) {
    %c0_i32 = arith.constant 0 : i32
    %c0_i32_0 = arith.constant 0 : i32
    %c0_i32_1 = arith.constant 0 : i32
    return %c0_i32, %c0_i32_0 : i32, i32
  }
  func.func @transform_3(%arg0: i32) -> (i32, i32, i32, i32) {
    %c0_i32 = arith.constant 0 : i32
    %c0_i32_0 = arith.constant 0 : i32
    %c0_i32_1 = arith.constant 0 : i32
    %c0_i32_2 = arith.constant 0 : i32
    %c0_i32_3 = arith.constant 0 : i32
    return %c0_i32, %c0_i32_0, %c0_i32_1, %c0_i32_2 : i32, i32, i32, i32
  }
  func.func @transform_4(%arg0: i32) -> (i32, i32) {
    %c0_i32 = arith.constant 0 : i32
    %c0_i32_0 = arith.constant 0 : i32
    %c0_i32_1 = arith.constant 0 : i32
    return %c0_i32, %c0_i32_0 : i32, i32
  }
  func.func @transform_5(%arg0: i32) -> (i32, i32, i32, i32) {
    %c0_i32 = arith.constant 0 : i32
    %c0_i32_0 = arith.constant 0 : i32
    %c0_i32_1 = arith.constant 0 : i32
    %c0_i32_2 = arith.constant 0 : i32
    %c0_i32_3 = arith.constant 0 : i32
    return %c0_i32, %c0_i32_0, %c0_i32_1, %c0_i32_2 : i32, i32, i32, i32
  }
  func.func @transform_6(%arg0: i32) -> (i32, i32) {
    %c0_i32 = arith.constant 0 : i32
    %c0_i32_0 = arith.constant 0 : i32
    %c0_i32_1 = arith.constant 0 : i32
    return %c0_i32, %c0_i32_0 : i32, i32
  }
  func.func @transform_7(%arg0: i32) -> (i32, i32, i32) {
    %c0_i32 = arith.constant 0 : i32
    %c0_i32_0 = arith.constant 0 : i32
    %c0_i32_1 = arith.constant 0 : i32
    return %arg0, %c0_i32, %c0_i32_0 : i32, i32, i32
  }
}

module attributes {stable_mosaic.version = 11 : i64} {
  func.func @_head_kernel(%arg0: memref<2x384xf32, #tpu.memory_space<vmem>>, %arg1: memref<384x128xbf16, #tpu.memory_space<vmem>>, %arg2: memref<1x128xf32, #tpu.memory_space<vmem>>, %arg3: memref<2x128xf32, #tpu.memory_space<vmem>>) attributes {dimension_semantics = [], scalar_prefetch = 0 : i64, scratch_operands = 0 : i64, tpu.core_type = #tpu.core_type<tc>} {
    %c0 = arith.constant 0 : index
    %c0_0 = arith.constant 0 : index
    %0 = vector.load %arg0[%c0, %c0_0] : memref<2x384xf32, #tpu.memory_space<vmem>>, vector<2x384xf32>
    %1 = arith.truncf %0 : vector<2x384xf32> to vector<2x384xbf16>
    %c0_1 = arith.constant 0 : index
    %c0_2 = arith.constant 0 : index
    %2 = vector.load %arg1[%c0_1, %c0_2] : memref<384x128xbf16, #tpu.memory_space<vmem>>, vector<384x128xbf16>
    %cst = arith.constant dense<0.000000e+00> : vector<2x128xf32>
    %3 = tpu.matmul %1, %2, %cst {dimension_numbers = #tpu.dot_dimension_numbers<[1], [0], [0], [1], [0, 0, 1, 1], [], []>} : vector<2x384xbf16>, vector<384x128xbf16>, vector<2x128xf32> -> vector<2x128xf32>
    %c0_3 = arith.constant 0 : index
    %c0_4 = arith.constant 0 : index
    %4 = vector.load %arg2[%c0_3, %c0_4] : memref<1x128xf32, #tpu.memory_space<vmem>>, vector<1x128xf32>
    %5 = vector.broadcast %4 : vector<1x128xf32> to vector<2x128xf32>
    %6 = arith.addf %3, %5 : vector<2x128xf32>
    %cst_5 = arith.constant dense<0xFF800000> : vector<2xf32>
    %7 = vector.multi_reduction <maximumf>, %6, %cst_5 [1] : vector<2x128xf32> to vector<2xf32>
    %8 = vector.shape_cast %7 : vector<2xf32> to vector<2x1xf32>
    %9 = vector.broadcast %8 : vector<2x1xf32> to vector<2x128xf32>
    %10 = arith.subf %6, %9 : vector<2x128xf32>
    %11 = math.exp %10 : vector<2x128xf32>
    %cst_6 = arith.constant dense<0.000000e+00> : vector<2xf32>
    %12 = vector.multi_reduction <add>, %11, %cst_6 [1] : vector<2x128xf32> to vector<2xf32>
    %13 = vector.shape_cast %12 : vector<2xf32> to vector<2x1xf32>
    %14 = tpu.reciprocal %13 : vector<2x1xf32> -> vector<2x1xf32>
    %15 = vector.broadcast %14 : vector<2x1xf32> to vector<2x128xf32>
    %16 = arith.mulf %11, %15 : vector<2x128xf32>
    %c0_7 = arith.constant 0 : index
    %c0_8 = arith.constant 0 : index
    %17 = vector.load %arg3[%c0_7, %c0_8] : memref<2x128xf32, #tpu.memory_space<vmem>>, vector<2x128xf32>
    tpu.vector_store %arg3[%c0_7, %c0_8], %16 {strides = array<i32>} : memref<2x128xf32, #tpu.memory_space<vmem>>, vector<2x128xf32>,
    return
  }
}

</mosaic_0001>

<bundles_post_ra>
// kernel: claasifiernet2_forward.3
= control target key start
LH: loop header
LB: loop body
LE: loop exit
PB: predicated region body
PF: predicated region fallthrough
CT: control target
= control target key end

     0   :  { %v477_v1 = vmov 0.0   ;;  %vm478_vm0 = vmmov 0   ;;  %v22_v21 = vlaneseq  ;;  %s582_s0 = inlined_call_operand.vmem [shape: f32[2,384], index: 0, kind: input, shape index: {}]   ;;  %s583_s1 = inlined_call_operand.vmem [shape: bf16[384,128], index: 1, kind: input, shape index: {}]   ;;  %s584_s2 = inlined_call_operand.vmem [shape: f32[1,128], index: 2, kind: input, shape index: {}]   ;;  %s585_s3 = inlined_call_operand.hbm [shape: f32[2,128], index: 3, kind: output, shape index: {}]  }
   0x1   :  { %v426_v0 = vld [vmem:[%s583_s1 + $0x78] sm:$0xff]   ;;  %402 = vmatprep.subr.bf16.mxu1 %v477_v1  ;;  %418 = vmatprep.mubr.msk.bf16.mxu1 %vm478_vm0, %v477_v1  ;;  %v429_v4 = vld [vmem:[%s583_s1 + $0x70] sm:$0xff]   ;;  %v432_v7 = vld [vmem:[%s583_s1 + $0x68] sm:$0xff]  }
   0x2   :  { %v427_v2 = vld [vmem:[%s583_s1 + $0x38] sm:$0xff]   ;;  %371 = vmatprep.subr.bf16.mxu0 %v426_v0  ;;  %v430_v5 = vld [vmem:[%s583_s1 + $0x30] sm:$0xff]   ;;  %v433_v8 = vld [vmem:[%s583_s1 + $0x28] sm:$0xff]  }
   0x3   :  { %v428_v3 = vld [vmem:[%s583_s1 + $0xb8] sm:$0xff]   ;;  %372 = vmatpush3.bf16.msra.mxu0 %v427_v2  ;;  %v431_v6 = vld [vmem:[%s583_s1 + $0xb0] sm:$0xff]   ;;  %v434_v9 = vld [vmem:[%s583_s1 + $0xa8] sm:$0xff]  }
   0x4   :  { %403 = vmatpush3.bf16.msra.mxu1 %v428_v3  ;;  %373 = vmatprep.subr.bf16.mxu0 %v429_v4  ;;  %v435_v10 = vld [vmem:[%s583_s1 + $0x60] sm:$0xff]   ;;  %v438_v13 = vld [vmem:[%s583_s1 + $0x58] sm:$0xff]   ;;  %v441_v16 = vld [vmem:[%s583_s1 + $0x50] sm:$0xff]  }
   0x5   :  { %404 = vmatprep.subr.bf16.mxu1 %v477_v1  ;;  %v436_v11 = vld [vmem:[%s583_s1 + $0x20] sm:$0xff]   ;;  %v439_v14 = vld [vmem:[%s583_s1 + $0x18] sm:$0xff]   ;;  %v442_v17 = vld [vmem:[%s583_s1 + $0x10] sm:$0xff]  }
   0x6   :  { %v437_v12 = vld [vmem:[%s583_s1 + $0xa0] sm:$0xff]   ;;  %v440_v15 = vld [vmem:[%s583_s1 + $0x98] sm:$0xff]   ;;  %v443_v18 = vld [vmem:[%s583_s1 + $0x90] sm:$0xff]  }
   0x7   :  { %374 = vmatpush3.bf16.msra.mxu0 %v430_v5  ;;  %v444_v19 = vld [vmem:[%s583_s1 + $0x48] sm:$0xff]   ;;  %v447_v23 = vld [vmem:[%s583_s1 + $0x40] sm:$0xff]  }
   0x8   :  { %405 = vmatpush3.bf16.msra.mxu1 %v431_v6  ;;  %375 = vmatprep.subr.bf16.mxu0 %v432_v7  ;;  %v445_v20 = vld [vmem:[%s583_s1 + $0x8] sm:$0xff]   ;;  %v16_v24 = vld [vmem:[%s582_s0] sm:$0x3f] }
   0x9   :  { %406 = vmatprep.subr.bf16.mxu1 %v477_v1  ;;  %v446_v22 = vld [vmem:[%s583_s1 + $0x88] sm:$0xff]  }
   0xb   :  { %376 = vmatpush3.bf16.msra.mxu0 %v433_v8 }
   0xc   :  { %407 = vmatpush3.bf16.msra.mxu1 %v434_v9  ;;  %377 = vmatprep.subr.bf16.mxu0 %v435_v10 }
   0xd   :  { %408 = vmatprep.subr.bf16.mxu1 %v477_v1 }
   0xf   :  { %378 = vmatpush3.bf16.msra.mxu0 %v436_v11 }
  0x10   :  { %409 = vmatpush3.bf16.msra.mxu1 %v437_v12  ;;  %379 = vmatprep.subr.bf16.mxu0 %v438_v13 }
  0x11   :  { %410 = vmatprep.subr.bf16.mxu1 %v477_v1 }
  0x13   :  { %380 = vmatpush3.bf16.msra.mxu0 %v439_v14 }
  0x14   :  { %411 = vmatpush3.bf16.msra.mxu1 %v440_v15  ;;  %381 = vmatprep.subr.bf16.mxu0 %v441_v16 }
  0x15   :  { %412 = vmatprep.subr.bf16.mxu1 %v477_v1 }
  0x17   :  { %382 = vmatpush3.bf16.msra.mxu0 %v442_v17 }
  0x18   :  { %413 = vmatpush3.bf16.msra.mxu1 %v443_v18  ;;  %383 = vmatprep.subr.bf16.mxu0 %v444_v19 }
  0x19   :  { %8 = vsyncpa [#allocation3], 0  ;;  %414 = vmatprep.subr.bf16.mxu1 %v477_v1  ;;  %v479_v25 = vmov 1983009808   ;;  %v23_v27 = vshrl.u32 %v22_v21, 7  ;;  %v448_v28 = vld [vmem:[%s583_s1] sm:$0xff]   ;;  %v18_v29 = vcombine.high %v16_v24, %v16_v24 }
  0x1a   :  { %v20_v26 = vunpack.c.l.s4 %v479_v25  ;;  %v449_v31 = vld [vmem:[%s583_s1 + $0x80] sm:$0xff]   ;;  %vm319_vm1 = vcmask 1041408   ;;  %s480_s1 = smov [#allocation2]  }
  0x1b   :  { %384 = vmatpush3.bf16.msra.mxu0 %v445_v20  ;;  %v346_v43 = vld [vmem:[%s584_s2] ss:$0 sm:$0xff]  ;;  %s338_s2 = sshll.u32 %s480_s1, 4  ;;  %s339_s2 = int_to_ptr.vmem [resolvable:$true] %s338_s2 }
  0x1c   :  { %v21_v30 = vunpack.c.0.s8 %v20_v26  ;;  %415 = vmatpush3.bf16.msra.mxu1 %v446_v22  ;;  %385 = vmatprep.subr.bf16.mxu0 %v447_v23  ;;  %s455_s9 = scalar_lea.vmem %s339_s2, 32  ;;  %p460_p1 = scmp.lt.s32.totalorder %s339_s2, %s339_s2 }
  0x1d   :  { %416 = vmatprep.subr.bf16.mxu1 %v477_v1  ;;  %p456_p0 = scmp.ne.s32.totalorder %s339_s2, %s455_s9  ;;  %p461_p2 = scmp.lt.s32.totalorder %s455_s9, %s455_s9 }
  0x1e   :  { %v24_v32 = vsub.s32 %v21_v30, %v23_v27 }
  0x1f   :  { %386 = vmatpush3.bf16.msra.mxu0 %v448_v28  ;;  %p462_p3 = por %p461_p2, %p460_p1 }
  0x20   :  { %v25_v33 = vrot.slane %v16_v24, %v24_v32  ;;  %v32_v34 = vrot.slane %v18_v29, %v24_v32  ;;  %417 = vmatpush3.bf16.msra.mxu1 %v449_v31 }
  0x21   :  { %p463_p4 = pnand %p462_p3, %p456_p0 }
  0x22   :  { %v33_v35 = vcombine.high %v25_v33, %v25_v33  ;;  %v39_v36 = vpack.c.bf16 %v32_v34, %v32_v34  ;;  %v37_v37 = vpack.c.bf16 %v25_v33, %v25_v33 }
  0x24   :  { %v38_v38 = vpack.c.bf16 %v33_v35, %v33_v35  ;;  %419 = vmatmul.mubr.bf16.vlgmr.msra.gmra.mxu1 %v39_v36 }
  0x26   :  { %271 = vmatprep.mubr.bf16.mxu0 %v38_v38 }
  0x27   :  { %272 = vmatmul.mubr.bf16.vlgmr.msra.gmra.mxu0 %v37_v37 }
  0xe4   :  { %v313_v39 = vpop.f32.mrf.mxu1 }
  0xe6   :  { %v420_v40 = vpop.f32.mrf.mxu1 }
  0xe7   :  { %v387_v41 = vpop.f32.mrf.mxu0 }
  0xe8   :  { %v316_v42 = vpop.f32.mrf.mxu1 }
  0xe9   :  { %v388_v44 = vpop.f32.mrf.mxu0 }
  0xea   :  { %v389_v45 = vadd.f32 %v388_v44, %v387_v41  ;;  %v421_v46 = vpop.f32.mrf.mxu1 }
  0xeb   :  { %v390_v47 = vpop.f32.mrf.mxu0 }
  0xec   :  { %v274_v48 = vadd.f32 %v389_v45, %v346_v43 }
  0xed   :  { %v391_v49 = vpop.f32.mrf.mxu0 }
  0xee   :  { %v314_v50 = vadd.f32 %v313_v39, %v274_v48 }
  0xf0   :  { %v320_v51 = vsel %vm319_vm1, %v314_v50, -inf }
  0xf1   :  { %321 = vmax.xlane.f32.xlu0 %v320_v51 }
 0x17a   :  { %v322_v52 = vpop.xlane.xlu0 %321 }
 0x17b   :  { %v323_v53 = vsub.f32 %v314_v50, %v322_v52 }
 0x17d   :  { %v324_v54 = vmul.f32 1.442695, %v323_v53 }
 0x17f   :  { %451 = vpow2.f32 %v324_v54 }
 0x18c   :  { %v452_v55 = vpop.eup %451 }
 0x18d   :  { %v326_v56 = vsel %vm319_vm1, %v452_v55, 0.0 }
 0x18e   :  { %327 = vadd.xlane.f32.xlu0 %v326_v56 }
 0x217   :  { %v328_v57 = vpop.xlane.xlu0 %327 }
 0x218   :  { %453 = vrcp.f32 %v328_v57 }
 0x225   :  { %v454_v58 = vpop.eup %453 }
 0x226   :  { %v330_v59 = vmul.f32 %v454_v58, %v452_v55 }
 0x228   :  { %331 = vst [vmem:[#allocation2] sm:$0x3] %v330_v59 }
 0x229   :  { %466 = shalt.err (!%p463_p4)
}
 0x22a   :  { %341 = dma.vmem_to_hbm [thread:$0]  %s339_s2, 32, %s585_s3, [#allocation3]  }
 0x22b   :  { %475 = dma.done.wait [#allocation3], 32  }
 0x22c   :  { %476 = vsyncadd [#allocation3], 4294967264 }
 0x22d   :  { %345 = vsyncpa [#allocation3], 1 }

// kernel: claasifiernet2_forward.2
= control target key start
LH: loop header
LB: loop body
LE: loop exit
PB: predicated region body
PF: predicated region fallthrough
CT: control target
= control target key end

     0   :  { %s6900_s24 = smov 0   ;;  %s8962_s0 = inlined_call_operand.vmem [shape: bf16[2,400,36], index: 0, kind: input, shape index: {}]   ;;  %s8963_s1 = inlined_call_operand.vmem [shape: bf16[36,128], index: 1, kind: input, shape index: {}]   ;;  %s8964_s2 = inlined_call_operand.vmem [shape: f32[1,128], index: 2, kind: input, shape index: {}]   ;;  %s8965_s3 = inlined_call_operand.vmem [shape: bf16[3,3,128,128], index: 3, kind: input, shape index: {}]   ;;  %s8966_s4 = inlined_call_operand.vmem [shape: f32[1,128], index: 4, kind: input, shape index: {}]   ;;  %s8967_s5 = inlined_call_operand.vmem [shape: bf16[3,3,128,128], index: 5, kind: input, shape index: {}]   ;;  %s8968_s6 = inlined_call_operand.vmem [shape: f32[1,128], index: 6, kind: input, shape index: {}]   ;;  %s8969_s7 = inlined_call_operand.vmem [shape: f32[2,64,128], index: 7, kind: output, shape index: {}]  }
   0x1 LB: > { %s5251_s25 = sadd.s32 4294967295, %s6856_s24   ;;  %p5255_p0 = scmp.ge.s32.totalorder %s6856_s24, 1  ;;  %s6856_s24 = sphi %s6900_s24, %s17_s24  }
   0x2   : > { %p237_p1 = scmp.lt.s32.totalorder %s6856_s24, 3 }
   0x4   : > { %p238_p2 = pnand %p5255_p0, %p237_p1 }
   0x6   : > { %241 = sbr.rel (%p238_p2) target bundleno = 1036 (0x40c), region = 48 }
   0xb   : > { %v6667_v0 = vld [vmem:[%s8963_s1 + $0x10] ss:$0 sps:$4 sm:$0x33]   ;;  %vm388_vm0 = vcmask 1041408   ;;  %v6669_v2 = vld [vmem:[%s8963_s1 + $0x8] sm:$0xff]   ;;  %v6671_v6 = vld [vmem:[%s8963_s1] sm:$0xff]  }
   0xc   : > { %v6668_v1 = vld [vmem:[%s8963_s1 + $0x10] ss:$0 sps:$4 sm:$0x33]   ;;  %6653 = vmatprep.subr.msk.bf16.mxu0 %vm388_vm0, %v6667_v0  ;;  %v390_v3 = vsel %vm388_vm0, %v6667_v0, 0  ;;  %v6670_v4 = vld [vmem:[%s8963_s1 + $0x8] sm:$0xff]   ;;  %v6672_v7 = vld [vmem:[%s8963_s1] sm:$0xff]  }
   0xd   : > { %6654 = vmatprep.subr.msk.bf16.mxu1 %vm388_vm0, %v6668_v1  ;;  %6038 = vmatpush3.bf16.msra.mxu0 %v390_v3  ;;  %v629_v5 = vsel %vm388_vm0, %v6668_v1, 0  ;;  %p269_p3 = scmp.lt.s32.totalorder %s5251_s25, 1  ;;  %v6677_v8 = vld [vmem:[%s8963_s1 + $0x10] ss:$0 sps:$4 sm:$0x33]   ;;  %v6858_v9 = vmov 0.0  }
   0xe   : > { %6060 = vmatpush3.bf16.msra.mxu1 %v629_v5  ;;  %6039 = vmatprep.subr.bf16.mxu0 %v6669_v2  ;;  %1084 = vst [vmem:[#allocation3] sm:$0xff] %v6858_v9  ;;  %1085 = vst [vmem:[#allocation3 + $0x8] sm:$0xff] %v6858_v9  ;;  %vm363_vm1 = vcmask 293888   ;;  %v6696_v10 = vld [vmem:[%s8963_s1 + $0x10] ss:$0 sps:$4 sm:$0x33]  }
   0xf   : > { %6061 = vmatprep.subr.bf16.mxu1 %v6670_v4  ;;  %s9117_s25 = smov (!%p269_p3, %s5251_s25), 1  ;;  %1086 = vst [vmem:[#allocation3 + $0x10] sm:$0xff] %v6858_v9  ;;  %1087 = vst [vmem:[#allocation3 + $0x18] sm:$0xff] %v6858_v9  ;;  %v6682_v12 = vld [vmem:[%s8963_s1 + $0x8] sm:$0xff]   ;;  %v868_v15 = vsel %vm388_vm0, %v6677_v8, 0  ;;  %v6687_v18 = vld [vmem:[%s8963_s1] sm:$0xff]  }
  0x10   : > { %1088 = vst [vmem:[#allocation3 + $0x20] sm:$0xff] %v6858_v9  ;;  %1089 = vst [vmem:[#allocation3 + $0x28] sm:$0xff] %v6858_v9  ;;  %s6656_s17 = smul.u32 200, %s9117_s25  ;;  %v1037_v19 = vsel %vm388_vm0, %v6696_v10, 0  ;;  %v6699_v21 = vld [vmem:[%s8963_s1 + $0x8] sm:$0xff]   ;;  %v6700_v26 = vld [vmem:[%s8963_s1] sm:$0xff]  }
  0x11   : > { %6040 = vmatpush3.bf16.msra.mxu0 %v6669_v2  ;;  %1090 = vst [vmem:[#allocation3 + $0x30] sm:$0xff] %v6858_v9  ;;  %1091 = vst [vmem:[#allocation3 + $0x38] sm:$0xff] %v6858_v9  ;;  %vm6859_vm2 = vmmov 0   ;;  %v6704_v42 = vld [vmem:[%s8965_s3 + $0x78] sm:$0xff]   ;;  %v6706_v44 = vld [vmem:[%s8965_s3 + $0x70] sm:$0xff]   ;;  %vm1154_vm3 = vcmask 1040384  }
  0x12   : > { %6062 = vmatpush3.bf16.msra.mxu1 %v6670_v4  ;;  %6041 = vmatprep.subr.bf16.mxu0 %v6671_v6  ;;  %1092 = vst [vmem:[#allocation3 + $0x40] sm:$0xff] %v6858_v9  ;;  %1093 = vst [vmem:[#allocation3 + $0x48] sm:$0xff] %v6858_v9  ;;  %s6957_s20 = scalar_lea.vmem %s8962_s0, %s6656_s17  ;;  %v6705_v43 = vld [vmem:[%s8965_s3 + $0x38] sm:$0xff]   ;;  %v6708_v45 = vld [vmem:[%s8965_s3 + $0x68] sm:$0xff]   ;;  %vm1157_vm4 = vcmask 1042432   ;;  %vm1159_vm5 = vcmask 1043456  }
  0x13   : > { %1094 = vst [vmem:[#allocation3 + $0x50] sm:$0xff] %v6858_v9  ;;  %1095 = vst [vmem:[#allocation3 + $0x58] sm:$0xff] %v6858_v9  ;;  %6063 = vmatprep.subr.bf16.mxu1 %v6672_v7  ;;  %v6673_v11 = vld [vmem:[%s6957_s20] sm:$0xff]   ;;  %v6675_v14 = vld [vmem:[%s6957_s20 + $0x8] sm:$0xff]   ;;  %vm1161_vm6 = vcmask 1044480   ;;  %vm1163_vm7 = vcmask 1045504  }
  0x14   : > { %1096 = vst [vmem:[#allocation3 + $0x60] sm:$0xff] %v6858_v9  ;;  %1097 = vst [vmem:[#allocation3 + $0x68] sm:$0xff] %v6858_v9  ;;  %v6674_v13 = vld [vmem:[%s6957_s20 + $0x40] sm:$0xff]   ;;  %6043 = vmatprep.mubr.msk.bf16.mxu0 %vm363_vm1, %v6673_v11  ;;  %v6676_v16 = vld [vmem:[%s6957_s20 + $0x48] sm:$0xff]   ;;  %vm1165_vm8 = vcmask 1046528   ;;  %s5729_s14 = sshll.u32 %s9117_s25, 6 }
  0x15   : > { %1098 = vst [vmem:[#allocation3 + $0x70] sm:$0xff] %v6858_v9  ;;  %1099 = vst [vmem:[#allocation3 + $0x78] sm:$0xff] %v6858_v9  ;;  %6042 = vmatpush3.bf16.msra.mxu0 %v6671_v6  ;;  %6065 = vmatprep.mubr.msk.bf16.mxu1 %vm363_vm1, %v6674_v13  ;;  %v6678_v17 = vld [vmem:[%s6957_s20 + $0x10] sm:$0xff]   ;;  %v6680_v22 = vld [vmem:[%s6957_s20 + $0x18] sm:$0xff]   ;;  %s8916_s16 = scalar_lea.vmem %s8969_s7, %s5729_s14 }
  0x16   : > { %1100 = vst [vmem:[#allocation3 + $0x80] sm:$0xff] %v6858_v9  ;;  %1101 = vst [vmem:[#allocation3 + $0x88] sm:$0xff] %v6858_v9  ;;  %6064 = vmatpush3.bf16.msra.mxu1 %v6672_v7  ;;  %6655 = vmatprep.subr.msk.bf16.mxu0 %vm388_vm0, %v6677_v8  ;;  %v6679_v20 = vld [vmem:[%s6957_s20 + $0x50] sm:$0xff]   ;;  %v6681_v23 = vld [vmem:[%s6957_s20 + $0x58] sm:$0xff]  }
  0x17   : > { %6103 = vmatprep.subr.bf16.mxu1 %v6858_v9  ;;  %v6683_v24 = vld [vmem:[%s6957_s20 + $0x20] sm:$0xff]   ;;  %v6685_v27 = vld [vmem:[%s6957_s20 + $0x28] sm:$0xff]   ;;  %v6688_v29 = vld [vmem:[%s6957_s20 + $0x30] sm:$0xff]  }
  0x18   : > { %6044 = vmatmul.mubr.msk.bf16.vlgmr.msra.gmra.mxu0 %vm363_vm1, %v6675_v14  ;;  %v6684_v25 = vld [vmem:[%s6957_s20 + $0x60] sm:$0xff]   ;;  %v6686_v28 = vld [vmem:[%s6957_s20 + $0x68] sm:$0xff]   ;;  %v6689_v30 = vld [vmem:[%s6957_s20 + $0x70] sm:$0xff]  }
  0x19   : > { %6066 = vmatmul.mubr.msk.bf16.vlgmr.msra.gmra.mxu1 %vm363_vm1, %v6676_v16  ;;  %6082 = vmatpush3.bf16.msra.mxu0 %v868_v15  ;;  %v6690_v31 = vld [vmem:[%s6957_s20 + $0x38] sm:$0xff]   ;;  %v6692_v33 = vld [vmem:[%s6957_s20 + $0x80] sm:$0xff]   ;;  %v6693_v34 = vld [vmem:[%s6957_s20 + $0x88] sm:$0xff]  }
  0x1a   : > { %6047 = vmatprep.mubr.msk.bf16.mxu0 %vm363_vm1, %v6678_v17  ;;  %6083 = vmatprep.subr.bf16.mxu0 %v6682_v12  ;;  %v6691_v32 = vld [vmem:[%s6957_s20 + $0x78] sm:$0xff]   ;;  %v6694_v35 = vld [vmem:[%s6957_s20 + $0x90] sm:$0xff]   ;;  %v6703_v36 = vld [vmem:[%s6957_s20 + $0xc0] sm:$0xff]  }
  0x1b   : > { %6069 = vmatprep.mubr.msk.bf16.mxu1 %vm363_vm1, %v6679_v20  ;;  %6104 = vmatpush3.bf16.msra.mxu1 %v1037_v19  ;;  %v6695_v37 = vld [vmem:[%s6957_s20 + $0x98] sm:$0xff]   ;;  %v6697_v38 = vld [vmem:[%s6957_s20 + $0xa0] sm:$0xff]   ;;  %v6698_v39 = vld [vmem:[%s6957_s20 + $0xa8] sm:$0xff]  }
  0x1c   : > { %6105 = vmatprep.subr.bf16.mxu1 %v6858_v9  ;;  %v6701_v40 = vld [vmem:[%s6957_s20 + $0xb0] sm:$0xff]   ;;  %v6702_v41 = vld [vmem:[%s6957_s20 + $0xb8] sm:$0xff]   ;;  %v6710_v47 = vld [vmem:[%s8965_s3 + $0x60] sm:$0xff]  }
  0x1d   : > { %6084 = vmatpush3.bf16.msra.mxu0 %v6682_v12  ;;  %v6707_v46 = vld [vmem:[%s8965_s3 + $0x30] sm:$0xff]   ;;  %v6709_v48 = vld [vmem:[%s8965_s3 + $0x28] sm:$0xff]   ;;  %v6712_v49 = vld [vmem:[%s8965_s3 + $0x58] sm:$0xff]  }
  0x1e   : > { %6085 = vmatprep.subr.bf16.mxu0 %v6687_v18  ;;  %v6711_v50 = vld [vmem:[%s8965_s3 + $0x20] sm:$0xff]   ;;  %v6714_v51 = vld [vmem:[%s8965_s3 + $0x50] sm:$0xff]   ;;  %v6713_v52 = vld [vmem:[%s8965_s3 + $0x18] sm:$0xff]  }
  0x1f   : > { %6106 = vmatpush3.bf16.msra.mxu1 %v6699_v21  ;;  %v6716_v53 = vld [vmem:[%s8965_s3 + $0x48] sm:$0xff]   ;;  %v6715_v54 = vld [vmem:[%s8965_s3 + $0x10] sm:$0xff]   ;;  %v6718_v55 = vld [vmem:[%s8965_s3 + $0x40] sm:$0xff]  }
  0x20   : > { %6048 = vmatmul.mubr.msk.bf16.gmra.mxu0 %vm363_vm1, %v6680_v22  ;;  %6107 = vmatprep.subr.bf16.mxu1 %v6858_v9  ;;  %v6717_v56 = vld [vmem:[%s8965_s3 + $0x8] sm:$0xff]   ;;  %v6719_v57 = vld [vmem:[%s8965_s3] sm:$0xff]   ;;  %v7089_v0 = vld [vmem:[%s8965_s3 + $0xb8] sm:$0xff]  }
  0x21   : > { %6070 = vmatmul.mubr.msk.bf16.gmra.mxu1 %vm363_vm1, %v6681_v23  ;;  %6051 = vmatprep.mubr.msk.bf16.mxu0 %vm363_vm1, %v6683_v24  ;;  %v7082_v58 = vld [vmem:[%s8964_s2] ss:$0 sm:$0xff]  ;;  %v6721_v1 = vld [vmem:[%s8965_s3 + $0xf8] sm:$0xff]  }
  0x22   : > { %6073 = vmatprep.mubr.msk.bf16.mxu1 %vm363_vm1, %v6684_v25  ;;  %6086 = vmatpush3.bf16.msra.mxu0 %v6687_v18 }
  0x23   : > { %6108 = vmatpush3.bf16.msra.mxu1 %v6700_v26  ;;  %6113 = vmatprep.subr.bf16.mxu0 %v6704_v42 }
  0x24   : > { %6145 = vmatprep.subr.bf16.mxu1 %v6705_v43 }
  0x28   : > { %6052 = vmatmul.mubr.msk.bf16.gmra.mxu0 %vm363_vm1, %v6685_v27 }
  0x29   : > { %6074 = vmatmul.mubr.msk.bf16.gmra.mxu1 %vm363_vm1, %v6686_v28  ;;  %6055 = vmatprep.mubr.msk.bf16.mxu0 %vm363_vm1, %v6688_v29 }
  0x2a   : > { %6077 = vmatprep.mubr.msk.bf16.mxu1 %vm363_vm1, %v6689_v30 }
  0x30   : > { %6056 = vmatmul.mubr.msk.bf16.gmra.mxu0 %vm363_vm1, %v6690_v31 }
  0x31   : > { %6078 = vmatmul.mubr.msk.bf16.gmra.mxu1 %vm363_vm1, %v6691_v32  ;;  %6087 = vmatprep.mubr.msk.bf16.mxu0 %vm363_vm1, %v6692_v33 }
  0x32   : > { %6109 = vmatprep.mubr.msk.bf16.mxu1 %vm6859_vm2, %v6858_v9 }
  0x38   : > { %6088 = vmatmul.mubr.msk.bf16.vlgmr.msra.gmra.mxu0 %vm363_vm1, %v6693_v34 }
  0x39   : > { %6091 = vmatprep.mubr.msk.bf16.mxu0 %vm363_vm1, %v6694_v35  ;;  %6110 = vmatmul.mubr.msk.bf16.vlgmr.msra.gmra.mxu1 %vm363_vm1, %v6703_v36 }
  0x3a   : > { %6114 = vmatpush3.bf16.msra.mxu0 %v6704_v42  ;;  %6146 = vmatpush3.bf16.msra.mxu1 %v6705_v43 }
  0x3b   : > { %6115 = vmatprep.subr.bf16.mxu0 %v6706_v44  ;;  %6147 = vmatprep.subr.bf16.mxu1 %v6707_v46 }
  0x3e   : > { %6116 = vmatpush3.bf16.msra.mxu0 %v6706_v44  ;;  %6148 = vmatpush3.bf16.msra.mxu1 %v6707_v46 }
  0x3f   : > { %6117 = vmatprep.subr.bf16.mxu0 %v6708_v45  ;;  %6149 = vmatprep.subr.bf16.mxu1 %v6709_v48 }
  0x40   : > { %6092 = vmatmul.mubr.msk.bf16.gmra.mxu0 %vm363_vm1, %v6695_v37 }
  0x41   : > { %6095 = vmatprep.mubr.msk.bf16.mxu0 %vm363_vm1, %v6697_v38 }
  0x42   : > { %6118 = vmatpush3.bf16.msra.mxu0 %v6708_v45  ;;  %6150 = vmatpush3.bf16.msra.mxu1 %v6709_v48 }
  0x43   : > { %6119 = vmatprep.subr.bf16.mxu0 %v6710_v47  ;;  %6151 = vmatprep.subr.bf16.mxu1 %v6711_v50 }
  0x46   : > { %6120 = vmatpush3.bf16.msra.mxu0 %v6710_v47  ;;  %6152 = vmatpush3.bf16.msra.mxu1 %v6711_v50 }
  0x47   : > { %6121 = vmatprep.subr.bf16.mxu0 %v6712_v49  ;;  %6153 = vmatprep.subr.bf16.mxu1 %v6713_v52 }
  0x48   : > { %6096 = vmatmul.mubr.msk.bf16.gmra.mxu0 %vm363_vm1, %v6698_v39 }
  0x49   : > { %6099 = vmatprep.mubr.msk.bf16.mxu0 %vm363_vm1, %v6701_v40 }
  0x4a   : > { %6122 = vmatpush3.bf16.msra.mxu0 %v6712_v49  ;;  %6154 = vmatpush3.bf16.msra.mxu1 %v6713_v52 }
  0x4b   : > { %6123 = vmatprep.subr.bf16.mxu0 %v6714_v51  ;;  %6155 = vmatprep.subr.bf16.mxu1 %v6715_v54 }
  0x4e   : > { %6124 = vmatpush3.bf16.msra.mxu0 %v6714_v51  ;;  %6156 = vmatpush3.bf16.msra.mxu1 %v6715_v54 }
  0x4f   : > { %6125 = vmatprep.subr.bf16.mxu0 %v6716_v53  ;;  %6157 = vmatprep.subr.bf16.mxu1 %v6717_v56 }
  0x50   : > { %6100 = vmatmul.mubr.msk.bf16.gmra.mxu0 %vm363_vm1, %v6702_v41 }
  0x52   : > { %6126 = vmatpush3.bf16.msra.mxu0 %v6716_v53  ;;  %6158 = vmatpush3.bf16.msra.mxu1 %v6717_v56 }
  0x53   : > { %6127 = vmatprep.subr.bf16.mxu0 %v6718_v55  ;;  %6159 = vmatprep.subr.bf16.mxu1 %v6719_v57 }
  0x56   : > { %6128 = vmatpush3.bf16.msra.mxu0 %v6718_v55  ;;  %6160 = vmatpush3.bf16.msra.mxu1 %v6719_v57 }
  0x57   : > { %6177 = vmatprep.subr.bf16.mxu0 %v7089_v0  ;;  %6209 = vmatprep.subr.bf16.mxu1 %v6721_v1 }
  0xd8   : > { %v6045_v59 = vpop.f32.mrf.mxu0 }
  0xd9   : > { %v435_v60 = vadd.f32 %v6045_v59, %v7082_v58  ;;  %v6067_v61 = vpop.f32.mrf.mxu1 }
  0xda   : > { %v674_v62 = vadd.f32 %v6067_v61, %v7082_v58  ;;  %v426_v63 = vpop.f32.mrf.mxu0 }
  0xdb   : > { %v491_v2 = vmax.f32 %v435_v60, 0.0  ;;  %v427_v3 = vadd.f32 %v7082_v58, %v426_v63  ;;  %v665_v4 = vpop.f32.mrf.mxu1 }
  0xdc   : > { %v730_v5 = vmax.f32 %v674_v62, 0.0  ;;  %v7096_v6 = vadd.f32 %v7082_v58, %v665_v4  ;;  %v6046_v7 = vpop.f32.mrf.mxu0 }
  0xdd   : > { %507 = vst [vmem:[#allocation2 + $0x10] sm:$0xff] %v491_v2  ;;  %v489_v8 = vmax.f32 %v427_v3, 0.0  ;;  %v438_v9 = vadd.f32 %v6046_v7, %v7082_v58  ;;  %v6068_v10 = vpop.f32.mrf.mxu1 }
  0xde   : > { %746 = vst [vmem:[#allocation2 + $0x90] sm:$0xff] %v730_v5  ;;  %v677_v12 = vadd.f32 %v6068_v10, %v7082_v58  ;;  %v429_v13 = vpop.f32.mrf.mxu0 }
  0xdf   : > { %v492_v14 = vmax.f32 %v438_v9, 0.0  ;;  %v7103_v15 = vadd.f32 %v7082_v58, %v429_v13  ;;  %v668_v16 = vpop.f32.mrf.mxu1 }
  0xe0   : > { %v731_v17 = vmax.f32 %v677_v12, 0.0  ;;  %v669_v18 = vadd.f32 %v7082_v58, %v668_v16  ;;  %v6049_v19 = vpop.f32.mrf.mxu0 }
  0xe1   : > { %508 = vst [vmem:[#allocation2 + $0x18] sm:$0xff] %v492_v14  ;;  %v490_v20 = vmax.f32 %v7103_v15, 0.0  ;;  %v7108_v21 = vadd.f32 %v6049_v19, %v7082_v58  ;;  %v6071_v22 = vpop.f32.mrf.mxu1 }
  0xe2   : > { %747 = vst [vmem:[#allocation2 + $0x98] sm:$0xff] %v731_v17  ;;  %v729_v23 = vmax.f32 %v669_v18, 0.0  ;;  %v690_v24 = vadd.f32 %v6071_v22, %v7082_v58  ;;  %v442_v25 = vpop.f32.mrf.mxu0 }
  0xe3   : > { %v495_v26 = vmax.f32 %v7108_v21, 0.0  ;;  %v443_v27 = vadd.f32 %v7082_v58, %v442_v25  ;;  %v681_v28 = vpop.f32.mrf.mxu1 }
  0xe4   : > { %745 = vst [vmem:[#allocation2 + $0x88] sm:$0xff] %v729_v23  ;;  %v734_v29 = vmax.f32 %v690_v24, 0.0  ;;  %v682_v30 = vadd.f32 %v7082_v58, %v681_v28  ;;  %v6050_v31 = vpop.f32.mrf.mxu0  ;;  %v1104_v2 = vld [vmem:[#allocation2 + $0x10] sm:$0xf] }
  0xe5   : > { %v493_v32 = vmax.f32 %v443_v27, 0.0  ;;  %v454_v33 = vadd.f32 %v6050_v31, %v7082_v58  ;;  %v6072_v34 = vpop.f32.mrf.mxu1 }
  0xe6   : > { %750 = vst [vmem:[#allocation2 + $0xb0] sm:$0xff] %v734_v29  ;;  %v732_v35 = vmax.f32 %v682_v30, 0.0  ;;  %v693_v36 = vadd.f32 %v6072_v34, %v7082_v58  ;;  %v445_v37 = vpop.f32.mrf.mxu0 }
  0xe7   : > { %509 = vst [vmem:[#allocation2 + $0x20] sm:$0xff] %v493_v32  ;;  %v496_v38 = vmax.f32 %v454_v33, 0.0  ;;  %v446_v39 = vadd.f32 %v7082_v58, %v445_v37  ;;  %v684_v40 = vpop.f32.mrf.mxu1 }
  0xe8   : > { %v1105_v41 = vld [vmem:[#allocation2 + $0x14] sm:$0xff]  ;;  %v735_v42 = vmax.f32 %v693_v36, 0.0  ;;  %v685_v43 = vadd.f32 %v7082_v58, %v684_v40  ;;  %v6053_v44 = vpop.f32.mrf.mxu0 }
  0xe9   : > { %v1108_v45 = vmax.f32 %v489_v8, %v1105_v41  ;;  %512 = vst [vmem:[#allocation2 + $0x38] sm:$0xff] %v496_v38  ;;  %v494_v46 = vmax.f32 %v446_v39, 0.0  ;;  %v7119_v47 = vadd.f32 %v6053_v44, %v7082_v58  ;;  %v6075_v48 = vpop.f32.mrf.mxu1  ;;  %v7136_v10 = vld [vmem:[#allocation2 + $0x94] sm:$0xff]  ;;  %v1376_v36 = vld [vmem:[#allocation2 + $0x9c] sm:$0xf] }
  0xea   : > { %751 = vst [vmem:[#allocation2 + $0xb8] sm:$0xff] %v735_v42  ;;  %v733_v49 = vmax.f32 %v685_v43, 0.0  ;;  %v7122_v50 = vadd.f32 %v6075_v48, %v7082_v58  ;;  %v458_v51 = vpop.f32.mrf.mxu0 }
  0xeb   : > { %v1112_v52 = vrot.slane %v1108_v45, 1  ;;  %v499_v53 = vmax.f32 %v7119_v47, 0.0  ;;  %v697_v54 = vpop.f32.mrf.mxu1  ;;  %v7125_v55 = vld [vmem:[#allocation2 + $0x8c] sm:$0xff]  ;;  %v459_v57 = vadd.f32 %v7082_v58, %v458_v51  ;;  %v1115_v61 = vrot.slane %v1108_v45, 2 }
  0xec   : > { %v738_v56 = vmax.f32 %v7122_v50, 0.0  ;;  %v6054_v59 = vpop.f32.mrf.mxu0  ;;  %v698_v62 = vadd.f32 %v7082_v58, %v697_v54  ;;  %v1380_v14 = vmax.f32 %v7125_v55, %v732_v35  ;;  %v1176_v28 = vmax.f32 %v1105_v41, %v494_v46 }
  0xed   : > { %v1114_v60 = vmax.f32 %v1108_v45, %v1112_v52  ;;  %v7131_v63 = vadd.f32 %v6054_v59, %v7082_v58  ;;  %v6076_v1 = vpop.f32.mrf.mxu1  ;;  %v497_v5 = vmax.f32 %v459_v57, 0.0  ;;  %v1381_v29 = vmax.f32 %v7136_v10, %v733_v49  ;;  %v1379_v37 = vld [vmem:[#allocation2 + $0xb0] sm:$0xf] }
  0xee   : > { %v1106_v3 = vld [vmem:[#allocation2 + $0x1c] sm:$0xff]  ;;  %v1107_v4 = vld [vmem:[#allocation2 + $0x24] sm:$0xf]  ;;  %v709_v7 = vadd.f32 %v6076_v1, %v7082_v58  ;;  %v461_v8 = vpop.f32.mrf.mxu0  ;;  %v736_v16 = vmax.f32 %v698_v62, 0.0 }
  0xef   : > { %v7134_v9 = vmax.f32 %v1114_v60, %v1115_v61  ;;  %v1109_v12 = vmax.f32 %v490_v20, %v1106_v3  ;;  %v1110_v13 = vmax.f32 %v1104_v2, %v1107_v4  ;;  %v700_v15 = vpop.f32.mrf.mxu1  ;;  %513 = vst [vmem:[#allocation2 + $0x40] sm:$0xff] %v497_v5  ;;  %v500_v17 = vmax.f32 %v7131_v63, 0.0  ;;  %v1172_v62 = vld [vmem:[#allocation2 + $0x24] sm:$0xf] }
  0xf0   : > { %v739_v18 = vmax.f32 %v709_v7, 0.0  ;;  %v462_v19 = vadd.f32 %v7082_v58, %v461_v8  ;;  %v6057_v22 = vpop.f32.mrf.mxu0  ;;  %752 = vst [vmem:[#allocation2 + $0xc0] sm:$0xff] %v736_v16  ;;  %v701_v42 = vadd.f32 %v7082_v58, %v700_v15  ;;  %v1382_v61 = vmax.f32 %v1376_v36, %v1379_v37 }
  0xf1   : > { %v1119_v23 = vrot.slane %v1109_v12, 1  ;;  %v7141_v24 = vld [vmem:[#allocation2 + $0xb4] sm:$0xff]  ;;  %v6079_v25 = vpop.f32.mrf.mxu1  ;;  %v1137_v27 = vrot.slane %v7134_v9, 1  ;;  %v1128_v20 = vrot.slane %v1110_v13, 1  ;;  %v1122_v32 = vrot.slane %v1109_v12, 2 }
  0xf2   : > { %755 = vst [vmem:[#allocation2 + $0xd8] sm:$0xff] %v739_v18  ;;  %v474_v30 = vpop.f32.mrf.mxu0  ;;  %v1131_v33 = vrot.slane %v1110_v13, 2  ;;  %v7146_v34 = vmax.f32 %v1380_v14, %v7141_v24  ;;  %v498_v40 = vmax.f32 %v462_v19, 0.0  ;;  %v1155_v43 = vsel %vm1154_vm3, %v1114_v60, %v7134_v9 }
  0xf3   : > { %v1121_v31 = vmax.f32 %v1108_v45, %v1119_v23  ;;  %v713_v35 = vpop.f32.mrf.mxu1  ;;  %v1130_v38 = vmax.f32 %v1109_v12, %v1128_v20  ;;  %v1134_v39 = vmax.f32 %v1110_v13, %v1128_v20  ;;  %v1125_v44 = vmax.f32 %v1109_v12, %v1119_v23  ;;  %v7153_v45 = vld [vmem:[#allocation2 + $0x38] sm:$0xf] }
  0xf4   : > { %v7149_v41 = vpop.f32.mrf.mxu0  ;;  %v1390_v46 = vrot.slane %v7146_v34, 1  ;;  %v1393_v48 = vrot.slane %v7146_v34, 2  ;;  %514 = vst [vmem:[#allocation2 + $0x48] sm:$0xff] %v498_v40  ;;  %v737_v54 = vmax.f32 %v701_v42, 0.0  ;;  %v483_v57 = vadd.f32 %v6057_v22, %v7082_v58 }
  0xf5   : > { %v7157_v49 = vpop.f32.mrf.mxu1  ;;  %v7159_v51 = vmax.f32 %v1121_v31, %v1122_v32  ;;  %v1133_v52 = vmax.f32 %v1130_v38, %v1131_v33  ;;  %v1139_v60 = vrot.slane %v7134_v9, 2  ;;  %v1177_v1 = vmax.f32 %v1106_v3, %v495_v26 }
  0xf6   : > { %v7162_v59 = vpop.f32.mrf.mxu0  ;;  %v1392_v2 = vmax.f32 %v7146_v34, %v1390_v46  ;;  %v1179_v4 = vld [vmem:[#allocation2 + $0x3c] sm:$0xff]  ;;  %v1135_v7 = vmax.f32 %v1134_v39, %v1131_v33  ;;  %v1178_v12 = vmax.f32 %v1172_v62, %v7153_v45  ;;  %v7174_v15 = vsel %vm388_vm0, %v1155_v43, %v1137_v27 }
  0xf7   : > { %v7168_v5 = vpop.f32.mrf.mxu1  ;;  %v1152_v8 = vrot.slane %v1133_v52, 7  ;;  %v1182_v13 = vmax.f32 %v1176_v28, %v1179_v4  ;;  %v7176_v16 = vmax.f32 %v1125_v44, %v1122_v32  ;;  %v1384_v21 = vld [vmem:[#allocation2 + $0xbc] sm:$0xff]  ;;  %v1385_v26 = vld [vmem:[#allocation2 + $0xc4] sm:$0xf]  ;;  %v503_v3 = vmax.f32 %v483_v57, 0.0 }
  0xf8   : > { %v7171_v14 = vpop.f32.mrf.mxu0  ;;  %v7178_v18 = vmax.f32 %v1392_v2, %v1393_v48  ;;  %v1142_v22 = vrot.slane %v7159_v51, 3  ;;  %v1387_v28 = vmax.f32 %v1381_v29, %v1384_v21  ;;  %v7188_v27 = vmax.f32 %v1179_v4, %v499_v53 }
  0xf9   : > { %v7180_v19 = vpop.f32.mrf.mxu1  ;;  %v1167_v23 = vsel %vm1154_vm3, %v1152_v8, %v1135_v7  ;;  %v1186_v20 = vrot.slane %v1182_v13, 1  ;;  %v1388_v32 = vmax.f32 %v1382_v61, %v1385_v26  ;;  %519 = vst [vmem:[#allocation2 + $0x70] sm:$0xff] %v503_v3  ;;  %v7191_v33 = vadd.f32 %v6079_v25, %v7082_v58  ;;  %v7210_v7 = vld [vmem:[#allocation2 + $0xc4] sm:$0xf] }
  0xfa   : > { %v7184_v31 = vpop.f32.mrf.mxu0  ;;  %1169 = vst [vmem:[#allocation3 + $0x15] sm:$0x3] %v1167_v23  ;;  %v7194_v36 = vadd.f32 %v7082_v58, %v474_v30  ;;  %v1189_v39 = vrot.slane %v1182_v13, 2  ;;  %v1397_v40 = vrot.slane %v1387_v28, 1  ;;  %v1400_v29 = vrot.slane %v1387_v28, 2 }
  0xfb   : > { %v6111_v37 = vpop.f32.mrf.mxu1  ;;  %v1188_v38 = vmax.f32 %v1182_v13, %v1186_v20  ;;  %v1415_v43 = vrot.slane %v7178_v18, 1  ;;  %v1406_v47 = vrot.slane %v1388_v32, 1  ;;  %v1180_v53 = vld [vmem:[#allocation2 + $0x44] sm:$0xff]  ;;  %v1181_v44 = vld [vmem:[#allocation2 + $0x4c] sm:$0xf]  ;;  %v7200_v45 = vmax.f32 %v7141_v24, %v737_v54 }
  0xfc   : > { %v7196_v42 = vpop.f32.mrf.mxu0  ;;  %v714_v25 = vadd.f32 %v7082_v58, %v713_v35  ;;  %v1432_v30 = vsel %vm1154_vm3, %v1392_v2, %v7178_v18  ;;  %v1399_v52 = vmax.f32 %v7146_v34, %v1397_v40  ;;  %v1183_v57 = vmax.f32 %v1177_v1, %v1180_v53  ;;  %v7212_v24 = vld [vmem:[#allocation2 + $0xd8] sm:$0xf]  ;;  %v1311_v2 = vld [vmem:[#allocation2 + $0x88] sm:$0xf] }
  0xfd   : > { %v7203_v46 = vpop.f32.mrf.mxu1  ;;  %v1191_v48 = vmax.f32 %v1188_v38, %v1189_v39  ;;  %v1408_v62 = vmax.f32 %v1387_v28, %v1406_v47  ;;  %v1409_v4 = vrot.slane %v1388_v32, 2  ;;  %v1184_v54 = vmax.f32 %v1178_v12, %v1181_v44 }
  0xfe   : > { %v7208_v61 = vpop.f32.mrf.mxu0  ;;  %v7216_v35 = vadd.f32 %v7149_v41, %v7082_v58  ;;  %v7219_v3 = vmax.f32 %v1399_v52, %v1400_v29  ;;  %v7223_v34 = vmax.f32 %v1384_v21, %v738_v56  ;;  %v7226_v23 = vsel %vm388_vm0, %v1432_v30, %v1415_v43 }
  0xff   : > { %v6112_v8 = vpop.f32.mrf.mxu1  ;;  %v1211_v26 = vrot.slane %v1191_v48, 1  ;;  %v1228_v12 = vsel %vm1154_vm3, %v1188_v38, %v1191_v48  ;;  %v1403_v20 = vmax.f32 %v1387_v28, %v1397_v40  ;;  %v1193_v37 = vrot.slane %v1183_v57, 1 }
 0x100   : > { %v6093_v1 = vpop.f32.mrf.mxu0  ;;  %v1412_v41 = vmax.f32 %v1388_v32, %v1406_v47  ;;  %v1202_v44 = vrot.slane %v1184_v54, 1  ;;  %v7233_v52 = vmax.f32 %v1180_v53, %v500_v17  ;;  %v1213_v56 = vrot.slane %v1191_v48, 2  ;;  %v1308_v30 = vld [vmem:[#allocation2 + $0x74] sm:$0xf] }
 0x101   : > { %v7235_v21 = vmax.f32 %v1408_v62, %v1409_v4  ;;  %v1195_v8 = vmax.f32 %v1182_v13, %v1193_v37  ;;  %v1199_v43 = vmax.f32 %v1183_v57, %v1193_v37  ;;  %v1229_v28 = vsel %vm388_vm0, %v1228_v12, %v1211_v26 }
 0x102   : > { %v920_v50 = vpop.f32.mrf.mxu0  ;;  %v1196_v38 = vrot.slane %v1183_v57, 2  ;;  %v1204_v32 = vmax.f32 %v1183_v57, %v1202_v44  ;;  %v1208_v40 = vmax.f32 %v1184_v54, %v1202_v44  ;;  %v7238_v39 = vmax.f32 %v1403_v20, %v1400_v29 }
 0x103   : > { %v1314_v63 = vmax.f32 %v1308_v30, %v1311_v2  ;;  %v742_v17 = vmax.f32 %v7191_v33, 0.0  ;;  %v501_v53 = vmax.f32 %v7194_v36, 0.0  ;;  %v7242_v48 = vmax.f32 %v1412_v41, %v1409_v4  ;;  %v1317_v36 = vld [vmem:[#allocation2 + $0x9c] sm:$0xf] }
 0x104   : > { %v6094_v47 = vpop.f32.mrf.mxu0  ;;  %v7244_v13 = vmax.f32 %v1195_v8, %v1196_v38  ;;  %v1205_v62 = vrot.slane %v1184_v54, 2  ;;  %v740_v37 = vmax.f32 %v714_v25, 0.0  ;;  %v7247_v57 = vsel %vm1157_vm4, %v1229_v28, %v1213_v56 }
 0x105   : > { %v7251_v2 = vmax.f32 %v1199_v43, %v1196_v38  ;;  %517 = vst [vmem:[#allocation2 + $0x60] sm:$0xff] %v501_v53  ;;  %v504_v25 = vmax.f32 %v7216_v35, 0.0  ;;  %v7260_v54 = vadd.f32 %v7157_v49, %v7082_v58  ;;  %v7262_v41 = vmax.f32 %v1314_v63, %v1317_v36 }
 0x106   : > { %v923_v11 = vpop.f32.mrf.mxu0  ;;  %v7253_v4 = vmax.f32 %v1204_v32, %v1205_v62  ;;  %v7255_v12 = vmax.f32 %v1208_v40, %v1205_v62  ;;  %756 = vst [vmem:[#allocation2 + $0xe0] sm:$0xff] %v740_v37  ;;  %v478_v44 = vadd.f32 %v7082_v58, %v7162_v59  ;;  %v717_v56 = vadd.f32 %v7082_v58, %v7168_v5 }
 0x107   : > { %v913_v8 = vadd.f32 %v7171_v14, %v7082_v58  ;;  %v1216_v43 = vrot.slane %v7244_v13, 3  ;;  %v743_v30 = vmax.f32 %v7260_v54, 0.0  ;;  %v905_v49 = vadd.f32 %v7082_v58, %v7184_v31  ;;  %v1240_v31 = vld [vmem:[#allocation2 + $0x4c] sm:$0xf] }
 0x108   : > { %v6097_v20 = vpop.f32.mrf.mxu0  ;;  %v7276_v28 = vadd.f32 %v7196_v42, %v7082_v58  ;;  %v502_v32 = vmax.f32 %v478_v44, 0.0  ;;  %v741_v59 = vmax.f32 %v717_v56, 0.0  ;;  %v908_v5 = vadd.f32 %v7082_v58, %v7208_v61 }
 0x109   : > { %v969_v40 = vmax.f32 %v913_v8, 0.0  ;;  %v967_v63 = vmax.f32 %v905_v49, 0.0  ;;  %v929_v53 = vadd.f32 %v6093_v1, %v7082_v58  ;;  %v7283_v62 = vadd.f32 %v7082_v58, %v920_v50 }
 0x10a   : > { %v936_v38 = vpop.f32.mrf.mxu0  ;;  %v970_v14 = vmax.f32 %v7276_v28, 0.0  ;;  %518 = vst [vmem:[#allocation2 + $0x68] sm:$0xff] %v502_v32  ;;  %757 = vst [vmem:[#allocation2 + $0xe8] sm:$0xff] %v741_v59  ;;  %v968_v42 = vmax.f32 %v908_v5, 0.0  ;;  %v932_v37 = vadd.f32 %v6094_v47, %v7082_v58  ;;  %v924_v36 = vadd.f32 %v7082_v58, %v923_v11  ;;  %v1249_v47 = vld [vmem:[#allocation2 + $0x74] sm:$0xf] }
 0x10b   : > { %985 = vst [vmem:[#allocation2 + $0x110] sm:$0xff] %v969_v40  ;;  %v1145_v44 = vrot.slane %v7176_v16, 4  ;;  %983 = vst [vmem:[#allocation2 + $0x100] sm:$0xff] %v967_v63  ;;  %v973_v1 = vmax.f32 %v929_v53, 0.0  ;;  %v971_v50 = vmax.f32 %v7283_v62, 0.0  ;;  %v1147_v49 = vrot.slane %v7176_v16, 5 }
 0x10c   : > { %v6098_v61 = vpop.f32.mrf.mxu0  ;;  %v1243_v8 = vld [vmem:[#allocation2 + $0x60] sm:$0xf]  ;;  %984 = vst [vmem:[#allocation2 + $0x108] sm:$0xff] %v968_v42  ;;  %v974_v40 = vmax.f32 %v932_v37, 0.0  ;;  %v972_v5 = vmax.f32 %v924_v36, 0.0  ;;  %v1158_v11 = vsel %vm1157_vm4, %v7174_v15, %v1139_v60  ;;  %v1149_v63 = vrot.slane %v7176_v16, 6 }
 0x10d   : > { %v1246_v32 = vmax.f32 %v1240_v31, %v1243_v8  ;;  %v1451_v59 = vld [vmem:[#allocation2 + $0xdc] sm:$0xff]  ;;  %989 = vst [vmem:[#allocation2 + $0x130] sm:$0xff] %v973_v1  ;;  %v1160_v53 = vsel %vm1159_vm5, %v1158_v11, %v1142_v22  ;;  %v945_v31 = vadd.f32 %v6097_v20, %v7082_v58  ;;  %v7305_v60 = vadd.f32 %v7082_v58, %v936_v38 }
 0x10e   : > { %v1454_v26 = vmax.f32 %v7200_v45, %v1451_v59  ;;  %990 = vst [vmem:[#allocation2 + $0x138] sm:$0xff] %v974_v40  ;;  %988 = vst [vmem:[#allocation2 + $0x128] sm:$0xff] %v972_v5  ;;  %v1162_v9 = vsel %vm1161_vm6, %v1160_v53, %v1145_v44  ;;  %v948_v15 = vadd.f32 %v6098_v61, %v7082_v58  ;;  %v939_v45 = vpop.f32.mrf.mxu0  ;;  %v8970_v20 = vrot.slane %v7262_v41, 1 }
 0x10f   : > { %v7301_v42 = vmax.f32 %v1246_v32, %v1249_v47  ;;  %v1164_v51 = vsel %vm1163_vm7, %v1162_v9, %v1147_v49  ;;  %v977_v36 = vmax.f32 %v945_v31, 0.0  ;;  %v7324_v9 = vsel %vm1159_vm5, %v7247_v57, %v1216_v43 }
 0x110   : > { %v1458_v37 = vrot.slane %v1454_v26, 1  ;;  %v1461_v16 = vrot.slane %v1454_v26, 2  ;;  %v1166_v8 = vsel %vm1165_vm8, %v1164_v51, %v1149_v63  ;;  %v978_v49 = vmax.f32 %v948_v15, 0.0  ;;  %v6101_v31 = vpop.f32.mrf.mxu0 }
 0x111   : > { %v1270_v38 = vrot.slane %v7301_v42, 1  ;;  %v1247_v61 = vld [vmem:[#allocation2 + $0x64] sm:$0xff]  ;;  %v1248_v40 = vld [vmem:[#allocation2 + $0x6c] sm:$0xff]  ;;  %1168 = vst [vmem:[#allocation3 + $0xd] sm:$0xff] %v1166_v8  ;;  %993 = vst [vmem:[#allocation2 + $0x150] sm:$0xff] %v977_v36  ;;  %v8976_v15 = vmax.f32 %v7096_v6, 0.0  ;;  %v1516_v35 = vmax.f32 %v1451_v59, %v742_v17  ;;  %v7343_v43 = vadd.f32 %v7082_v58, %v939_v45 }
 0x112   : > { %v1460_v32 = vmax.f32 %v1454_v26, %v1458_v37  ;;  %v1452_v5 = vld [vmem:[#allocation2 + $0xe4] sm:$0xff]  ;;  %v1250_v47 = vmax.f32 %v7188_v27, %v1247_v61  ;;  %v1251_v53 = vmax.f32 %v7233_v52, %v1248_v40  ;;  %v1312_v63 = vmax.f32 %v1247_v61, %v504_v25  ;;  %994 = vst [vmem:[#allocation2 + $0x158] sm:$0xff] %v978_v49  ;;  %v1453_v6 = vld [vmem:[#allocation2 + $0xec] sm:$0xf]  ;;  %v1580_v22 = vld [vmem:[#allocation2 + $0x114] sm:$0xf] }
 0x113   : > { %v1313_v51 = vmax.f32 %v1248_v40, %v8976_v15  ;;  %v1455_v36 = vmax.f32 %v7223_v34, %v1452_v5  ;;  %v7334_v27 = vmax.f32 %v7262_v41, %v8970_v20  ;;  %v7340_v25 = vmax.f32 %v7301_v42, %v1270_v38 }
 0x114   : > { %v7326_v37 = vmax.f32 %v1460_v32, %v1461_v16  ;;  %v1254_v52 = vrot.slane %v1250_v47, 1  ;;  %v1261_v13 = vrot.slane %v1251_v53, 1  ;;  %v7346_v34 = vadd.f32 %v6101_v31, %v7082_v58 }
 0x115   : > { %v1318_v33 = vmax.f32 %v1312_v63, %v7125_v55  ;;  %v1257_v59 = vrot.slane %v1250_v47, 2  ;;  %v7353_v40 = vmax.f32 %v1313_v51, %v7136_v10  ;;  %v1465_v49 = vrot.slane %v1455_v36, 1  ;;  %v7399_v56 = vld [vmem:[#allocation2 + $0x134] sm:$0xff] }
 0x116   : > { %v1483_v16 = vrot.slane %v7326_v37, 1  ;;  %v1256_v8 = vmax.f32 %v1250_v47, %v1254_v52  ;;  %v1263_v61 = vmax.f32 %v1250_v47, %v1261_v13  ;;  %v1500_v17 = vsel %vm1154_vm3, %v1460_v32, %v7326_v37 }
 0x117   : > { %v1264_v15 = vrot.slane %v1251_v53, 2  ;;  %v1267_v45 = vmax.f32 %v1251_v53, %v1261_v13  ;;  %v1322_v29 = vrot.slane %v1318_v33, 1  ;;  %v8977_v31 = vmax.f32 %v7210_v7, %v7212_v24 }
 0x118   : > { %v7360_v52 = vmax.f32 %v1256_v8, %v1257_v59  ;;  %v1329_v55 = vrot.slane %v7353_v40, 1  ;;  %v1467_v63 = vmax.f32 %v1454_v26, %v1465_v49  ;;  %v1468_v20 = vrot.slane %v1455_v36, 2  ;;  %v1515_v59 = vld [vmem:[#allocation2 + $0x100] sm:$0xf] }
 0x119   : > { %v7358_v11 = vmax.f32 %v8977_v31, %v1453_v6  ;;  %v7365_v10 = vsel %vm388_vm0, %v1500_v17, %v1483_v16  ;;  %v7367_v47 = vmax.f32 %v1263_v61, %v1264_v15  ;;  %v7369_v51 = vmax.f32 %v1251_v53, %v1270_v38  ;;  %v1512_v6 = vld [vmem:[#allocation2 + $0xec] sm:$0xf]  ;;  %v1519_v53 = vld [vmem:[#allocation2 + $0x104] sm:$0xff] }
 0x11a   : > { %8978 = vst [vmem:[#allocation5_spill] sm:$0xff] %v7365_v10  ;;  %v1324_v13 = vmax.f32 %v1318_v33, %v1322_v29  ;;  %v1331_v57 = vmax.f32 %v1318_v33, %v1329_v55  ;;  %v1335_v7 = vmax.f32 %v7353_v40, %v1329_v55  ;;  %v7372_v24 = vmax.f32 %v1467_v63, %v1468_v20  ;;  %v1583_v55 = vld [vmem:[#allocation2 + $0x128] sm:$0xf] }
 0x11b   : > { %v7374_v31 = vmax.f32 %v1267_v45, %v1264_v15  ;;  %v1325_v26 = vrot.slane %v1318_v33, 2  ;;  %v1471_v44 = vmax.f32 %v1455_v36, %v1465_v49  ;;  %v1474_v32 = vrot.slane %v7358_v11, 1  ;;  %v1520_v45 = vld [vmem:[#allocation2 + $0x10c] sm:$0xff] }
 0x11c   : > { %8979 = vst [vmem:[#allocation6_spill] sm:$0xff] %v7372_v24  ;;  %v1332_v38 = vrot.slane %v7353_v40, 2  ;;  %v1517_v29 = vmax.f32 %v1452_v5, %v743_v30  ;;  %v7385_v15 = vsel %vm1154_vm3, %v1256_v8, %v7360_v52  ;;  %v1518_v49 = vmax.f32 %v1512_v6, %v1515_v59  ;;  %v1521_v30 = vld [vmem:[#allocation2 + $0x114] sm:$0xf]  ;;  %v1587_v6 = vld [vmem:[#allocation2 + $0x12c] sm:$0xff] }
 0x11d   : > { %v7387_v33 = vmax.f32 %v1324_v13, %v1325_v26  ;;  %v1477_v16 = vrot.slane %v7358_v11, 2  ;;  %v7395_v5 = vmax.f32 %v1471_v44, %v1468_v20  ;;  %v1476_v17 = vmax.f32 %v1455_v36, %v1474_v32  ;;  %v952_v20 = vpop.f32.mrf.mxu0 }
 0x11e   : > { %v7389_v63 = vmax.f32 %v1331_v57, %v1332_v38  ;;  %v7391_v61 = vmax.f32 %v1335_v7, %v1332_v38  ;;  %v7397_v8 = vmax.f32 %v1518_v49, %v1521_v30  ;;  %v1522_v26 = vmax.f32 %v1516_v35, %v1519_v53  ;;  %v1589_v30 = vld [vmem:[#allocation2 + $0x13c] sm:$0xf] }
 0x11f   : > { %v1523_v59 = vmax.f32 %v1517_v29, %v1520_v45  ;;  %v1584_v57 = vmax.f32 %v1519_v53, %v970_v14  ;;  %v1585_v7 = vmax.f32 %v1520_v45, %v971_v50  ;;  %v1586_v38 = vmax.f32 %v1580_v22, %v1583_v55 }
 0x120   : > { %v1480_v44 = vmax.f32 %v7358_v11, %v1474_v32  ;;  %v1526_v36 = vrot.slane %v1522_v26, 1  ;;  %v1542_v28 = vrot.slane %v7397_v8, 1  ;;  %v1529_v62 = vrot.slane %v1522_v26, 2 }
 0x121   : > { %v1533_v49 = vrot.slane %v1523_v59, 1  ;;  %v1591_v29 = vmax.f32 %v1585_v7, %v7399_v56  ;;  %v1590_v1 = vmax.f32 %v1584_v57, %v1587_v6  ;;  %v7411_v50 = vmax.f32 %v1586_v38, %v1589_v30  ;;  %v1821_v30 = vld [vmem:[#allocation3 + $0x1] sm:$0xff] }
 0x122   : > { %v1528_v14 = vmax.f32 %v1522_v26, %v1526_v36  ;;  %v1536_v53 = vrot.slane %v1523_v59, 2  ;;  %v7415_v11 = vsel %vm1154_vm3, %v1324_v13, %v7387_v33  ;;  %v7417_v32 = vmax.f32 %v1476_v17, %v1477_v16 }
 0x123   : > { %v1535_v22 = vmax.f32 %v1522_v26, %v1533_v49  ;;  %v1539_v45 = vmax.f32 %v1523_v59, %v1533_v49  ;;  %v1601_v55 = vrot.slane %v1591_v29, 1  ;;  %v1594_v57 = vrot.slane %v1590_v1, 1  ;;  %v1822_v49 = vld [vmem:[#allocation3 + $0x9] sm:$0xff] }
 0x124   : > { %8980 = vst [vmem:[#allocation7_spill] sm:$0xff] %v7417_v32  ;;  %v7419_v35 = vmax.f32 %v1528_v14, %v1529_v62  ;;  %v7421_v7 = vmax.f32 %v1480_v44, %v1477_v16  ;;  %v7427_v54 = vmax.f32 %v7397_v8, %v1542_v28  ;;  %v1610_v17 = vrot.slane %v7411_v50, 1  ;;  %v1783_v62 = vld [vmem:[#allocation3 + $0x8] sm:$0xff] }
 0x125   : > { %v7424_v38 = vmax.f32 %v1535_v22, %v1536_v53  ;;  %v1607_v26 = vmax.f32 %v1591_v29, %v1601_v55  ;;  %v7429_v24 = vmax.f32 %v1590_v1, %v1594_v57  ;;  %v1603_v13 = vmax.f32 %v1590_v1, %v1601_v55  ;;  %v6102_v22 = vpop.f32.mrf.mxu0  ;;  %v7442_v55 = vld [vmem:[#allocation2 + $0x154] sm:$0xff] }
 0x126   : > { %8981 = vst [vmem:[#allocation8_spill] sm:$0xff] %v7421_v7  ;;  %8982 = vst [vmem:[#allocation9_spill] sm:$0xff] %v7427_v54  ;;  %v7432_v32 = vmax.f32 %v1539_v45, %v1536_v53  ;;  %v7434_v16 = vmax.f32 %v1523_v59, %v1542_v28  ;;  %v1604_v44 = vrot.slane %v1591_v29, 2  ;;  %v1597_v36 = vrot.slane %v1590_v1, 2  ;;  %v5319_v53 = vld [vmem:[%s8964_s2] ss:$0 sm:$0xff] }
 0x127   : > { %v7440_v54 = vsel %vm1154_vm3, %v1528_v14, %v7419_v35  ;;  %v1836_v57 = vpack.c.bf16 %v1822_v49, %v1821_v30  ;;  %v6848_v1 = vld [vmem:[#allocation3] sm:$0xff]  ;;  %v8985_v7 = vmax.f32 %v7305_v60, 0.0  ;;  %v7457_v30 = vmax.f32 %v1591_v29, %v1610_v17 }
 0x128   : > { %8983 = vst [vmem:[#allocation10_spill] sm:$0xff] %v7432_v32  ;;  %v7448_v28 = vmax.f32 %v1607_v26, %v1604_v44  ;;  %v1797_v45 = vpack.c.bf16 %v1783_v62, %v6848_v1  ;;  %v7453_v32 = vmax.f32 %v7429_v24, %v1597_v36  ;;  %v7455_v14 = vmax.f32 %v1603_v13, %v1604_v44  ;;  %v1651_v1 = vld [vmem:[#allocation2 + $0x150] sm:$0xf] }
 0x129   : > { %v1652_v10 = vmax.f32 %v1587_v6, %v8985_v7  ;;  %6129 = vmatprep.mubr.bf16.mxu0 %v1836_v57  ;;  %v976_v49 = vmax.f32 %v7343_v43, 0.0  ;;  %v1074_v62 = vadd.f32 %v5319_v53, %v7180_v19  ;;  %v953_v60 = vadd.f32 %v7082_v58, %v952_v20  ;;  %v955_v6 = vpop.f32.mrf.mxu0 }
 0x12a   : > { %8984 = vst [vmem:[#allocation11_spill] sm:$0xff] %v7448_v28  ;;  %6161 = vmatprep.mubr.bf16.mxu1 %v1797_v45  ;;  %v8986_v36 = vrot.slane %v7251_v2, 4  ;;  %v964_v43 = vadd.f32 %v6102_v22, %v7082_v58  ;;  %v1077_v13 = vadd.f32 %v5319_v53, %v7203_v46  ;;  %v8987_v20 = vrot.slane %v7251_v2, 5  ;;  %v1823_v53 = vld [vmem:[#allocation3 + $0x11] sm:$0xff] }
 0x12b   : > { %v7461_v59 = vmax.f32 %v1652_v10, %v7442_v55  ;;  %v1080_v57 = vmax.f32 %v1074_v62, 0.0  ;;  %v979_v19 = vmax.f32 %v953_v60, 0.0  ;;  %v956_v28 = vadd.f32 %v7082_v58, %v955_v6 }
 0x12c   : > { %v1232_v29 = vsel %vm1161_vm6, %v7324_v9, %v8986_v36  ;;  %v982_v7 = vmax.f32 %v964_v43, 0.0  ;;  %v1081_v26 = vmax.f32 %v1077_v13, 0.0  ;;  %v8988_v46 = vrot.slane %v7251_v2, 6  ;;  %v6722_v13 = vld [vmem:[%s8965_s3 + $0xb0] sm:$0xff]  }
 0x12d   : > { %v1662_v10 = vrot.slane %v7461_v59, 1  ;;  %v1665_v44 = vrot.slane %v7461_v59, 2  ;;  %v1233_v45 = vsel %vm1163_vm7, %v1232_v29, %v8987_v20  ;;  %1082 = vst [vmem:[#allocation2 + $0x180] sm:$0xff] %v1080_v57  ;;  %995 = vst [vmem:[#allocation2 + $0x160] sm:$0xff] %v979_v19  ;;  %v1226_v62 = vrot.slane %v7253_v4, 7 }
 0x12e   : > { %v1234_v22 = vsel %vm1165_vm8, %v1233_v45, %v8988_v46  ;;  %v8989_v60 = vrot.slane %v7301_v42, 2  ;;  %v1648_v29 = vld [vmem:[#allocation2 + $0x13c] sm:$0xf]  ;;  %v7488_v43 = vmax.f32 %v7411_v50, %v1610_v17  ;;  %v1624_v58 = vrot.slane %v7455_v14, 3  ;;  %998 = vst [vmem:[#allocation2 + $0x178] sm:$0xff] %v982_v7  ;;  %1083 = vst [vmem:[#allocation2 + $0x188] sm:$0xff] %v1081_v26 }
 0x12f   : > { %v1664_v9 = vmax.f32 %v7461_v59, %v1662_v10  ;;  %1236 = vst [vmem:[#allocation3 + $0x19] sm:$0xff] %v1234_v22  ;;  %v1837_v6 = vpack.c.bf16 %v1234_v22, %v1823_v53  ;;  %v980_v2 = vmax.f32 %v956_v28, 0.0  ;;  %v1619_v4 = vrot.slane %v7453_v32, 1 }
 0x130   : > { %v1275_v36 = vmax.f32 %v7369_v51, %v8989_v60  ;;  %v1654_v10 = vmax.f32 %v1648_v29, %v1651_v1  ;;  %v1235_v51 = vsel %vm1154_vm3, %v1226_v62, %v7255_v12  ;;  %v8990_v17 = vmov %v8989_v60  ;;  %v1784_v62 = vld [vmem:[#allocation3 + $0x10] sm:$0xff] }
 0x131   : > { %v7495_v57 = vmax.f32 %v1664_v9, %v1665_v44  ;;  %6130 = vmatmul.mubr.bf16.vlgmr.msra.gmra.mxu0 %v1837_v6  ;;  %1237 = vst [vmem:[#allocation3 + $0x21] sm:$0x3] %v1235_v51  ;;  %v1277_v7 = vmax.f32 %v7340_v25, %v8990_v17  ;;  %v8991_v28 = vrot.slane %v7360_v52, 1  ;;  %v8992_v20 = vrot.slane %v7262_v41, 1 }
 0x132   : > { %v1294_v26 = vrot.slane %v1275_v36, 7  ;;  %v1621_v1 = vrot.slane %v7453_v32, 2  ;;  %v7513_v12 = vsel %vm1154_vm3, %v7429_v24, %v7453_v32  ;;  %v1287_v42 = vrot.slane %v7374_v31, 4  ;;  %6178 = vmatpush3.bf16.msra.mxu0 %v7089_v0  ;;  %v6724_v24 = vld [vmem:[%s8965_s3 + $0xa8] sm:$0xff]  }
 0x133   : > { %v1297_v19 = vsel %vm388_vm0, %v7385_v15, %v8991_v28  ;;  %v1340_v44 = vmax.f32 %v7353_v40, %v8992_v20  ;;  %v8993_v25 = vrot.slane %v7360_v52, 2  ;;  %v1653_v15 = vmax.f32 %v7399_v56, %v976_v49  ;;  %6179 = vmatprep.subr.bf16.mxu0 %v6722_v13 }
 0x134   : > { %v1289_v46 = vrot.slane %v7374_v31, 5  ;;  %v8994_v40 = vrot.slane %v7367_v47, 3  ;;  %v1303_v53 = vsel %vm1154_vm3, %v1294_v26, %v1277_v7  ;;  %v1687_v52 = vrot.slane %v7495_v57, 1  ;;  %v1656_v36 = vld [vmem:[#allocation2 + $0x15c] sm:$0xff]  ;;  %v1657_v29 = vld [vmem:[#allocation2 + $0x164] sm:$0xf] }
 0x135   : > { %v1298_v45 = vsel %vm1157_vm4, %v1297_v19, %v8993_v25  ;;  %v1720_v0 = vmax.f32 %v7442_v55, %v980_v2  ;;  %v1291_v56 = vrot.slane %v7374_v31, 6  ;;  %1305 = vst [vmem:[#allocation3 + $0x2d] sm:$0x3] %v1303_v53  ;;  %v1689_v47 = vrot.slane %v7495_v57, 2  ;;  %v1716_v6 = vld [vmem:[#allocation2 + $0x164] sm:$0xf] }
 0x136   : > { %v1299_v22 = vsel %vm1159_vm5, %v1298_v45, %v8994_v40  ;;  %v1704_v60 = vsel %vm1154_vm3, %v1664_v9, %v7495_v57  ;;  %v8995_v17 = vrot.slane %v7262_v41, 2  ;;  %v1659_v55 = vmax.f32 %v1653_v15, %v1656_v36  ;;  %v1785_v28 = vld [vmem:[#allocation3 + $0x18] sm:$0xff]  ;;  %v1719_v19 = vld [vmem:[#allocation2 + $0x178] sm:$0xf]  ;;  %v1723_v20 = vld [vmem:[#allocation2 + $0x17c] sm:$0xff]  ;;  %6180 = vmatpush3.bf16.msra.mxu0 %v6722_v13 }
 0x137   : > { %v1300_v49 = vsel %vm1161_vm6, %v1299_v22, %v1287_v42  ;;  %v1660_v2 = vmax.f32 %v1654_v10, %v1657_v29  ;;  %v8996_v31 = vmax.f32 %v7346_v34, 0.0  ;;  %v1798_v9 = vpack.c.bf16 %v1785_v28, %v1784_v62  ;;  %v1724_v45 = vld [vmem:[#allocation2 + $0x184] sm:$0xff]  ;;  %6181 = vmatprep.subr.bf16.mxu0 %v6724_v24 }
 0x138   : > { %v1301_v51 = vsel %vm1163_vm7, %v1300_v49, %v1289_v46  ;;  %v7539_v7 = vmax.f32 %v1340_v44, %v8995_v17  ;;  %v1722_v25 = vmax.f32 %v1716_v6, %v1719_v19  ;;  %v1725_v46 = vld [vmem:[#allocation2 + $0x18c] sm:$0xf]  ;;  %v7546_v40 = vmax.f32 %v1720_v0, %v1723_v20  ;;  %v6723_v44 = vld [vmem:[%s8965_s3 + $0xf0] sm:$0xff]   ;;  %v6726_v62 = vld [vmem:[%s8965_s3 + $0xa0] sm:$0xff]  }
 0x139   : > { %v1721_v26 = vmax.f32 %v1656_v36, %v8996_v31  ;;  %v7544_v42 = vsel %vm1165_vm8, %v1301_v51, %v1291_v56  ;;  %v8997_v10 = vmov %v8995_v17  ;;  %v7558_v13 = vsel %vm388_vm0, %v1704_v60, %v1687_v52  ;;  %6162 = vmatmul.mubr.bf16.vlgmr.msra.gmra.mxu1 %v1798_v9  ;;  %v6849_v6 = vld [vmem:[%s8965_s3 + $0xf8] sm:$0xff]  }
 0x13a   : > { %1304 = vst [vmem:[#allocation3 + $0x25] sm:$0xff] %v7544_v42  ;;  %v7552_v34 = vmax.f32 %v7334_v27, %v8997_v10  ;;  %v1669_v15 = vrot.slane %v1659_v55, 1  ;;  %v1678_v22 = vrot.slane %v1660_v2, 1  ;;  %v1355_v53 = vrot.slane %v7391_v61, 4  ;;  %6210 = vmatpush3.bf16.msra.mxu1 %v6849_v6  ;;  %6182 = vmatpush3.bf16.msra.mxu0 %v6724_v24 }
 0x13b   : > { %v1672_v41 = vrot.slane %v1659_v55, 2  ;;  %v7564_v27 = vmax.f32 %v1721_v26, %v1724_v45  ;;  %v7566_v0 = vmax.f32 %v1722_v25, %v1725_v46  ;;  %v8998_v56 = vrot.slane %v7387_v33, 1  ;;  %6211 = vmatprep.subr.bf16.mxu1 %v6723_v44  ;;  %6183 = vmatprep.subr.bf16.mxu0 %v6726_v62  ;;  %v6728_v45 = vld [vmem:[%s8965_s3 + $0x98] sm:$0xff]  }
 0x13c   : > { %v1671_v49 = vmax.f32 %v7461_v59, %v1669_v15  ;;  %v1680_v60 = vmax.f32 %v1659_v55, %v1678_v22  ;;  %v1681_v36 = vrot.slane %v1660_v2, 2  ;;  %v1730_v29 = vrot.slane %v7546_v40, 1 }
 0x13d   : > { %v1365_v52 = vsel %vm388_vm0, %v7415_v11, %v8998_v56  ;;  %v1675_v51 = vmax.f32 %v1659_v55, %v1669_v15  ;;  %v1684_v17 = vmax.f32 %v1660_v2, %v1678_v22  ;;  %v1737_v31 = vrot.slane %v7564_v27, 1  ;;  %v6725_v11 = vld [vmem:[%s8965_s3 + $0xe8] sm:$0xff]  }
 0x13e   : > { %v1746_v26 = vrot.slane %v7566_v0, 1  ;;  %v7582_v59 = vmax.f32 %v1671_v49, %v1672_v41  ;;  %v1357_v28 = vrot.slane %v7391_v61, 5  ;;  %v1359_v19 = vrot.slane %v7391_v61, 6  ;;  %6212 = vmatpush3.bf16.msra.mxu1 %v6723_v44  ;;  %6184 = vmatpush3.bf16.msra.mxu0 %v6726_v62 }
 0x13f   : > { %v8999_v20 = vrot.slane %v7178_v18, 2  ;;  %v7590_v2 = vmax.f32 %v1680_v60, %v1681_v36  ;;  %v1743_v9 = vmax.f32 %v7564_v27, %v1737_v31  ;;  %v1362_v24 = vrot.slane %v7539_v7, 7  ;;  %6213 = vmatprep.subr.bf16.mxu1 %v6725_v11  ;;  %6185 = vmatprep.subr.bf16.mxu0 %v6728_v45 }
 0x140   : > { %v1748_v25 = vmax.f32 %v7564_v27, %v1746_v26  ;;  %v1740_v61 = vrot.slane %v7564_v27, 2  ;;  %v7600_v18 = vmax.f32 %v7546_v40, %v1730_v29  ;;  %v9000_v22 = vrot.slane %v7387_v33, 2 }
 0x141   : > { %v1434_v55 = vsel %vm1157_vm4, %v7226_v23, %v8999_v20  ;;  %v1733_v23 = vrot.slane %v7546_v40, 2  ;;  %v7603_v46 = vld [vmem:[#allocation3 + $0x21] sm:$0xff]  ;;  %v1826_v10 = vld [vmem:[#allocation3 + $0x29] sm:$0xff]  ;;  %v7610_v56 = vmax.f32 %v1675_v51, %v1672_v41  ;;  %v7612_v49 = vmax.f32 %v1684_v17, %v1681_v36 }
 0x142   : > { %v7605_v15 = vld [vmem:[#allocation3 + $0x20] sm:$0xff]  ;;  %v1366_v7 = vsel %vm1157_vm4, %v1365_v52, %v9000_v22  ;;  %v1749_v27 = vrot.slane %v7566_v0, 2  ;;  %v7616_v60 = vmax.f32 %v7566_v0, %v1746_v26  ;;  %v7618_v29 = vld [vmem:[#allocation3 + $0x28] sm:$0xff]  ;;  %v1692_v6 = vrot.slane %v7582_v59, 3  ;;  %v6727_v52 = vld [vmem:[%s8965_s3 + $0xe0] sm:$0xff]   ;;  %6214 = vmatpush3.bf16.msra.mxu1 %v6725_v11  ;;  %6186 = vmatpush3.bf16.msra.mxu0 %v6728_v45 }
 0x143   : > { %v1838_v20 = vpack.c.bf16 %v1826_v10, %v7603_v46  ;;  %v1799_v33 = vpack.c.bf16 %v7618_v29, %v7605_v15  ;;  %v9001_v44 = vrot.slane %v7389_v63, 3  ;;  %v1702_v36 = vrot.slane %v7590_v2, 7  ;;  %v6730_v63 = vld [vmem:[%s8965_s3 + $0x90] sm:$0xff]   ;;  %6215 = vmatprep.subr.bf16.mxu1 %v6727_v52 }
 0x144   : > { %v7631_v51 = vmax.f32 %v1743_v9, %v1740_v61  ;;  %v7635_v17 = vmax.f32 %v1748_v25, %v1749_v27  ;;  %v1739_v26 = vmax.f32 %v7546_v40, %v1737_v31  ;;  %v7642_v10 = vmax.f32 %v7600_v18, %v1733_v23  ;;  %6187 = vmatprep.subr.bf16.mxu0 %v6730_v63 }
 0x145   : > { %v1367_v41 = vsel %vm1159_vm5, %v1366_v7, %v9001_v44  ;;  %6133 = vmatprep.mubr.bf16.mxu0 %v1838_v20  ;;  %6165 = vmatprep.mubr.bf16.mxu1 %v1799_v33  ;;  %v1371_v9 = vsel %vm1154_vm3, %v1362_v24, %v7552_v34  ;;  %v1423_v25 = vrot.slane %v7238_v39, 4  ;;  %v1425_v40 = vrot.slane %v7238_v39, 5  ;;  %v6732_v33 = vld [vmem:[%s8965_s3 + $0x88] sm:$0xff]  }
 0x146   : > { %v1368_v62 = vsel %vm1161_vm6, %v1367_v41, %v1355_v53  ;;  %1373 = vst [vmem:[#allocation3 + $0x39] sm:$0x3] %v1371_v9  ;;  %v1427_v31 = vrot.slane %v7238_v39, 6  ;;  %v9002_v7 = vrot.slane %v7219_v3, 3  ;;  %v9003_v34 = vrot.slane %v7235_v21, 7  ;;  %v6729_v3 = vld [vmem:[%s8965_s3 + $0xd8] sm:$0xff]   ;;  %6216 = vmatpush3.bf16.msra.mxu1 %v6727_v52  ;;  %6188 = vmatpush3.bf16.msra.mxu0 %v6730_v63 }
 0x147   : > { %v1369_v22 = vsel %vm1163_vm7, %v1368_v62, %v1357_v28  ;;  %v1491_v24 = vrot.slane %v7395_v5, 4  ;;  %v7666_v39 = vmax.f32 %v1739_v26, %v1740_v61  ;;  %v9004_v21 = vrot.slane %v7326_v37, 2  ;;  %v9006_v61 = vld [vmem:[#allocation6_spill] sm:$0xff]  ;;  %v9008_v26 = vld [vmem:[#allocation7_spill] sm:$0xff]  ;;  %6217 = vmatprep.subr.bf16.mxu1 %v6729_v3  ;;  %6189 = vmatprep.subr.bf16.mxu0 %v6732_v33 }
 0x148   : > { %v1435_v23 = vsel %vm1159_vm5, %v1434_v55, %v9002_v7  ;;  %v7655_v20 = vsel %vm1165_vm8, %v1369_v22, %v1359_v19  ;;  %v1439_v28 = vsel %vm1154_vm3, %v9003_v34, %v7242_v48  ;;  %v1493_v19 = vrot.slane %v7395_v5, 5  ;;  %v9005_v48 = vld [vmem:[#allocation5_spill] sm:$0xff]  ;;  %v9013_v52 = vld [vmem:[#allocation10_spill] sm:$0xff] }
 0x149   : > { %v1436_v53 = vsel %vm1161_vm6, %v1435_v23, %v1423_v25  ;;  %1372 = vst [vmem:[#allocation3 + $0x31] sm:$0xff] %v7655_v20  ;;  %1441 = vst [vmem:[#allocation3 + $0x45] sm:$0x3] %v1439_v28  ;;  %v1502_v55 = vsel %vm1157_vm4, %v9005_v48, %v9004_v21  ;;  %v9007_v44 = vrot.slane %v9006_v61, 3  ;;  %v1498_v62 = vrot.slane %v9008_v26, 7  ;;  %v9010_v23 = vld [vmem:[#allocation8_spill] sm:$0xff] }
 0x14a   : > { %v1437_v11 = vsel %vm1163_vm7, %v1436_v53, %v1425_v40  ;;  %v9009_v9 = vrot.slane %v7397_v8, 2  ;;  %v1770_v25 = vrot.slane %v7635_v17, 7  ;;  %v1755_v22 = vrot.slane %v7642_v10, 1  ;;  %v9012_v28 = vld [vmem:[#allocation9_spill] sm:$0xff]  ;;  %v6731_v21 = vld [vmem:[%s8965_s3 + $0xd0] sm:$0xff]   ;;  %v6734_v63 = vld [vmem:[%s8965_s3 + $0x80] sm:$0xff]   ;;  %6218 = vmatpush3.bf16.msra.mxu1 %v6729_v3  ;;  %6190 = vmatpush3.bf16.msra.mxu0 %v6732_v33 }
 0x14b   : > { %v7679_v45 = vsel %vm1165_vm8, %v1437_v11, %v1427_v31  ;;  %v1503_v41 = vsel %vm1159_vm5, %v1502_v55, %v9007_v44  ;;  %v1495_v40 = vrot.slane %v7395_v5, 6  ;;  %v1507_v53 = vsel %vm1154_vm3, %v1498_v62, %v9010_v23  ;;  %6219 = vmatprep.subr.bf16.mxu1 %v6731_v21  ;;  %6191 = vmatprep.subr.bf16.mxu0 %v6734_v63 }
 0x14c   : > { %v1547_v37 = vmax.f32 %v7434_v16, %v9009_v9  ;;  %1440 = vst [vmem:[#allocation3 + $0x3d] sm:$0xff] %v7679_v45  ;;  %v1504_v31 = vsel %vm1161_vm6, %v1503_v41, %v1491_v24  ;;  %v9011_v34 = vmov %v9009_v9  ;;  %1509 = vst [vmem:[#allocation3 + $0x51] sm:$0x3] %v1507_v53  ;;  %v1559_v24 = vrot.slane %v9013_v52, 4 }
 0x14d   : > { %v1505_v7 = vsel %vm1163_vm7, %v1504_v31, %v1493_v19  ;;  %v1549_v16 = vmax.f32 %v9012_v28, %v9011_v34  ;;  %v9014_v19 = vrot.slane %v7419_v35, 1  ;;  %v9015_v48 = vrot.slane %v7411_v50, 2 }
 0x14e   : > { %v1566_v11 = vrot.slane %v1547_v37, 7  ;;  %v7703_v5 = vsel %vm1165_vm8, %v1505_v7, %v1495_v40  ;;  %v1561_v61 = vrot.slane %v9013_v52, 5  ;;  %v1563_v44 = vrot.slane %v9013_v52, 6  ;;  %6220 = vmatpush3.bf16.msra.mxu1 %v6731_v21  ;;  %6192 = vmatpush3.bf16.msra.mxu0 %v6734_v63  ;;  %v7818_v63 = vld [vmem:[%s8965_s3 + $0x178] sm:$0xff]  }
 0x14f   : > { %v1569_v8 = vsel %vm388_vm0, %v7440_v54, %v9014_v19  ;;  %v1615_v55 = vmax.f32 %v7457_v30, %v9015_v48  ;;  %1508 = vst [vmem:[#allocation3 + $0x49] sm:$0xff] %v7703_v5  ;;  %v9016_v41 = vrot.slane %v7419_v35, 2  ;;  %v9017_v62 = vrot.slane %v7424_v38, 3  ;;  %v9019_v38 = vld [vmem:[#allocation11_spill] sm:$0xff] }
 0x150   : > { %v1575_v54 = vsel %vm1154_vm3, %v1566_v11, %v1549_v16  ;;  %v9018_v9 = vmov %v9015_v48  ;;  %v1637_v35 = vsel %vm388_vm0, %v7513_v12, %v1619_v4  ;;  %v7733_v31 = vld [vmem:[#allocation3 + $0x30] sm:$0xff]  ;;  %v1627_v23 = vrot.slane %v9019_v38, 4 }
 0x151   : > { %v1570_v26 = vsel %vm1157_vm4, %v1569_v8, %v9016_v41  ;;  %1577 = vst [vmem:[#allocation3 + $0x5d] sm:$0x3] %v1575_v54  ;;  %v1617_v37 = vmax.f32 %v7488_v43, %v9018_v9  ;;  %v1634_v40 = vrot.slane %v1615_v55, 7  ;;  %v1629_v53 = vrot.slane %v9019_v38, 5  ;;  %v6733_v43 = vld [vmem:[%s8965_s3 + $0xc8] sm:$0xff]  }
 0x152   : > { %v1571_v30 = vsel %vm1159_vm5, %v1570_v26, %v9017_v62  ;;  %v1638_v50 = vsel %vm1157_vm4, %v1637_v35, %v1621_v1  ;;  %v1695_v34 = vrot.slane %v7610_v56, 4  ;;  %v1631_v33 = vrot.slane %v9019_v38, 6  ;;  %6221 = vmatprep.subr.bf16.mxu1 %v6733_v43 }
 0x153   : > { %v1572_v7 = vsel %vm1161_vm6, %v1571_v30, %v1559_v24  ;;  %v1639_v12 = vsel %vm1159_vm5, %v1638_v50, %v1624_v58  ;;  %v1643_v3 = vsel %vm1154_vm3, %v1634_v40, %v1617_v37  ;;  %v7750_v28 = vld [vmem:[#allocation3 + $0x39] sm:$0xff]  ;;  %v1711_v14 = vsel %vm1154_vm3, %v1702_v36, %v7612_v49  ;;  %v7767_v52 = vld [vmem:[#allocation3 + $0x41] sm:$0xff]  ;;  %6222 = vmatpush3.bf16.msra.mxu1 %v6733_v43  ;;  %v2150_v43 = vld [vmem:[#allocation3 + $0xa] sm:$0xff] }
 0x154   : > { %v1573_v4 = vsel %vm1163_vm7, %v1572_v7, %v1561_v61  ;;  %v7752_v32 = vld [vmem:[#allocation3 + $0x38] sm:$0xff]  ;;  %v1640_v16 = vsel %vm1161_vm6, %v1639_v12, %v1627_v23  ;;  %1645 = vst [vmem:[#allocation3 + $0x69] sm:$0x3] %v1643_v3  ;;  %v1839_v58 = vpack.c.bf16 %v7750_v28, %v7655_v20  ;;  %v1706_v2 = vsel %vm1157_vm4, %v7558_v13, %v1689_v47  ;;  %v7778_v49 = vld [vmem:[%s8965_s3 + $0x138] sm:$0xff]   ;;  %v6735_v47 = vld [vmem:[%s8965_s3 + $0xc0] sm:$0xff]  }
 0x155   : > { %v7755_v1 = vsel %vm1165_vm8, %v1573_v4, %v1563_v44  ;;  %v1800_v11 = vpack.c.bf16 %v7752_v32, %v7733_v31  ;;  %v1641_v24 = vsel %vm1163_vm7, %v1640_v16, %v1629_v53  ;;  %1713 = vst [vmem:[#allocation3 + $0x75] sm:$0x3] %v1711_v14  ;;  %v1840_v36 = vpack.c.bf16 %v7703_v5, %v7767_v52  ;;  %v7796_v48 = vld [vmem:[#allocation3 + $0x40] sm:$0xff]  ;;  %v2349_v16 = vld [vmem:[#allocation3 + $0x14] sm:$0xff] }
 0x156   : > { %1576 = vst [vmem:[#allocation3 + $0x55] sm:$0xff] %v7755_v1  ;;  %v7783_v19 = vsel %vm1165_vm8, %v1641_v24, %v1631_v33  ;;  %v1697_v21 = vrot.slane %v7610_v56, 5  ;;  %v1707_v57 = vsel %vm1159_vm5, %v1706_v2, %v1692_v6  ;;  %v1757_v13 = vrot.slane %v7642_v10, 2  ;;  %6134 = vmatmul.mubr.bf16.gmra.mxu0 %v1839_v58  ;;  %v7798_v55 = vld [vmem:[#allocation3 + $0x48] sm:$0xff]  ;;  %6241 = vmatprep.subr.bf16.mxu0 %v7778_v49  ;;  %v7866_v14 = vld [vmem:[#allocation3 + $0x1a] sm:$0xff] }
 0x157   : > { %v1772_v8 = vsel %vm1154_vm3, %v7600_v18, %v7642_v10  ;;  %6166 = vmatmul.mubr.bf16.gmra.mxu1 %v1800_v11  ;;  %1644 = vst [vmem:[#allocation3 + $0x61] sm:$0xff] %v7783_v19  ;;  %v1699_v59 = vrot.slane %v7610_v56, 6  ;;  %v1708_v6 = vsel %vm1161_vm6, %v1707_v57, %v1695_v34  ;;  %6137 = vmatprep.mubr.bf16.mxu0 %v1840_v36  ;;  %v1760_v56 = vrot.slane %v7666_v39, 3  ;;  %v2149_v50 = vld [vmem:[#allocation3 + $0x2] sm:$0xff]  ;;  %v7872_v2 = vld [vmem:[#allocation3 + $0x2a] sm:$0xff]  ;;  %v7874_v36 = vld [vmem:[#allocation3 + $0x32] sm:$0xff] }
 0x158   : > { %v1801_v61 = vpack.c.bf16 %v7798_v55, %v7796_v48  ;;  %v1709_v44 = vsel %vm1163_vm7, %v1708_v6, %v1697_v21  ;;  %v1753_v18 = vmax.f32 %v7616_v60, %v1749_v27  ;;  %6223 = vmatprep.subr.bf16.mxu1 %v6735_v47  ;;  %v1773_v0 = vsel %vm388_vm0, %v1772_v8, %v1755_v22  ;;  %v7868_v58 = vld [vmem:[#allocation3 + $0x22] sm:$0xff] }
 0x159   : > { %v7810_v41 = vsel %vm1165_vm8, %v1709_v44, %v1699_v59  ;;  %v1763_v27 = vrot.slane %v7631_v51, 4  ;;  %v1774_v60 = vsel %vm1157_vm4, %v1773_v0, %v1757_v13  ;;  %v1765_v30 = vrot.slane %v7631_v51, 5  ;;  %6224 = vmatpush3.bf16.msra.mxu1 %v6735_v47  ;;  %v7876_v21 = vld [vmem:[#allocation3 + $0x42] sm:$0xff]  ;;  %v7890_v44 = vld [vmem:[#allocation3 + $0x3a] sm:$0xff]  ;;  %v2348_v0 = vld [vmem:[#allocation3 + $0xc] sm:$0xff] }
 0x15a   : > { %6169 = vmatprep.mubr.bf16.mxu1 %v1801_v61  ;;  %1712 = vst [vmem:[#allocation3 + $0x6d] sm:$0xff] %v7810_v41  ;;  %v1779_v39 = vsel %vm1154_vm3, %v1770_v25, %v1753_v18  ;;  %v1775_v10 = vsel %vm1159_vm5, %v1774_v60, %v1760_v56  ;;  %v1767_v17 = vrot.slane %v7631_v51, 6  ;;  %6273 = vmatprep.subr.bf16.mxu1 %v7818_v63 }
 0x15b   : > { %1781 = vst [vmem:[#allocation3 + $0x81] sm:$0x3] %v1779_v39  ;;  %v1776_v25 = vsel %vm1161_vm6, %v1775_v10, %v1763_v27  ;;  %v2961_v51 = vpack.c.bf16 %v7733_v31, %v7618_v29  ;;  %v2962_v4 = vpack.c.bf16 %v7796_v48, %v7752_v32  ;;  %v3161_v12 = vpack.c.bf16 %v7767_v52, %v7750_v28  ;;  %v7894_v27 = vld [vmem:[#allocation3 + $0x4a] sm:$0xff] }
 0x15c   : > { %v1777_v40 = vsel %vm1163_vm7, %v1776_v25, %v1765_v30  ;;  %v3358_v18 = vpack.c.bf16 %v7868_v58, %v7866_v14  ;;  %v2164_v56 = vpack.c.bf16 %v2150_v43, %v2149_v50  ;;  %v3359_v60 = vpack.c.bf16 %v7874_v36, %v7872_v2  ;;  %v2351_v25 = vld [vmem:[#allocation3 + $0x24] sm:$0xff]  ;;  %v2350_v50 = vld [vmem:[#allocation3 + $0x1c] sm:$0xff]  ;;  %v6771_v29 = vld [vmem:[%s8965_s3 + $0x220] sm:$0xff]  }
 0x15d   : > { %v7828_v26 = vld [vmem:[#allocation3 + $0x51] sm:$0xff]  ;;  %v7830_v54 = vld [vmem:[#allocation3 + $0x59] sm:$0xff]  ;;  %v7847_v35 = vsel %vm1165_vm8, %v1777_v40, %v1767_v17  ;;  %v3360_v39 = vpack.c.bf16 %v7876_v21, %v7890_v44  ;;  %v2363_v30 = vpack.c.bf16 %v2349_v16, %v2348_v0  ;;  %v2364_v43 = vpack.c.bf16 %v2351_v25, %v2350_v50  ;;  %v6744_v50 = vld [vmem:[%s8965_s3 + $0x118] sm:$0xff]  }
 0x15e   : > { %v7832_v62 = vld [vmem:[#allocation3 + $0x50] sm:$0xff]  ;;  %v1841_v22 = vpack.c.bf16 %v7830_v54, %v7828_v26  ;;  %v7838_v9 = vld [vmem:[#allocation3 + $0x58] sm:$0xff]  ;;  %v7849_v7 = vld [vmem:[#allocation3 + $0x60] sm:$0xff]  ;;  %1780 = vst [vmem:[#allocation3 + $0x79] sm:$0xff] %v7847_v35  ;;  %v3162_v57 = vpack.c.bf16 %v7828_v26, %v7703_v5  ;;  %v3163_v61 = vpack.c.bf16 %v7783_v19, %v7830_v54 }
 0x15f   : > { %v1802_v37 = vpack.c.bf16 %v7838_v9, %v7832_v62  ;;  %v2963_v11 = vpack.c.bf16 %v7832_v62, %v7798_v55  ;;  %v2964_v47 = vpack.c.bf16 %v7849_v7, %v7838_v9  ;;  %v7882_v8 = vld [vmem:[#allocation3 + $0x52] sm:$0xff]  ;;  %v7884_v59 = vld [vmem:[#allocation3 + $0x5a] sm:$0xff]  ;;  %v7886_v6 = vld [vmem:[#allocation3 + $0x62] sm:$0xff] }
 0x160   : > { %6138 = vmatmul.mubr.bf16.gmra.mxu0 %v1841_v22  ;;  %v3361_v10 = vpack.c.bf16 %v7882_v8, %v7894_v27  ;;  %v3362_v22 = vpack.c.bf16 %v7886_v6, %v7884_v59  ;;  %v2151_v17 = vld [vmem:[#allocation3 + $0x12] sm:$0xff]  ;;  %v6739_v16 = vld [vmem:[%s8965_s3 + $0x170] sm:$0xff]   ;;  %v6772_v28 = vld [vmem:[%s8965_s3 + $0x218] sm:$0xff]  }
 0x161   : > { %6170 = vmatmul.mubr.bf16.gmra.mxu1 %v1802_v37  ;;  %v7854_v38 = vld [vmem:[#allocation3 + $0x69] sm:$0xff]  ;;  %v1835_v53 = vld [vmem:[#allocation3 + $0x71] sm:$0x3f] }
 0x162   : > { %v7856_v23 = vld [vmem:[#allocation3 + $0x68] sm:$0xff]  ;;  %v1842_v3 = vpack.c.bf16 %v7854_v38, %v7783_v19  ;;  %v1796_v33 = vld [vmem:[#allocation3 + $0x70] sm:$0x3f]  ;;  %v1843_v24 = vpack.c.bf16 %v1835_v53, %v1835_v53  ;;  %v2165_v53 = vpack.c.bf16 %v7866_v14, %v2151_v17  ;;  %v2354_v17 = vld [vmem:[#allocation3 + $0x3c] sm:$0xff] }
 0x163   : > { %v1803_v34 = vpack.c.bf16 %v7856_v23, %v7849_v7  ;;  %v1804_v13 = vpack.c.bf16 %v1796_v33, %v1796_v33  ;;  %v2352_v37 = vld [vmem:[#allocation3 + $0x2c] sm:$0xff]  ;;  %v2353_v40 = vld [vmem:[#allocation3 + $0x34] sm:$0xff]  ;;  %v3157_v5 = vld [vmem:[#allocation3 + $0x81] sm:$0xff] }
 0x164   : > { %6141 = vmatprep.mubr.bf16.mxu0 %v1842_v3  ;;  %v2166_v3 = vpack.c.bf16 %v7872_v2, %v7868_v58  ;;  %v2365_v33 = vpack.c.bf16 %v2353_v40, %v2352_v37  ;;  %v2357_v0 = vld [vmem:[#allocation3 + $0x54] sm:$0xff]  ;;  %v2356_v25 = vld [vmem:[#allocation3 + $0x4c] sm:$0xff]  ;;  %v6773_v19 = vld [vmem:[%s8965_s3 + $0x210] sm:$0xff]   ;;  %v3165_v54 = vpack.c.bf16 %v3157_v5, %v7847_v35 }
 0x165   : > { %6173 = vmatprep.mubr.bf16.mxu1 %v1803_v34  ;;  %v6738_v34 = vld [vmem:[%s8965_s3 + $0x130] sm:$0xff]   ;;  %v6742_v37 = vld [vmem:[%s8965_s3 + $0x120] sm:$0xff]   ;;  %v2367_v40 = vpack.c.bf16 %v2357_v0, %v2356_v25  ;;  %v6748_v25 = vld [vmem:[%s8965_s3 + $0x108] sm:$0xff]  }
 0x166   : > { %v2360_v0 = vld [vmem:[#allocation3 + $0x6c] sm:$0xff]  ;;  %v2957_v52 = vld [vmem:[#allocation3 + $0x78] sm:$0xff]  ;;  %v2958_v48 = vld [vmem:[#allocation3 + $0x80] sm:$0xff] }
 0x167   : > { %v2956_v31 = vld [vmem:[#allocation3 + $0x70] sm:$0xff]  ;;  %v2966_v62 = vpack.c.bf16 %v2958_v48, %v2957_v52  ;;  %v2959_v9 = vld [vmem:[#allocation3 + $0x88] sm:$0x3f]  ;;  %v6787_v5 = vld [vmem:[%s8967_s5 + $0x50] sm:$0xff]  }
 0x168   : > { %6142 = vmatmul.mubr.bf16.gmra.mxu0 %v1843_v24  ;;  %v6740_v24 = vld [vmem:[%s8965_s3 + $0x128] sm:$0xff]   ;;  %v2965_v55 = vpack.c.bf16 %v2956_v31, %v7856_v23  ;;  %v3158_v7 = vld [vmem:[#allocation3 + $0x89] sm:$0x3f] }
 0x169   : > { %6174 = vmatmul.mubr.bf16.gmra.mxu1 %v1804_v13  ;;  %6193 = vmatprep.mubr.bf16.mxu0 %v2164_v56  ;;  %v2355_v13 = vld [vmem:[#allocation3 + $0x44] sm:$0xff]  ;;  %v6741_v56 = vld [vmem:[%s8965_s3 + $0x168] sm:$0xff]   ;;  %v3166_v23 = vpack.c.bf16 %v3158_v7, %v3158_v7 }
 0x16a   : > { %6225 = vmatprep.mubr.bf16.mxu1 %v2363_v30  ;;  %v2167_v30 = vpack.c.bf16 %v7890_v44, %v7874_v36  ;;  %v3155_v32 = vld [vmem:[#allocation3 + $0x71] sm:$0xff]  ;;  %v3356_v58 = vld [vmem:[#allocation3 + $0x82] sm:$0xff]  ;;  %v3357_v2 = vld [vmem:[#allocation3 + $0x8a] sm:$0x3f] }
 0x16b   : > { %v3164_v26 = vpack.c.bf16 %v3155_v32, %v7854_v38  ;;  %v2967_v38 = vpack.c.bf16 %v2959_v9, %v2959_v9  ;;  %v3354_v35 = vld [vmem:[#allocation3 + $0x72] sm:$0xff]  ;;  %v3365_v36 = vpack.c.bf16 %v3357_v2, %v3357_v2 }
 0x170   : > { %6194 = vmatmul.mubr.bf16.vlgmr.msra.gmra.mxu0 %v2165_v53  ;;  %v6743_v53 = vld [vmem:[%s8965_s3 + $0x160] sm:$0xff]  }
 0x171   : > { %6226 = vmatmul.mubr.bf16.vlgmr.msra.gmra.mxu1 %v2364_v43  ;;  %6197 = vmatprep.mubr.bf16.mxu0 %v2166_v3  ;;  %v6745_v43 = vld [vmem:[%s8965_s3 + $0x158] sm:$0xff]   ;;  %v2358_v3 = vld [vmem:[#allocation3 + $0x5c] sm:$0xff] }
 0x172   : > { %6229 = vmatprep.mubr.bf16.mxu1 %v2365_v33  ;;  %6242 = vmatpush3.bf16.msra.mxu0 %v7778_v49  ;;  %v2366_v49 = vpack.c.bf16 %v2355_v13, %v2354_v17  ;;  %v7937_v33 = vld [vmem:[#allocation3 + $0x6a] sm:$0xff] }
 0x173   : > { %6274 = vmatpush3.bf16.msra.mxu1 %v7818_v63  ;;  %6243 = vmatprep.subr.bf16.mxu0 %v6738_v34  ;;  %v2168_v63 = vpack.c.bf16 %v7894_v27, %v7876_v21  ;;  %v3363_v14 = vpack.c.bf16 %v3354_v35, %v7937_v33  ;;  %v6776_v27 = vld [vmem:[%s8967_s5 + $0x38] sm:$0xff]  }
 0x174   : > { %6275 = vmatprep.subr.bf16.mxu1 %v6739_v16 }
 0x176   : > { %6244 = vmatpush3.bf16.msra.mxu0 %v6738_v34  ;;  %v2359_v34 = vld [vmem:[#allocation3 + $0x64] sm:$0xff] }
 0x177   : > { %6276 = vmatpush3.bf16.msra.mxu1 %v6739_v16  ;;  %6245 = vmatprep.subr.bf16.mxu0 %v6740_v24  ;;  %v2361_v16 = vld [vmem:[#allocation3 + $0x74] sm:$0xff]  ;;  %v2368_v13 = vpack.c.bf16 %v2359_v34, %v2358_v3 }
 0x178   : > { %6198 = vmatmul.mubr.bf16.gmra.mxu0 %v2167_v30  ;;  %6277 = vmatprep.subr.bf16.mxu1 %v6741_v56  ;;  %v6746_v30 = vld [vmem:[%s8965_s3 + $0x110] sm:$0xff]   ;;  %v2369_v17 = vpack.c.bf16 %v2361_v16, %v2360_v0  ;;  %v2747_v3 = vld [vmem:[#allocation3 + $0x16] sm:$0xff]  ;;  %v2547_v16 = vld [vmem:[#allocation3 + $0xd] sm:$0xff] }
 0x179   : > { %6230 = vmatmul.mubr.bf16.gmra.mxu1 %v2366_v49  ;;  %6201 = vmatprep.mubr.bf16.mxu0 %v2168_v63  ;;  %v6747_v49 = vld [vmem:[%s8965_s3 + $0x150] sm:$0xff]   ;;  %v2163_v63 = vld [vmem:[#allocation3 + $0x72] sm:$0x3f] }
 0x17a   : > { %6233 = vmatprep.mubr.bf16.mxu1 %v2367_v40  ;;  %6246 = vmatpush3.bf16.msra.mxu0 %v6740_v24  ;;  %v2169_v24 = vpack.c.bf16 %v7884_v59, %v7882_v8  ;;  %v6749_v40 = vld [vmem:[%s8965_s3 + $0x148] sm:$0xff]   ;;  %v2171_v34 = vpack.c.bf16 %v2163_v63, %v2163_v63  ;;  %v6751_v0 = vld [vmem:[%s8965_s3 + $0x140] sm:$0xff]   ;;  %v2749_v63 = vld [vmem:[#allocation3 + $0x26] sm:$0xff] }
 0x17b   : > { %6278 = vmatpush3.bf16.msra.mxu1 %v6741_v56  ;;  %6247 = vmatprep.subr.bf16.mxu0 %v6742_v37  ;;  %v2170_v56 = vpack.c.bf16 %v7937_v33, %v7886_v6 }
 0x17c   : > { %6279 = vmatprep.subr.bf16.mxu1 %v6743_v53 }
 0x17e   : > { %6248 = vmatpush3.bf16.msra.mxu0 %v6742_v37  ;;  %v2362_v37 = vld [vmem:[#allocation3 + $0x7c] sm:$0x3f] }
 0x17f   : > { %6280 = vmatpush3.bf16.msra.mxu1 %v6743_v53  ;;  %6249 = vmatprep.subr.bf16.mxu0 %v6744_v50  ;;  %v2548_v53 = vld [vmem:[#allocation3 + $0x15] sm:$0xff] }
 0x180   : > { %6202 = vmatmul.mubr.bf16.gmra.mxu0 %v2169_v24  ;;  %6281 = vmatprep.subr.bf16.mxu1 %v6745_v43  ;;  %v2746_v24 = vld [vmem:[#allocation3 + $0xe] sm:$0xff] }
 0x181   : > { %6234 = vmatmul.mubr.bf16.gmra.mxu1 %v2368_v13  ;;  %6205 = vmatprep.mubr.bf16.mxu0 %v2170_v56  ;;  %v6750_v13 = vld [vmem:[%s8965_s3 + $0x100] sm:$0xff]   ;;  %v2761_v56 = vpack.c.bf16 %v2747_v3, %v2746_v24  ;;  %v2549_v3 = vld [vmem:[#allocation3 + $0x1d] sm:$0xff] }
 0x182   : > { %6237 = vmatprep.mubr.bf16.mxu1 %v2369_v17  ;;  %6250 = vmatpush3.bf16.msra.mxu0 %v6744_v50  ;;  %v2370_v50 = vpack.c.bf16 %v2362_v37, %v2362_v37  ;;  %v2748_v17 = vld [vmem:[#allocation3 + $0x1e] sm:$0xff]  ;;  %v2551_v37 = vld [vmem:[#allocation3 + $0x2d] sm:$0xff] }
 0x183   : > { %6282 = vmatpush3.bf16.msra.mxu1 %v6745_v43  ;;  %6251 = vmatprep.subr.bf16.mxu0 %v6746_v30  ;;  %v2562_v43 = vpack.c.bf16 %v2548_v53, %v2547_v16  ;;  %v2552_v53 = vld [vmem:[#allocation3 + $0x35] sm:$0xff]  ;;  %v2762_v16 = vpack.c.bf16 %v2749_v63, %v2748_v17 }
 0x184   : > { %6283 = vmatprep.subr.bf16.mxu1 %v6747_v49  ;;  %v6757_v17 = vld [vmem:[%s8965_s3 + $0x1e8] sm:$0xff]   ;;  %v2754_v63 = vld [vmem:[#allocation3 + $0x4e] sm:$0xff] }
 0x186   : > { %6252 = vmatpush3.bf16.msra.mxu0 %v6746_v30  ;;  %v6752_v30 = vld [vmem:[%s8965_s3 + $0x1b8] sm:$0xff]  }
 0x187   : > { %6284 = vmatpush3.bf16.msra.mxu1 %v6747_v49  ;;  %6253 = vmatprep.subr.bf16.mxu0 %v6748_v25  ;;  %v6753_v49 = vld [vmem:[%s8965_s3 + $0x1f8] sm:$0xff]  }
 0x188   : > { %6206 = vmatmul.mubr.bf16.gmra.mxu0 %v2171_v34  ;;  %6285 = vmatprep.subr.bf16.mxu1 %v6749_v40  ;;  %v2750_v34 = vld [vmem:[#allocation3 + $0x2e] sm:$0xff] }
 0x189   : > { %6238 = vmatmul.mubr.bf16.gmra.mxu1 %v2370_v50  ;;  %6257 = vmatprep.mubr.bf16.mxu0 %v2562_v43  ;;  %v2564_v50 = vpack.c.bf16 %v2552_v53, %v2551_v37  ;;  %v6754_v43 = vld [vmem:[%s8965_s3 + $0x1b0] sm:$0xff]   ;;  %v2755_v37 = vld [vmem:[#allocation3 + $0x56] sm:$0xff] }
 0x18a   : > { %6254 = vmatpush3.bf16.msra.mxu0 %v6748_v25  ;;  %6289 = vmatprep.mubr.bf16.mxu1 %v2761_v56  ;;  %v2751_v25 = vld [vmem:[#allocation3 + $0x36] sm:$0xff] }
 0x18b   : > { %6286 = vmatpush3.bf16.msra.mxu1 %v6749_v40  ;;  %6255 = vmatprep.subr.bf16.mxu0 %v6750_v13  ;;  %v2563_v40 = vpack.c.bf16 %v7544_v42, %v2549_v3  ;;  %v2763_v24 = vpack.c.bf16 %v2751_v25, %v2750_v34  ;;  %v2554_v42 = vld [vmem:[#allocation3 + $0x45] sm:$0xff]  ;;  %v6756_v56 = vld [vmem:[%s8965_s3 + $0x1a8] sm:$0xff]   ;;  %v6758_v25 = vld [vmem:[%s8965_s3 + $0x1a0] sm:$0xff]  }
 0x18c   : > { %6287 = vmatprep.subr.bf16.mxu1 %v6751_v0  ;;  %v2565_v53 = vpack.c.bf16 %v2554_v42, %v7679_v45  ;;  %v2752_v3 = vld [vmem:[#allocation3 + $0x3e] sm:$0xff]  ;;  %v2759_v42 = vld [vmem:[#allocation3 + $0x76] sm:$0xff] }
 0x18d   : > { %v2557_v45 = vld [vmem:[#allocation3 + $0x5d] sm:$0xff] }
 0x18e   : > { %6256 = vmatpush3.bf16.msra.mxu0 %v6750_v13  ;;  %v6755_v13 = vld [vmem:[%s8965_s3 + $0x1f0] sm:$0xff]  }
 0x18f   : > { %6288 = vmatpush3.bf16.msra.mxu1 %v6751_v0  ;;  %6305 = vmatprep.subr.bf16.mxu0 %v6752_v30  ;;  %v2753_v0 = vld [vmem:[#allocation3 + $0x46] sm:$0xff] }
 0x190   : > { %6337 = vmatprep.subr.bf16.mxu1 %v6753_v49 }
 0x191   : > { %6258 = vmatmul.mubr.bf16.vlgmr.msra.gmra.mxu0 %v2563_v40  ;;  %v2765_v40 = vpack.c.bf16 %v2755_v37, %v2754_v63  ;;  %v2756_v63 = vld [vmem:[#allocation3 + $0x5e] sm:$0xff]  ;;  %v2758_v37 = vld [vmem:[#allocation3 + $0x6e] sm:$0xff] }
 0x192   : > { %6290 = vmatmul.mubr.bf16.vlgmr.msra.gmra.mxu1 %v2762_v16  ;;  %6261 = vmatprep.mubr.bf16.mxu0 %v2564_v50  ;;  %v6759_v16 = vld [vmem:[%s8965_s3 + $0x1e0] sm:$0xff]   ;;  %v2558_v50 = vld [vmem:[#allocation3 + $0x65] sm:$0xff] }
 0x193   : > { %6293 = vmatprep.mubr.bf16.mxu1 %v2763_v24  ;;  %6306 = vmatpush3.bf16.msra.mxu0 %v6752_v30  ;;  %v2555_v30 = vld [vmem:[#allocation3 + $0x4d] sm:$0xff] }
 0x194   : > { %6338 = vmatpush3.bf16.msra.mxu1 %v6753_v49  ;;  %6307 = vmatprep.subr.bf16.mxu0 %v6754_v43  ;;  %v2764_v49 = vpack.c.bf16 %v2753_v0, %v2752_v3  ;;  %v2566_v34 = vpack.c.bf16 %v7755_v1, %v2555_v30  ;;  %v6760_v1 = vld [vmem:[%s8965_s3 + $0x198] sm:$0xff]   ;;  %v2567_v0 = vpack.c.bf16 %v2558_v50, %v2557_v45  ;;  %v6763_v30 = vld [vmem:[%s8965_s3 + $0x1d0] sm:$0xff]  }
 0x195   : > { %6339 = vmatprep.subr.bf16.mxu1 %v6755_v13  ;;  %v6761_v24 = vld [vmem:[%s8965_s3 + $0x1d8] sm:$0xff]   ;;  %v2767_v3 = vpack.c.bf16 %v2759_v42, %v2758_v37 }
 0x196   : > { %v3146_v42 = vld [vmem:[#allocation3 + $0x29] sm:$0xff] }
 0x197   : > { %6308 = vmatpush3.bf16.msra.mxu0 %v6754_v43  ;;  %v2757_v43 = vld [vmem:[#allocation3 + $0x66] sm:$0xff] }
 0x198   : > { %6340 = vmatpush3.bf16.msra.mxu1 %v6755_v13  ;;  %6309 = vmatprep.subr.bf16.mxu0 %v6756_v56  ;;  %v2560_v13 = vld [vmem:[#allocation3 + $0x75] sm:$0xff] }
 0x199   : > { %6262 = vmatmul.mubr.bf16.gmra.mxu0 %v2565_v53  ;;  %6341 = vmatprep.subr.bf16.mxu1 %v6757_v17  ;;  %v6762_v53 = vld [vmem:[%s8965_s3 + $0x190] sm:$0xff]  }
 0x19a   : > { %6294 = vmatmul.mubr.bf16.gmra.mxu1 %v2764_v49  ;;  %6265 = vmatprep.mubr.bf16.mxu0 %v2566_v34  ;;  %v2561_v49 = vld [vmem:[#allocation3 + $0x7d] sm:$0x3f] }
 0x19b   : > { %6297 = vmatprep.mubr.bf16.mxu1 %v2765_v40  ;;  %6310 = vmatpush3.bf16.msra.mxu0 %v6756_v56  ;;  %v2766_v56 = vpack.c.bf16 %v2757_v43, %v2756_v63  ;;  %v2760_v34 = vld [vmem:[#allocation3 + $0x7e] sm:$0x3f]  ;;  %v2569_v40 = vpack.c.bf16 %v2561_v49, %v2561_v49  ;;  %v6766_v43 = vld [vmem:[%s8965_s3 + $0x180] sm:$0xff]  }
 0x19c   : > { %6342 = vmatpush3.bf16.msra.mxu1 %v6757_v17  ;;  %6311 = vmatprep.subr.bf16.mxu0 %v6758_v25  ;;  %v2568_v17 = vpack.c.bf16 %v2560_v13, %v7810_v41  ;;  %v6764_v41 = vld [vmem:[%s8965_s3 + $0x188] sm:$0xff]   ;;  %v2768_v45 = vpack.c.bf16 %v2760_v34, %v2760_v34  ;;  %v6767_v13 = vld [vmem:[%s8965_s3 + $0x1c0] sm:$0xff]  }
 0x19d   : > { %6343 = vmatprep.subr.bf16.mxu1 %v6759_v16  ;;  %v6781_v34 = vld [vmem:[%s8967_s5 + $0x68] sm:$0xff]  }
 0x19f   : > { %6312 = vmatpush3.bf16.msra.mxu0 %v6758_v25  ;;  %v6765_v25 = vld [vmem:[%s8965_s3 + $0x1c8] sm:$0xff]  }
 0x1a0   : > { %6344 = vmatpush3.bf16.msra.mxu1 %v6759_v16  ;;  %6313 = vmatprep.subr.bf16.mxu0 %v6760_v1  ;;  %v2945_v16 = vld [vmem:[#allocation3 + $0x18] sm:$0xff] }
 0x1a1   : > { %6266 = vmatmul.mubr.bf16.gmra.mxu0 %v2567_v0  ;;  %6345 = vmatprep.subr.bf16.mxu1 %v6761_v24  ;;  %v2960_v50 = vpack.c.bf16 %v7605_v15, %v2945_v16  ;;  %v6768_v15 = vld [vmem:[%s8965_s3 + $0x238] sm:$0xff]   ;;  %v6769_v0 = vld [vmem:[%s8965_s3 + $0x230] sm:$0xff]  }
 0x1a2   : > { %6298 = vmatmul.mubr.bf16.gmra.mxu1 %v2766_v56  ;;  %6269 = vmatprep.mubr.bf16.mxu0 %v2568_v17 }
 0x1a3   : > { %6301 = vmatprep.mubr.bf16.mxu1 %v2767_v3  ;;  %6314 = vmatpush3.bf16.msra.mxu0 %v6760_v1  ;;  %v3144_v1 = vld [vmem:[#allocation3 + $0x19] sm:$0xff] }
 0x1a4   : > { %6346 = vmatpush3.bf16.msra.mxu1 %v6761_v24  ;;  %6315 = vmatprep.subr.bf16.mxu0 %v6762_v53  ;;  %v3159_v24 = vpack.c.bf16 %v7603_v46, %v3144_v1  ;;  %v3160_v46 = vpack.c.bf16 %v7655_v20, %v3146_v42  ;;  %v6770_v20 = vld [vmem:[%s8965_s3 + $0x228] sm:$0xff]   ;;  %v6783_v1 = vld [vmem:[%s8967_s5 + $0x60] sm:$0xff]  }
 0x1a5   : > { %6347 = vmatprep.subr.bf16.mxu1 %v6763_v30 }
 0x1a7   : > { %6316 = vmatpush3.bf16.msra.mxu0 %v6762_v53 }
 0x1a8   : > { %6348 = vmatpush3.bf16.msra.mxu1 %v6763_v30  ;;  %6317 = vmatprep.subr.bf16.mxu0 %v6764_v41 }
 0x1a9   : > { %6270 = vmatmul.mubr.bf16.gmra.mxu0 %v2569_v40  ;;  %6349 = vmatprep.subr.bf16.mxu1 %v6765_v25 }
 0x1aa   : > { %6302 = vmatmul.mubr.bf16.gmra.mxu1 %v2768_v45  ;;  %6321 = vmatprep.mubr.bf16.mxu0 %v2960_v50 }
 0x1ab   : > { %6318 = vmatpush3.bf16.msra.mxu0 %v6764_v41  ;;  %6353 = vmatprep.mubr.bf16.mxu1 %v3159_v24 }
 0x1ac   : > { %6350 = vmatpush3.bf16.msra.mxu1 %v6765_v25  ;;  %6319 = vmatprep.subr.bf16.mxu0 %v6766_v43  ;;  %v6782_v25 = vld [vmem:[%s8967_s5 + $0x20] sm:$0xff]  }
 0x1ad   : > { %6351 = vmatprep.subr.bf16.mxu1 %v6767_v13 }
 0x1af   : > { %6320 = vmatpush3.bf16.msra.mxu0 %v6766_v43  ;;  %v6784_v43 = vld [vmem:[%s8967_s5 + $0x18] sm:$0xff]  }
 0x1b0   : > { %6352 = vmatpush3.bf16.msra.mxu1 %v6767_v13  ;;  %6369 = vmatprep.subr.bf16.mxu0 %v6768_v15 }
 0x1b2   : > { %6322 = vmatmul.mubr.bf16.vlgmr.msra.gmra.mxu0 %v2961_v51  ;;  %v6774_v51 = vld [vmem:[%s8965_s3 + $0x208] sm:$0xff]  }
 0x1b3   : > { %6354 = vmatmul.mubr.bf16.vlgmr.msra.gmra.mxu1 %v3160_v46  ;;  %6325 = vmatprep.mubr.bf16.mxu0 %v2962_v4  ;;  %v6775_v4 = vld [vmem:[%s8965_s3 + $0x200] sm:$0xff]  }
 0x1b4   : > { %6357 = vmatprep.mubr.bf16.mxu1 %v3161_v12  ;;  %6370 = vmatpush3.bf16.msra.mxu0 %v6768_v15  ;;  %v3355_v12 = vld [vmem:[#allocation3 + $0x7a] sm:$0xff] }
 0x1b5   : > { %6371 = vmatprep.subr.bf16.mxu0 %v6769_v0 }
 0x1b8   : > { %6372 = vmatpush3.bf16.msra.mxu0 %v6769_v0 }
 0x1b9   : > { %6373 = vmatprep.subr.bf16.mxu0 %v6770_v20 }
 0x1ba   : > { %6326 = vmatmul.mubr.bf16.gmra.mxu0 %v2963_v11  ;;  %v3364_v11 = vpack.c.bf16 %v3356_v58, %v3355_v12  ;;  %v8169_v58 = vld [vmem:[%s8967_s5 + $0xf8] sm:$0xff]  }
 0x1bb   : > { %6358 = vmatmul.mubr.bf16.gmra.mxu1 %v3162_v57  ;;  %6329 = vmatprep.mubr.bf16.mxu0 %v2964_v47  ;;  %9020 = vst [vmem:[#allocation5_spill] sm:$0xff] %v8169_v58 }
 0x1bc   : > { %6361 = vmatprep.mubr.bf16.mxu1 %v3163_v61  ;;  %6374 = vmatpush3.bf16.msra.mxu0 %v6770_v20  ;;  %v6785_v20 = vld [vmem:[%s8967_s5 + $0x58] sm:$0xff]  }
 0x1bd   : > { %6375 = vmatprep.subr.bf16.mxu0 %v6771_v29 }
 0x1c0   : > { %6376 = vmatpush3.bf16.msra.mxu0 %v6771_v29  ;;  %v6786_v29 = vld [vmem:[%s8967_s5 + $0x10] sm:$0xff]  }
 0x1c1   : > { %6377 = vmatprep.subr.bf16.mxu0 %v6772_v28 }
 0x1c2   : > { %6330 = vmatmul.mubr.bf16.gmra.mxu0 %v2965_v55  ;;  %v6788_v55 = vld [vmem:[%s8967_s5 + $0x8] sm:$0xff]  }
 0x1c3   : > { %6362 = vmatmul.mubr.bf16.gmra.mxu1 %v3164_v26  ;;  %6333 = vmatprep.mubr.bf16.mxu0 %v2966_v62 }
 0x1c4   : > { %6365 = vmatprep.mubr.bf16.mxu1 %v3165_v54  ;;  %6378 = vmatpush3.bf16.msra.mxu0 %v6772_v28 }
 0x1c5   : > { %6379 = vmatprep.subr.bf16.mxu0 %v6773_v19 }
 0x1c8   : > { %6380 = vmatpush3.bf16.msra.mxu0 %v6773_v19 }
 0x1c9   : > { %6381 = vmatprep.subr.bf16.mxu0 %v6774_v51 }
 0x1ca   : > { %6334 = vmatmul.mubr.bf16.gmra.mxu0 %v2967_v38  ;;  %v6790_v38 = vld [vmem:[%s8967_s5] sm:$0xff]  }
 0x1cb   : > { %6385 = vmatprep.mubr.bf16.mxu0 %v3358_v18  ;;  %6366 = vmatmul.mubr.bf16.gmra.mxu1 %v3166_v23 }
 0x1cc   : > { %6382 = vmatpush3.bf16.msra.mxu0 %v6774_v51  ;;  %v6789_v51 = vld [vmem:[%s8967_s5 + $0x48] sm:$0xff]  }
 0x1cd   : > { %6383 = vmatprep.subr.bf16.mxu0 %v6775_v4 }
 0x1d0   : > { %6384 = vmatpush3.bf16.msra.mxu0 %v6775_v4 }
 0x1d1   : > { %6429 = vmatprep.subr.bf16.mxu0 %v6776_v27 }
 0x1d3   : > { %6386 = vmatmul.mubr.bf16.vlgmr.msra.gmra.mxu0 %v3359_v60  ;;  %v6777_v60 = vld [vmem:[%s8967_s5 + $0x78] sm:$0xff]  }
 0x1d4   : > { %6389 = vmatprep.mubr.bf16.mxu0 %v3360_v39  ;;  %v6778_v39 = vld [vmem:[%s8967_s5 + $0x30] sm:$0xff]   ;;  %6430 = vmatpush3.bf16.msra.mxu0 %v6776_v27 }
 0x1d5   : > { %6401 = vmatprep.subr.bf16.mxu1 %v6777_v60  ;;  %6431 = vmatprep.subr.bf16.mxu0 %v6778_v39 }
 0x1d6   : > { %6402 = vmatpush3.bf16.msra.mxu1 %v6777_v60 }
 0x1d8   : > { %6432 = vmatpush3.bf16.msra.mxu0 %v6778_v39 }
 0x1db   : > { %6390 = vmatmul.mubr.bf16.gmra.mxu0 %v3361_v10  ;;  %v6779_v10 = vld [vmem:[%s8967_s5 + $0x70] sm:$0xff]  }
 0x1dc   : > { %6393 = vmatprep.mubr.bf16.mxu0 %v3362_v22  ;;  %v6780_v22 = vld [vmem:[%s8967_s5 + $0x28] sm:$0xff]   ;;  %6403 = vmatprep.subr.bf16.mxu1 %v6779_v10 }
 0x1dd   : > { %6433 = vmatprep.subr.bf16.mxu0 %v6780_v22  ;;  %6404 = vmatpush3.bf16.msra.mxu1 %v6779_v10 }
 0x1de   : > { %6434 = vmatpush3.bf16.msra.mxu0 %v6780_v22  ;;  %6405 = vmatprep.subr.bf16.mxu1 %v6781_v34 }
 0x1df   : > { %6435 = vmatprep.subr.bf16.mxu0 %v6782_v25 }
 0x1e1   : > { %6406 = vmatpush3.bf16.msra.mxu1 %v6781_v34 }
 0x1e2   : > { %6436 = vmatpush3.bf16.msra.mxu0 %v6782_v25  ;;  %6407 = vmatprep.subr.bf16.mxu1 %v6783_v1 }
 0x1e3   : > { %6394 = vmatmul.mubr.bf16.gmra.mxu0 %v3363_v14  ;;  %6437 = vmatprep.subr.bf16.mxu0 %v6784_v43  ;;  %v6791_v14 = vld [vmem:[%s8967_s5 + $0x40] sm:$0xff]  }
 0x1e4   : > { %6397 = vmatprep.mubr.bf16.mxu0 %v3364_v11 }
 0x1e5   : > { %6408 = vmatpush3.bf16.msra.mxu1 %v6783_v1 }
 0x1e6   : > { %6438 = vmatpush3.bf16.msra.mxu0 %v6784_v43  ;;  %6409 = vmatprep.subr.bf16.mxu1 %v6785_v20 }
 0x1e7   : > { %6439 = vmatprep.subr.bf16.mxu0 %v6786_v29 }
 0x1e9   : > { %6410 = vmatpush3.bf16.msra.mxu1 %v6785_v20 }
 0x1ea   : > { %6440 = vmatpush3.bf16.msra.mxu0 %v6786_v29  ;;  %6411 = vmatprep.subr.bf16.mxu1 %v6787_v5 }
 0x1eb   : > { %6398 = vmatmul.mubr.bf16.gmra.mxu0 %v3365_v36  ;;  %6441 = vmatprep.subr.bf16.mxu0 %v6788_v55 }
 0x1ed   : > { %6412 = vmatpush3.bf16.msra.mxu1 %v6787_v5 }
 0x1ee   : > { %6442 = vmatpush3.bf16.msra.mxu0 %v6788_v55  ;;  %6413 = vmatprep.subr.bf16.mxu1 %v6789_v51 }
 0x1ef   : > { %6443 = vmatprep.subr.bf16.mxu0 %v6790_v38 }
 0x1f1   : > { %v6131_v21 = vpop.f32.mrf.mxu0  ;;  %6414 = vmatpush3.bf16.msra.mxu1 %v6789_v51 }
 0x1f2   : > { %6444 = vmatpush3.bf16.msra.mxu0 %v6790_v38  ;;  %6415 = vmatprep.subr.bf16.mxu1 %v6791_v14 }
 0x1f3   : > { %v1943_v47 = vpop.f32.mrf.mxu0  ;;  %6485 = vmatprep.subr.bf16.mxu0 %v8169_v58 }
 0x1f5   : > { %v6132_v59 = vpop.f32.mrf.mxu0  ;;  %6416 = vmatpush3.bf16.msra.mxu1 %v6791_v14 }
 0x1f7   : > { %v8101_v33 = vpop.f32.mrf.mxu0 }
 0x1f9   : > { %v6163_v57 = vpop.f32.mrf.mxu1 }
 0x1fa   : > { %v8080_v8 = vadd.f32 %v6163_v57, %v6131_v21 }
 0x1fb   : > { %v2087_v61 = vpop.f32.mrf.mxu1 }
 0x1fc   : > { %v8082_v44 = vadd.f32 %v2087_v61, %v1943_v47 }
 0x1fd   : > { %v6164_v6 = vpop.f32.mrf.mxu1 }
 0x1fe   : > { %v8084_v18 = vadd.f32 %v6164_v6, %v6132_v59  ;;  %v8179_v59 = vld [vmem:[%s8967_s5 + $0xb8] sm:$0xff]  }
 0x1ff   : > { %v8103_v63 = vpop.f32.mrf.mxu1  ;;  %9021 = vst [vmem:[#allocation6_spill] sm:$0xff] %v8179_v59  ;;  %6457 = vmatprep.subr.bf16.mxu1 %v8179_v59 }
 0x216   : > { %v6135_v56 = vpop.f32.mrf.mxu0 }
 0x217   : > { %v6167_v17 = vpop.f32.mrf.mxu1 }
 0x218   : > { %v8105_v37 = vadd.f32 %v6167_v17, %v6135_v56  ;;  %v1959_v53 = vpop.f32.mrf.mxu0 }
 0x219   : > { %v2103_v3 = vpop.f32.mrf.mxu1 }
 0x21a   : > { %v8107_v30 = vadd.f32 %v2103_v3, %v1959_v53  ;;  %v6136_v49 = vpop.f32.mrf.mxu0 }
 0x21b   : > { %v6168_v41 = vpop.f32.mrf.mxu1 }
 0x21c   : > { %v8115_v40 = vadd.f32 %v6168_v41, %v6136_v49  ;;  %v8117_v16 = vpop.f32.mrf.mxu0 }
 0x21d   : > { %v8119_v45 = vpop.f32.mrf.mxu1 }
 0x21e   : > { %v2107_v34 = vadd.f32 %v8119_v45, %v8117_v16 }
 0x220   : > { %v6139_v50 = vpop.f32.mrf.mxu0 }
 0x221   : > { %v6171_v24 = vpop.f32.mrf.mxu1 }
 0x222   : > { %v8127_v13 = vadd.f32 %v6171_v24, %v6139_v50  ;;  %v1975_v15 = vpop.f32.mrf.mxu0 }
 0x223   : > { %v2119_v42 = vpop.f32.mrf.mxu1 }
 0x224   : > { %v8129_v46 = vadd.f32 %v2119_v42, %v1975_v15  ;;  %v6140_v0 = vpop.f32.mrf.mxu0 }
 0x225   : > { %v6172_v31 = vpop.f32.mrf.mxu1 }
 0x226   : > { %v8137_v28 = vadd.f32 %v6172_v31, %v6140_v0  ;;  %v8139_v32 = vpop.f32.mrf.mxu0 }
 0x227   : > { %v8141_v52 = vpop.f32.mrf.mxu1 }
 0x228   : > { %v6143_v48 = vpop.f32.mrf.mxu0 }
 0x229   : > { %v6175_v26 = vpop.f32.mrf.mxu1 }
 0x22a   : > { %v8149_v62 = vadd.f32 %v6175_v26, %v6143_v48  ;;  %v1991_v19 = vpop.f32.mrf.mxu0 }
 0x22b   : > { %v2135_v54 = vpop.f32.mrf.mxu1 }
 0x22c   : > { %v8151_v9 = vadd.f32 %v2135_v54, %v1991_v19  ;;  %v6144_v7 = vpop.f32.mrf.mxu0 }
 0x22d   : > { %v6176_v23 = vpop.f32.mrf.mxu1 }
 0x22e   : > { %v8159_v4 = vpop.f32.mrf.mxu0 }
 0x22f   : > { %v8161_v35 = vpop.f32.mrf.mxu1 }
 0x230   : > { %v6195_v12 = vpop.f32.mrf.mxu0 }
 0x231   : > { %v2335_v11 = vadd.f32 %v6195_v12, %v8080_v8  ;;  %v6227_v2 = vpop.f32.mrf.mxu1  ;;  %v2091_v8 = vadd.f32 %v8103_v63, %v8101_v33 }
 0x232   : > { %v2271_v36 = vpop.f32.mrf.mxu0 }
 0x233   : > { %v8173_v21 = vadd.f32 %v6227_v2, %v2335_v11  ;;  %v2333_v57 = vadd.f32 %v2271_v36, %v8082_v44  ;;  %v2470_v47 = vpop.f32.mrf.mxu1 }
 0x234   : > { %v6196_v61 = vpop.f32.mrf.mxu0 }
 0x235   : > { %v8183_v6 = vadd.f32 %v2470_v47, %v2333_v57  ;;  %v2336_v27 = vadd.f32 %v6196_v61, %v8084_v18  ;;  %v6228_v60 = vpop.f32.mrf.mxu1 }
 0x236   : > { %v2274_v39 = vpop.f32.mrf.mxu0 }
 0x237   : > { %v8187_v44 = vadd.f32 %v6228_v60, %v2336_v27  ;;  %v2334_v10 = vadd.f32 %v2274_v39, %v2091_v8  ;;  %v2473_v22 = vpop.f32.mrf.mxu1 }
 0x238   : > { %v6199_v56 = vpop.f32.mrf.mxu0 }
 0x239   : > { %v8189_v17 = vadd.f32 %v2473_v22, %v2334_v10  ;;  %v2339_v53 = vadd.f32 %v6199_v56, %v8105_v37  ;;  %v6231_v3 = vpop.f32.mrf.mxu1 }
 0x23a   : > { %v2287_v49 = vpop.f32.mrf.mxu0 }
 0x23b   : > { %v8192_v33 = vadd.f32 %v6231_v3, %v2339_v53  ;;  %v2337_v63 = vadd.f32 %v2287_v49, %v8107_v30  ;;  %v2486_v18 = vpop.f32.mrf.mxu1 }
 0x23c   : > { %v6200_v41 = vpop.f32.mrf.mxu0 }
 0x23d   : > { %v8197_v25 = vadd.f32 %v2486_v18, %v2337_v63  ;;  %v2340_v50 = vadd.f32 %v6200_v41, %v8115_v40  ;;  %v6232_v1 = vpop.f32.mrf.mxu1  ;;  %v2123_v40 = vadd.f32 %v8141_v52, %v8139_v32 }
 0x23e   : > { %v2290_v43 = vpop.f32.mrf.mxu0 }
 0x23f   : > { %v8200_v24 = vadd.f32 %v6232_v1, %v2340_v50  ;;  %v2338_v37 = vadd.f32 %v2290_v43, %v2107_v34  ;;  %v2489_v15 = vpop.f32.mrf.mxu1 }
 0x240   : > { %v6203_v42 = vpop.f32.mrf.mxu0 }
 0x241   : > { %v8202_v0 = vadd.f32 %v2489_v15, %v2338_v37  ;;  %v2343_v30 = vadd.f32 %v6203_v42, %v8127_v13  ;;  %v6235_v20 = vpop.f32.mrf.mxu1 }
 0x242   : > { %v2303_v29 = vpop.f32.mrf.mxu0 }
 0x243   : > { %v8205_v31 = vadd.f32 %v6235_v20, %v2343_v30  ;;  %v2341_v16 = vadd.f32 %v2303_v29, %v8129_v46  ;;  %v2502_v45 = vpop.f32.mrf.mxu1 }
 0x244   : > { %v6204_v48 = vpop.f32.mrf.mxu0 }
 0x245   : > { %v8210_v5 = vadd.f32 %v2502_v45, %v2341_v16  ;;  %v2344_v55 = vadd.f32 %v6204_v48, %v8137_v28  ;;  %v6236_v26 = vpop.f32.mrf.mxu1  ;;  %v2139_v28 = vadd.f32 %v8161_v35, %v8159_v4 }
 0x246   : > { %v2306_v19 = vpop.f32.mrf.mxu0 }
 0x247   : > { %v8213_v54 = vadd.f32 %v6236_v26, %v2344_v55  ;;  %v2342_v13 = vadd.f32 %v2306_v19, %v2123_v40  ;;  %v2505_v7 = vpop.f32.mrf.mxu1 }
 0x248   : > { %v6207_v51 = vpop.f32.mrf.mxu0 }
 0x249   : > { %v8215_v38 = vadd.f32 %v2505_v7, %v2342_v13  ;;  %v2347_v46 = vadd.f32 %v6207_v51, %v8149_v62  ;;  %v6239_v23 = vpop.f32.mrf.mxu1 }
 0x24a   : > { %v2319_v12 = vpop.f32.mrf.mxu0 }
 0x24b   : > { %v8218_v14 = vadd.f32 %v6239_v23, %v2347_v46  ;;  %v2345_v32 = vadd.f32 %v2319_v12, %v8151_v9  ;;  %v2518_v52 = vpop.f32.mrf.mxu1 }
 0x24c   : > { %v6208_v11 = vpop.f32.mrf.mxu0 }
 0x24d   : > { %v8223_v2 = vadd.f32 %v2518_v52, %v2345_v32  ;;  %v6240_v36 = vpop.f32.mrf.mxu1 }
 0x24e   : > { %v2322_v57 = vpop.f32.mrf.mxu0 }
 0x24f   : > { %9022 = vst [vmem:[#allocation7_spill] sm:$0xff] %v8223_v2  ;;  %v2346_v47 = vadd.f32 %v2322_v57, %v2139_v28  ;;  %v2521_v61 = vpop.f32.mrf.mxu1 }
 0x251   : > { %v8225_v8 = vadd.f32 %v2521_v61, %v2346_v47  ;;  %v6259_v62 = vpop.f32.mrf.mxu0 }
 0x252   : > { %v6291_v27 = vpop.f32.mrf.mxu1  ;;  %v2733_v58 = vadd.f32 %v6259_v62, %v8173_v21 }
 0x253   : > { %9023 = vst [vmem:[#allocation8_spill] sm:$0xff] %v8225_v8  ;;  %v2669_v60 = vpop.f32.mrf.mxu0 }
 0x254   : > { %v2868_v39 = vpop.f32.mrf.mxu1  ;;  %v2731_v2 = vadd.f32 %v2669_v60, %v8183_v6 }
 0x255   : > { %v6260_v10 = vpop.f32.mrf.mxu0 }
 0x256   : > { %v8227_v22 = vpop.f32.mrf.mxu1  ;;  %v2930_v21 = vadd.f32 %v2868_v39, %v2731_v2 }
 0x257   : > { %v2672_v9 = vpop.f32.mrf.mxu0 }
 0x258   : > { %v8229_v56 = vpop.f32.mrf.mxu1 }
 0x259   : > { %v6263_v53 = vpop.f32.mrf.mxu0 }
 0x25a   : > { %v8231_v4 = vpop.f32.mrf.mxu1  ;;  %v2737_v6 = vadd.f32 %v6263_v53, %v8192_v33 }
 0x25b   : > { %v8233_v35 = vpop.f32.mrf.mxu0 }
 0x25c   : > { %v8235_v3 = vpop.f32.mrf.mxu1  ;;  %v2936_v33 = vadd.f32 %v8231_v4, %v2737_v6 }
 0x25d   : > { %v8237_v49 = vpop.f32.mrf.mxu0 }
 0x25e   : > { %v8239_v63 = vpop.f32.mrf.mxu1  ;;  %v2738_v2 = vadd.f32 %v8237_v49, %v8200_v24 }
 0x25f   : > { %v8241_v18 = vpop.f32.mrf.mxu0 }
 0x260   : > { %v8243_v41 = vpop.f32.mrf.mxu1 }
 0x261   : > { %v8245_v34 = vpop.f32.mrf.mxu0 }
 0x262   : > { %v8247_v50 = vpop.f32.mrf.mxu1 }
 0x263   : > { %v8249_v1 = vpop.f32.mrf.mxu0 }
 0x264   : > { %v8251_v43 = vpop.f32.mrf.mxu1 }
 0x265   : > { %v8253_v37 = vpop.f32.mrf.mxu0 }
 0x266   : > { %v8255_v15 = vpop.f32.mrf.mxu1 }
 0x267   : > { %v8257_v42 = vpop.f32.mrf.mxu0 }
 0x268   : > { %v8259_v30 = vpop.f32.mrf.mxu1 }
 0x269   : > { %9024 = vst [vmem:[#allocation9_spill] sm:$0xff] %v8259_v30  ;;  %v8261_v20 = vpop.f32.mrf.mxu0 }
 0x26a   : > { %9025 = vst [vmem:[#allocation10_spill] sm:$0xff] %v8261_v20  ;;  %v8263_v29 = vpop.f32.mrf.mxu1 }
 0x26b   : > { %9026 = vst [vmem:[#allocation11_spill] sm:$0xff] %v8263_v29  ;;  %v8265_v16 = vpop.f32.mrf.mxu0 }
 0x26c   : > { %9027 = vst [vmem:[#allocation12_spill] sm:$0xff] %v8265_v16  ;;  %v8267_v45 = vpop.f32.mrf.mxu1 }
 0x26d   : > { %9028 = vst [vmem:[#allocation13_spill] sm:$0xff] %v8267_v45  ;;  %v6272_v48 = vpop.f32.mrf.mxu0 }
 0x26e   : > { %v6304_v40 = vpop.f32.mrf.mxu1 }
 0x26f   : > { %v8269_v55 = vpop.f32.mrf.mxu0 }
 0x270   : > { %9029 = vst [vmem:[#allocation14_spill] sm:$0xff] %v8269_v55  ;;  %v8271_v26 = vpop.f32.mrf.mxu1 }
 0x271   : > { %9030 = vst [vmem:[#allocation15_spill] sm:$0xff] %v8271_v26 }
 0x272   : > { %v6323_v19 = vpop.f32.mrf.mxu0 }
 0x273   : > { %v6355_v13 = vpop.f32.mrf.mxu1 }
 0x274   : > { %v3067_v7 = vpop.f32.mrf.mxu0 }
 0x275   : > { %v3266_v51 = vpop.f32.mrf.mxu1  ;;  %v3129_v60 = vadd.f32 %v3067_v7, %v2930_v21 }
 0x276   : > { %v6324_v46 = vpop.f32.mrf.mxu0 }
 0x277   : > { %v6356_v23 = vpop.f32.mrf.mxu1 }
 0x278   : > { %v3070_v12 = vpop.f32.mrf.mxu0 }
 0x279   : > { %v3269_v32 = vpop.f32.mrf.mxu1 }
 0x27a   : > { %v6327_v52 = vpop.f32.mrf.mxu0 }
 0x27b   : > { %v6359_v11 = vpop.f32.mrf.mxu1 }
 0x27c   : > { %v3083_v28 = vpop.f32.mrf.mxu0 }
 0x27d   : > { %v8273_v36 = vpop.f32.mrf.mxu1 }
 0x27e   : > { %v6328_v57 = vpop.f32.mrf.mxu0 }
 0x27f   : > { %v8275_v47 = vpop.f32.mrf.mxu1 }
 0x280   : > { %v8277_v61 = vpop.f32.mrf.mxu0 }
 0x281   : > { %v8279_v48 = vpop.f32.mrf.mxu1 }
 0x282   : > { %9031 = vst [vmem:[#allocation16_spill] sm:$0xff] %v8279_v48  ;;  %v8281_v40 = vpop.f32.mrf.mxu0 }
 0x283   : > { %v8283_v59 = vpop.f32.mrf.mxu1 }
 0x284   : > { %9032 = vst [vmem:[#allocation17_spill] sm:$0xff] %v8283_v59  ;;  %v8285_v26 = vpop.f32.mrf.mxu0  ;;  %v2932_v59 = vadd.f32 %v6291_v27, %v2733_v58 }
 0x285   : > { %9033 = vst [vmem:[#allocation18_spill] sm:$0xff] %v8285_v26  ;;  %v8287_v55 = vpop.f32.mrf.mxu1  ;;  %v2734_v26 = vadd.f32 %v6260_v10, %v8187_v44  ;;  %v2735_v44 = vadd.f32 %v8233_v35, %v8197_v25  ;;  %v8321_v10 = vld [vmem:[%s8966_s4] ss:$0 sm:$0xff]  ;;  %v2736_v25 = vadd.f32 %v8241_v18, %v8202_v0  ;;  %v3135_v35 = vadd.f32 %v6327_v52, %v2936_v33  ;;  %v9044_v33 = vld [vmem:[#allocation7_spill] sm:$0xff] }
 0x286   : > { %9034 = vst [vmem:[#allocation19_spill] sm:$0xff] %v8287_v55  ;;  %v8289_v8 = vpop.f32.mrf.mxu0  ;;  %v3131_v62 = vadd.f32 %v6323_v19, %v2932_v59  ;;  %v2739_v18 = vadd.f32 %v8249_v1, %v8210_v5 }
 0x287   : > { %9035 = vst [vmem:[#allocation20_spill] sm:$0xff] %v8289_v8  ;;  %v8291_v45 = vpop.f32.mrf.mxu1  ;;  %v2732_v8 = vadd.f32 %v2672_v9, %v8189_v17  ;;  %v2935_v0 = vadd.f32 %v8243_v41, %v2736_v25  ;;  %v6794_v25 = vld [vmem:[%s8967_s5 + $0xf0] sm:$0xff]  }
 0x288   : > { %9036 = vst [vmem:[#allocation21_spill] sm:$0xff] %v8291_v45  ;;  %v8294_v29 = vpop.f32.mrf.mxu0  ;;  %v3330_v27 = vadd.f32 %v6355_v13, %v3131_v62 }
 0x289   : > { %9037 = vst [vmem:[#allocation22_spill] sm:$0xff] %v8294_v29  ;;  %v8296_v16 = vpop.f32.mrf.mxu1  ;;  %v2931_v58 = vadd.f32 %v8229_v56, %v2732_v8  ;;  %v2934_v8 = vadd.f32 %v8235_v3, %v2735_v44 }
 0x28a   : > { %9038 = vst [vmem:[#allocation23_spill] sm:$0xff] %v8296_v16  ;;  %v8299_v30 = vpop.f32.mrf.mxu0  ;;  %v2933_v16 = vadd.f32 %v8227_v22, %v2734_v26  ;;  %v3328_v22 = vadd.f32 %v3266_v51, %v3129_v60 }
 0x28b   : > { %9039 = vst [vmem:[#allocation24_spill] sm:$0xff] %v8299_v30  ;;  %v8301_v48 = vpop.f32.mrf.mxu1  ;;  %v3130_v59 = vadd.f32 %v3070_v12, %v2931_v58  ;;  %v3133_v26 = vadd.f32 %v3083_v28, %v2934_v8  ;;  %v2742_v12 = vadd.f32 %v8253_v37, %v8213_v54  ;;  %v2938_v28 = vadd.f32 %v8251_v43, %v2739_v18  ;;  %v9040_v43 = vld [vmem:[#allocation10_spill] sm:$0xff]  ;;  %v9041_v58 = vld [vmem:[#allocation16_spill] sm:$0xff] }
 0x28c   : > { %v8304_v55 = vpop.f32.mrf.mxu0  ;;  %v3132_v17 = vadd.f32 %v6324_v46, %v2933_v16  ;;  %v3334_v46 = vadd.f32 %v6359_v11, %v3135_v35  ;;  %v2745_v60 = vadd.f32 %v9040_v43, %v8218_v14 }
 0x28d   : > { %v8307_v45 = vpop.f32.mrf.mxu1  ;;  %v3329_v16 = vadd.f32 %v3269_v32, %v3130_v59  ;;  %v3134_v32 = vadd.f32 %v8277_v61, %v2935_v0  ;;  %v3332_v41 = vadd.f32 %v8273_v36, %v3133_v26  ;;  %v2941_v6 = vadd.f32 %v8255_v15, %v2742_v12  ;;  %v9043_v59 = vld [vmem:[#allocation9_spill] sm:$0xff] }
 0x28e   : > { %v6336_v29 = vpop.f32.mrf.mxu0  ;;  %v3331_v53 = vadd.f32 %v6356_v23, %v3132_v17 }
 0x28f   : > { %v6368_v20 = vpop.f32.mrf.mxu1  ;;  %v2741_v29 = vadd.f32 %v8245_v34, %v8205_v31  ;;  %v9055_v12 = vld [vmem:[#allocation21_spill] sm:$0xff] }
 0x290   : > { %v8311_v30 = vpop.f32.mrf.mxu0  ;;  %v2937_v20 = vadd.f32 %v8239_v63, %v2738_v2  ;;  %v9050_v26 = vld [vmem:[#allocation22_spill] sm:$0xff] }
 0x291   : > { %v2940_v34 = vadd.f32 %v8247_v50, %v2741_v29 }
 0x292   : > { %v3136_v7 = vadd.f32 %v6328_v57, %v2937_v20  ;;  %v2740_v57 = vadd.f32 %v8257_v42, %v8215_v38  ;;  %v3333_v38 = vadd.f32 %v9041_v58, %v3134_v32  ;;  %v9042_v42 = vld [vmem:[#allocation18_spill] sm:$0xff]  ;;  %v9048_v20 = vld [vmem:[#allocation11_spill] sm:$0xff] }
 0x293   : > { %v6387_v39 = vpop.f32.mrf.mxu0  ;;  %v3139_v54 = vadd.f32 %v8281_v40, %v2940_v34  ;;  %v2944_v29 = vadd.f32 %v9048_v20, %v2745_v60 }
 0x294   : > { %v3529_v9 = vadd.f32 %v6387_v39, %v3330_v27  ;;  %v3335_v50 = vadd.f32 %v8275_v47, %v3136_v7  ;;  %v3137_v47 = vadd.f32 %v9042_v42, %v2938_v28  ;;  %v2939_v39 = vadd.f32 %v9043_v59, %v2740_v57  ;;  %v9051_v7 = vld [vmem:[#allocation5_spill] sm:$0xff]  ;;  %v9058_v42 = vld [vmem:[#allocation15_spill] sm:$0xff] }
 0x295   : > { %v3465_v56 = vpop.f32.mrf.mxu0 }
 0x296   : > { %v3551_v24 = vadd.f32 %v8321_v10, %v3529_v9  ;;  %v3527_v49 = vadd.f32 %v3465_v56, %v3328_v22  ;;  %v9045_v22 = vld [vmem:[#allocation12_spill] sm:$0xff]  ;;  %v9047_v56 = vld [vmem:[#allocation17_spill] sm:$0xff] }
 0x297   : > { %v6388_v4 = vpop.f32.mrf.mxu0  ;;  %v2743_v15 = vadd.f32 %v9045_v22, %v9044_v33  ;;  %v9046_v9 = vld [vmem:[#allocation20_spill] sm:$0xff] }
 0x298   : > { %v3566_v19 = vmax.f32 %v3551_v24, 0.0  ;;  %v3549_v3 = vadd.f32 %v8321_v10, %v3527_v49  ;;  %v3530_v13 = vadd.f32 %v6388_v4, %v3331_v53  ;;  %v3140_v8 = vadd.f32 %v9046_v9, %v2941_v6 }
 0x299   : > { %v3468_v51 = vpop.f32.mrf.mxu0  ;;  %v3338_v53 = vadd.f32 %v9047_v56, %v3139_v54 }
 0x29a   : > { %3581 = vst [vmem:[#allocation4 + $0x10] sm:$0xff] %v3566_v19  ;;  %v3564_v63 = vmax.f32 %v3549_v3, 0.0  ;;  %v3552_v23 = vadd.f32 %v8321_v10, %v3530_v13  ;;  %v3528_v31 = vadd.f32 %v3468_v51, %v3329_v16  ;;  %v9049_v16 = vld [vmem:[#allocation19_spill] sm:$0xff]  ;;  %v3339_v32 = vadd.f32 %v9055_v12, %v3140_v8  ;;  %v6802_v12 = vld [vmem:[%s8967_s5 + $0xd0] sm:$0xff]  }
 0x29b   : > { %v6391_v52 = vpop.f32.mrf.mxu0  ;;  %v3336_v4 = vadd.f32 %v9049_v16, %v3137_v47 }
 0x29c   : > { %3579 = vst [vmem:[#allocation4] sm:$0xff] %v3564_v63  ;;  %v8341_v5 = vmax.f32 %v3552_v23, 0.0  ;;  %v3550_v1 = vadd.f32 %v8321_v10, %v3528_v31  ;;  %v3533_v11 = vadd.f32 %v6391_v52, %v3334_v46  ;;  %v9052_v46 = vld [vmem:[#allocation13_spill] sm:$0xff]  ;;  %v9053_v23 = vld [vmem:[#allocation8_spill] sm:$0xff]  ;;  %v9054_v31 = vld [vmem:[#allocation14_spill] sm:$0xff] }
 0x29d   : > { %v3481_v37 = vpop.f32.mrf.mxu0  ;;  %v2744_v34 = vadd.f32 %v9054_v31, %v9053_v23  ;;  %v9056_v52 = vld [vmem:[#allocation24_spill] sm:$0xff]  ;;  %v6797_v23 = vld [vmem:[%s8967_s5 + $0xa8] sm:$0xff]  }
 0x29e   : > { %3582 = vst [vmem:[#allocation4 + $0x18] sm:$0xff] %v8341_v5  ;;  %v3565_v61 = vmax.f32 %v3550_v1, 0.0  ;;  %v3555_v36 = vadd.f32 %v8321_v10, %v3533_v11  ;;  %v3531_v21 = vadd.f32 %v3481_v37, %v3332_v41  ;;  %v3607_v62 = vpack.c.bf16 %v8341_v5, %v3566_v19  ;;  %v6796_v11 = vld [vmem:[%s8967_s5 + $0xe8] sm:$0xff]  }
 0x29f   : > { %v6392_v44 = vpop.f32.mrf.mxu0  ;;  %v3138_v19 = vadd.f32 %v9050_v26, %v2939_v39  ;;  %v3143_v41 = vadd.f32 %v9056_v52, %v2944_v29  ;;  %v9057_v37 = vld [vmem:[#allocation23_spill] sm:$0xff]  ;;  %v2943_v47 = vadd.f32 %v9058_v42, %v2744_v34  ;;  %v6798_v39 = vld [vmem:[%s8967_s5 + $0xe0] sm:$0xff]  }
 0x2a0   : > { %3580 = vst [vmem:[#allocation4 + $0x8] sm:$0xff] %v3565_v61  ;;  %v8357_v40 = vmax.f32 %v3555_v36, 0.0  ;;  %v3553_v27 = vadd.f32 %v8321_v10, %v3531_v21  ;;  %v3534_v17 = vadd.f32 %v6392_v44, %v3335_v50  ;;  %v3606_v2 = vpack.c.bf16 %v3565_v61, %v3564_v63  ;;  %v9059_v26 = vld [vmem:[#allocation6_spill] sm:$0xff] }
 0x2a1   : > { %v3484_v14 = vpop.f32.mrf.mxu0  ;;  %v2942_v63 = vadd.f32 %v9052_v46, %v2743_v15  ;;  %v3337_v61 = vadd.f32 %v9057_v37, %v3138_v19  ;;  %v3142_v22 = vadd.f32 %v8311_v30, %v2943_v47  ;;  %v6795_v30 = vld [vmem:[%s8967_s5 + $0xb0] sm:$0xff]  }
 0x2a2   : > { %3585 = vst [vmem:[#allocation4 + $0x30] sm:$0xff] %v8357_v40  ;;  %v8369_v35 = vmax.f32 %v3553_v27, 0.0  ;;  %v3556_v24 = vadd.f32 %v8321_v10, %v3534_v17  ;;  %v3532_v49 = vadd.f32 %v3484_v14, %v3333_v38  ;;  %6445 = vmatprep.mubr.bf16.mxu0 %v3606_v2  ;;  %v3317_v14 = vpop.f32.mrf.mxu1 }
 0x2a3   : > { %v6395_v3 = vpop.f32.mrf.mxu0  ;;  %6446 = vmatmul.mubr.bf16.vlgmr.msra.gmra.mxu0 %v3607_v62  ;;  %v3141_v36 = vadd.f32 %v8304_v55, %v2942_v63  ;;  %v3342_v55 = vadd.f32 %v8301_v48, %v3143_v41 }
 0x2a4   : > { %3583 = vst [vmem:[#allocation4 + $0x20] sm:$0xff] %v8369_v35  ;;  %v8376_v13 = vmax.f32 %v3556_v24, 0.0  ;;  %v3554_v0 = vadd.f32 %v8321_v10, %v3532_v49  ;;  %v3537_v18 = vadd.f32 %v6395_v3, %v3338_v53  ;;  %6486 = vmatpush3.bf16.msra.mxu0 %v9051_v7  ;;  %v4637_v51 = vpack.c.bf16 %v8369_v35, %v8341_v5  ;;  %v6840_v5 = vld [vmem:[%s8967_s5 + $0x238] sm:$0xff]  }
 0x2a5   : > { %v3497_v1 = vpop.f32.mrf.mxu0  ;;  %6487 = vmatprep.subr.bf16.mxu0 %v6794_v25  ;;  %v3340_v33 = vadd.f32 %v8307_v45, %v3141_v36  ;;  %v3630_v9 = vld [vmem:[#allocation4 + $0x11] sm:$0xff] }
 0x2a6   : > { %3586 = vst [vmem:[#allocation4 + $0x38] sm:$0xff] %v8376_v13  ;;  %v8391_v28 = vmax.f32 %v3554_v0, 0.0  ;;  %v3559_v57 = vadd.f32 %v8321_v10, %v3537_v18  ;;  %v3535_v50 = vadd.f32 %v3497_v1, %v3336_v4  ;;  %v3609_v54 = vpack.c.bf16 %v8376_v13, %v8357_v40  ;;  %v6800_v18 = vld [vmem:[%s8967_s5 + $0xd8] sm:$0xff]  }
 0x2a7   : > { %v6396_v21 = vpop.f32.mrf.mxu0  ;;  %v3628_v62 = vld [vmem:[#allocation4 + $0x1] sm:$0xff]  ;;  %v3629_v6 = vld [vmem:[#allocation4 + $0x9] sm:$0xff]  ;;  %v3341_v4 = vadd.f32 %v3317_v14, %v3142_v22 }
 0x2a8   : > { %3584 = vst [vmem:[#allocation4 + $0x28] sm:$0xff] %v8391_v28  ;;  %v8399_v43 = vmax.f32 %v3559_v57, 0.0  ;;  %v3557_v60 = vadd.f32 %v8321_v10, %v3535_v50  ;;  %v3538_v58 = vadd.f32 %v6396_v21, %v3339_v32  ;;  %v3640_v38 = vpack.c.bf16 %v3629_v6, %v3628_v62  ;;  %6488 = vmatpush3.bf16.msra.mxu0 %v6794_v25  ;;  %v4097_v21 = vld [vmem:[#allocation4 + $0xc] sm:$0xff] }
 0x2a9   : > { %v3500_v44 = vpop.f32.mrf.mxu0  ;;  %v3608_v27 = vpack.c.bf16 %v8391_v28, %v8369_v35  ;;  %6489 = vmatprep.subr.bf16.mxu0 %v6796_v11  ;;  %v4638_v8 = vpack.c.bf16 %v8357_v40, %v8391_v28  ;;  %v6843_v40 = vld [vmem:[%s8967_s5 + $0x220] sm:$0xff]  }
 0x2aa   : > { %3589 = vst [vmem:[#allocation4 + $0x50] sm:$0xff] %v8399_v43  ;;  %v8407_v17 = vmax.f32 %v3557_v60, 0.0  ;;  %v8410_v2 = vadd.f32 %v8321_v10, %v3538_v58  ;;  %v3536_v59 = vadd.f32 %v3500_v44, %v3337_v61  ;;  %6417 = vmatprep.mubr.bf16.mxu1 %v3640_v38 }
 0x2ab   : > { %v6399_v15 = vpop.f32.mrf.mxu0  ;;  %v8417_v48 = vld [vmem:[#allocation4 + $0x19] sm:$0xff]  ;;  %6449 = vmatprep.mubr.bf16.mxu0 %v3608_v27 }
 0x2ac   : > { %3587 = vst [vmem:[#allocation4 + $0x40] sm:$0xff] %v8407_v17  ;;  %v3575_v25 = vmax.f32 %v8410_v2, 0.0  ;;  %v3558_v56 = vadd.f32 %v8321_v10, %v3536_v59  ;;  %v3541_v53 = vadd.f32 %v6399_v15, %v3342_v55  ;;  %v3641_v45 = vpack.c.bf16 %v8417_v48, %v3630_v9  ;;  %6450 = vmatmul.mubr.bf16.gmra.mxu0 %v3609_v54  ;;  %v6799_v54 = vld [vmem:[%s8967_s5 + $0xa0] sm:$0xff]   ;;  %v4098_v27 = vld [vmem:[#allocation4 + $0x14] sm:$0xff]  ;;  %v6804_v55 = vld [vmem:[%s8967_s5 + $0xc8] sm:$0xff]  }
 0x2ad   : > { %v3513_v24 = vpop.f32.mrf.mxu0  ;;  %6490 = vmatpush3.bf16.msra.mxu0 %v6796_v11  ;;  %v4639_v49 = vpack.c.bf16 %v8407_v17, %v8376_v13  ;;  %v8455_v1 = vld [vmem:[#allocation4 + $0x31] sm:$0xff]  ;;  %v8473_v62 = vld [vmem:[#allocation4 + $0x1a] sm:$0xff] }
 0x2ae   : > { %3590 = vst [vmem:[#allocation4 + $0x58] sm:$0xff] %v3575_v25  ;;  %v8430_v20 = vmax.f32 %v3558_v56, 0.0  ;;  %v3563_v29 = vadd.f32 %v8321_v10, %v3541_v53  ;;  %v3539_v16 = vadd.f32 %v3513_v24, %v3340_v33  ;;  %6418 = vmatmul.mubr.bf16.vlgmr.msra.gmra.mxu1 %v3641_v45  ;;  %6491 = vmatprep.subr.bf16.mxu0 %v6798_v39  ;;  %v8475_v6 = vld [vmem:[#allocation4 + $0x32] sm:$0xff]  ;;  %v6806_v53 = vld [vmem:[%s8967_s5 + $0xc0] sm:$0xff]  }
 0x2af   : > { %6458 = vmatpush3.bf16.msra.mxu1 %v9059_v26  ;;  %v6400_v19 = vpop.f32.mrf.mxu0  ;;  %v8434_v3 = vld [vmem:[#allocation4 + $0x21] sm:$0xff]  ;;  %v8436_v0 = vld [vmem:[#allocation4 + $0x29] sm:$0xff]  ;;  %v6801_v33 = vld [vmem:[%s8967_s5 + $0x98] sm:$0xff]  }
 0x2b0   : > { %3588 = vst [vmem:[#allocation4 + $0x48] sm:$0xff] %v8430_v20  ;;  %v3578_v7 = vmax.f32 %v3563_v29, 0.0  ;;  %v3561_v46 = vadd.f32 %v8321_v10, %v3539_v16  ;;  %6459 = vmatprep.subr.bf16.mxu1 %v6795_v30  ;;  %v3642_v63 = vpack.c.bf16 %v8436_v0, %v8434_v3  ;;  %v3610_v31 = vpack.c.bf16 %v8430_v20, %v8407_v17  ;;  %v8457_v11 = vld [vmem:[#allocation4 + $0x22] sm:$0xff]  ;;  %v8459_v57 = vld [vmem:[#allocation4 + $0x2a] sm:$0xff]  ;;  %v6844_v13 = vld [vmem:[%s8967_s5 + $0x218] sm:$0xff]  }
 0x2b1   : > { %v3516_v34 = vpop.f32.mrf.mxu0  ;;  %6492 = vmatpush3.bf16.msra.mxu0 %v6798_v39  ;;  %v4813_v32 = vpack.c.bf16 %v8434_v3, %v8417_v48  ;;  %v4814_v37 = vpack.c.bf16 %v8455_v1, %v8436_v0  ;;  %v4640_v60 = vpack.c.bf16 %v8399_v43, %v8430_v20  ;;  %v4990_v42 = vpack.c.bf16 %v8475_v6, %v8459_v57  ;;  %v3921_v24 = vld [vmem:[#allocation4 + $0x2] sm:$0xff]  ;;  %v3922_v29 = vld [vmem:[#allocation4 + $0xa] sm:$0xff] }
 0x2b2   : > { %3593 = vst [vmem:[#allocation4 + $0x70] sm:$0x3f] %v3578_v7  ;;  %v3576_v52 = vmax.f32 %v3561_v46, 0.0  ;;  %v3540_v41 = vadd.f32 %v3516_v34, %v3341_v4  ;;  %6421 = vmatprep.mubr.bf16.mxu1 %v3642_v63  ;;  %6453 = vmatprep.mubr.bf16.mxu0 %v3610_v31  ;;  %v4109_v39 = vpack.c.bf16 %v4098_v27, %v4097_v21  ;;  %v6808_v46 = vld [vmem:[%s8967_s5 + $0x178] sm:$0xff]   ;;  %v4100_v63 = vld [vmem:[#allocation4 + $0x24] sm:$0xff]  ;;  %v4101_v31 = vld [vmem:[#allocation4 + $0x2c] sm:$0xff] }
 0x2b3   : > { %6460 = vmatpush3.bf16.msra.mxu1 %v6795_v30  ;;  %v8461_v50 = vld [vmem:[#allocation4 + $0x39] sm:$0xff]  ;;  %6493 = vmatprep.subr.bf16.mxu0 %v6800_v18  ;;  %v3933_v7 = vpack.c.bf16 %v3922_v29, %v3921_v24  ;;  %v6812_v21 = vld [vmem:[%s8967_s5 + $0x168] sm:$0xff]   ;;  %v6811_v29 = vld [vmem:[%s8967_s5 + $0x130] sm:$0xff]  }
 0x2b4   : > { %3591 = vst [vmem:[#allocation4 + $0x60] sm:$0xff] %v3576_v52  ;;  %v8469_v61 = vadd.f32 %v8321_v10, %v3540_v41  ;;  %6461 = vmatprep.subr.bf16.mxu1 %v6797_v23  ;;  %v3643_v36 = vpack.c.bf16 %v8461_v50, %v8455_v1  ;;  %v8479_v38 = vpack.c.bf16 %v3576_v52, %v3575_v25  ;;  %v8512_v45 = vld [vmem:[#allocation4 + $0x3a] sm:$0xff]  ;;  %v6810_v41 = vld [vmem:[%s8967_s5 + $0x170] sm:$0xff]  }
 0x2b5   : > { %v3605_v58 = vld [vmem:[#allocation4 + $0x58] sm:$0xf]  ;;  %6494 = vmatpush3.bf16.msra.mxu0 %v6800_v18  ;;  %v4989_v10 = vpack.c.bf16 %v8457_v11, %v8473_v62  ;;  %v6803_v18 = vld [vmem:[%s8967_s5 + $0x90] sm:$0xff]   ;;  %v4099_v34 = vld [vmem:[#allocation4 + $0x1c] sm:$0xff] }
 0x2b6   : > { %v3577_v47 = vmax.f32 %v8469_v61, 0.0  ;;  %6422 = vmatmul.mubr.bf16.gmra.mxu1 %v3643_v36  ;;  %v3611_v44 = vpack.c.bf16 %v3605_v58, %v8399_v43  ;;  %6495 = vmatprep.subr.bf16.mxu0 %v6802_v12  ;;  %v8501_v15 = vld [vmem:[#allocation4 + $0x51] sm:$0xff]  ;;  %v3639_v56 = vld [vmem:[#allocation4 + $0x59] sm:$0xf]  ;;  %v6807_v36 = vld [vmem:[%s8967_s5 + $0x80] sm:$0xff]  }
 0x2b7   : > { %6462 = vmatpush3.bf16.msra.mxu1 %v6797_v23  ;;  %v8490_v2 = vld [vmem:[#allocation4 + $0x41] sm:$0xff]  ;;  %v8492_v59 = vld [vmem:[#allocation4 + $0x49] sm:$0xff]  ;;  %v8516_v16 = vld [vmem:[#allocation4 + $0x52] sm:$0xff]  ;;  %v3645_v19 = vpack.c.bf16 %v3639_v56, %v8501_v15 }
 0x2b8   : > { %3592 = vst [vmem:[#allocation4 + $0x68] sm:$0xff] %v3577_v47  ;;  %6463 = vmatprep.subr.bf16.mxu1 %v6799_v54  ;;  %v3644_v22 = vpack.c.bf16 %v8492_v59, %v8490_v2  ;;  %6454 = vmatmul.mubr.bf16.gmra.mxu0 %v3611_v44  ;;  %v8503_v9 = vld [vmem:[#allocation4 + $0x42] sm:$0xff]  ;;  %v8505_v14 = vld [vmem:[#allocation4 + $0x4a] sm:$0xff]  ;;  %v4815_v25 = vpack.c.bf16 %v8490_v2, %v8461_v50  ;;  %v4102_v52 = vld [vmem:[#allocation4 + $0x34] sm:$0xff] }
 0x2b9   : > { %6501 = vmatprep.mubr.bf16.mxu0 %v4109_v39  ;;  %6496 = vmatpush3.bf16.msra.mxu0 %v6802_v12  ;;  %v4816_v30 = vpack.c.bf16 %v8501_v15, %v8492_v59  ;;  %v4991_v4 = vpack.c.bf16 %v8503_v9, %v8512_v45  ;;  %v4992_v26 = vpack.c.bf16 %v8516_v16, %v8505_v14  ;;  %v6805_v23 = vld [vmem:[%s8967_s5 + $0x88] sm:$0xff]   ;;  %v6809_v44 = vld [vmem:[%s8967_s5 + $0x138] sm:$0xff]   ;;  %v6838_v48 = vld [vmem:[%s8967_s5 + $0x1c0] sm:$0xff]  }
 0x2ba   : > { %6425 = vmatprep.mubr.bf16.mxu1 %v3644_v22  ;;  %6497 = vmatprep.subr.bf16.mxu0 %v6804_v55  ;;  %v4110_v12 = vpack.c.bf16 %v4100_v63, %v4099_v34  ;;  %v4104_v58 = vld [vmem:[#allocation4 + $0x44] sm:$0xff]  ;;  %v4105_v27 = vld [vmem:[#allocation4 + $0x4c] sm:$0xff]  ;;  %v4450_v34 = vld [vmem:[#allocation4 + $0x16] sm:$0xff] }
 0x2bb   : > { %6464 = vmatpush3.bf16.msra.mxu1 %v6799_v54  ;;  %v4111_v54 = vpack.c.bf16 %v4102_v52, %v4101_v31  ;;  %v6814_v22 = vld [vmem:[%s8967_s5 + $0x160] sm:$0xff]   ;;  %v3923_v56 = vld [vmem:[#allocation4 + $0x12] sm:$0xff]  ;;  %v6813_v63 = vld [vmem:[%s8967_s5 + $0x128] sm:$0xff]  }
 0x2bc   : > { %6465 = vmatprep.subr.bf16.mxu1 %v6801_v33  ;;  %v3934_v24 = vpack.c.bf16 %v8473_v62, %v3923_v56  ;;  %v4283_v3 = vld [vmem:[#allocation4 + $0x5d] sm:$0xff]  ;;  %v6841_v0 = vld [vmem:[%s8967_s5 + $0x230] sm:$0xff]   ;;  %v6842_v50 = vld [vmem:[%s8967_s5 + $0x228] sm:$0xff]  }
 0x2bd   : > { %6498 = vmatpush3.bf16.msra.mxu0 %v6804_v55  ;;  %v4103_v55 = vld [vmem:[#allocation4 + $0x3c] sm:$0xff]  ;;  %v4636_v28 = vld [vmem:[#allocation4 + $0x70] sm:$0xf]  ;;  %v6846_v43 = vld [vmem:[%s8967_s5 + $0x208] sm:$0xff]  }
 0x2be   : > { %6426 = vmatmul.mubr.bf16.gmra.mxu1 %v3645_v19  ;;  %6499 = vmatprep.subr.bf16.mxu0 %v6806_v53  ;;  %v4112_v39 = vpack.c.bf16 %v4104_v58, %v4103_v55  ;;  %v3935_v19 = vpack.c.bf16 %v8459_v57, %v8457_v11  ;;  %v6817_v58 = vld [vmem:[%s8967_s5 + $0x118] sm:$0xff]   ;;  %v6822_v55 = vld [vmem:[%s8967_s5 + $0x140] sm:$0xff]   ;;  %v4642_v17 = vpack.c.bf16 %v4636_v28, %v3577_v47 }
 0x2bf   : > { %6466 = vmatpush3.bf16.msra.mxu1 %v6801_v33  ;;  %6473 = vmatprep.mubr.bf16.mxu1 %v3933_v7  ;;  %v4106_v33 = vld [vmem:[#allocation4 + $0x54] sm:$0xff]  ;;  %v4107_v7 = vld [vmem:[#allocation4 + $0x5c] sm:$0xff]  ;;  %v4811_v1 = vld [vmem:[#allocation4 + $0x69] sm:$0xff] }
 0x2c0   : > { %6467 = vmatprep.subr.bf16.mxu1 %v6803_v18  ;;  %v4810_v35 = vld [vmem:[#allocation4 + $0x61] sm:$0xff]  ;;  %v4987_v62 = vld [vmem:[#allocation4 + $0x6a] sm:$0xff] }
 0x2c1   : > { %6500 = vmatpush3.bf16.msra.mxu0 %v6806_v53  ;;  %v4113_v53 = vpack.c.bf16 %v4106_v33, %v4105_v27  ;;  %v4273_v27 = vld [vmem:[#allocation4 + $0xd] sm:$0xff]  ;;  %v4274_v33 = vld [vmem:[#allocation4 + $0x15] sm:$0xff]  ;;  %v4986_v20 = vld [vmem:[#allocation4 + $0x62] sm:$0xff] }
 0x2c2   : > { %6541 = vmatprep.subr.bf16.mxu0 %v6808_v46  ;;  %v4285_v56 = vpack.c.bf16 %v4274_v33, %v4273_v27  ;;  %v6830_v27 = vld [vmem:[%s8967_s5 + $0x1e0] sm:$0xff]  }
 0x2c3   : > { %6468 = vmatpush3.bf16.msra.mxu1 %v6803_v18  ;;  %v6816_v18 = vld [vmem:[%s8967_s5 + $0x158] sm:$0xff]  }
 0x2c4   : > { %6469 = vmatprep.subr.bf16.mxu1 %v6805_v23  ;;  %6502 = vmatmul.mubr.bf16.vlgmr.msra.gmra.mxu0 %v4110_v12  ;;  %v6818_v12 = vld [vmem:[%s8967_s5 + $0x150] sm:$0xff]   ;;  %v4985_v11 = vld [vmem:[#allocation4 + $0x5a] sm:$0xff] }
 0x2c5   : > { %6505 = vmatprep.mubr.bf16.mxu0 %v4111_v54  ;;  %6542 = vmatpush3.bf16.msra.mxu0 %v6808_v46  ;;  %v4108_v46 = vld [vmem:[#allocation4 + $0x64] sm:$0xf]  ;;  %v4993_v61 = vpack.c.bf16 %v4986_v20, %v4985_v11 }
 0x2c6   : > { %6543 = vmatprep.subr.bf16.mxu0 %v6810_v41  ;;  %v4114_v31 = vpack.c.bf16 %v4108_v46, %v4107_v7  ;;  %v6815_v54 = vld [vmem:[%s8967_s5 + $0x120] sm:$0xff]   ;;  %v4454_v46 = vld [vmem:[#allocation4 + $0x36] sm:$0xff] }
 0x2c7   : > { %6470 = vmatpush3.bf16.msra.mxu1 %v6805_v23  ;;  %v4449_v23 = vld [vmem:[#allocation4 + $0xe] sm:$0xff] }
 0x2c8   : > { %6471 = vmatprep.subr.bf16.mxu1 %v6807_v36  ;;  %v4461_v52 = vpack.c.bf16 %v4450_v34, %v4449_v23  ;;  %v6828_v34 = vld [vmem:[%s8967_s5 + $0x1e8] sm:$0xff]  }
 0x2c9   : > { %6544 = vmatpush3.bf16.msra.mxu0 %v6810_v41  ;;  %v3936_v41 = vpack.c.bf16 %v8512_v45, %v8475_v6 }
 0x2ca   : > { %6545 = vmatprep.subr.bf16.mxu0 %v6812_v21 }
 0x2cb   : > { %6472 = vmatpush3.bf16.msra.mxu1 %v6807_v36  ;;  %v3937_v36 = vpack.c.bf16 %v8505_v14, %v8503_v9 }
 0x2cc   : > { %6513 = vmatprep.subr.bf16.mxu1 %v6809_v44  ;;  %6506 = vmatmul.mubr.bf16.gmra.mxu0 %v4112_v39 }
 0x2cd   : > { %6509 = vmatprep.mubr.bf16.mxu0 %v4113_v53  ;;  %6546 = vmatpush3.bf16.msra.mxu0 %v6812_v21  ;;  %v6820_v21 = vld [vmem:[%s8967_s5 + $0x148] sm:$0xff]   ;;  %v6824_v53 = vld [vmem:[%s8967_s5 + $0x1f8] sm:$0xff]  }
 0x2ce   : > { %6474 = vmatmul.mubr.bf16.vlgmr.msra.gmra.mxu1 %v3934_v24  ;;  %6547 = vmatprep.subr.bf16.mxu0 %v6814_v22  ;;  %v4452_v24 = vld [vmem:[#allocation4 + $0x26] sm:$0xff] }
 0x2cf   : > { %6477 = vmatprep.mubr.bf16.mxu1 %v3935_v19  ;;  %6514 = vmatpush3.bf16.msra.mxu1 %v6809_v44  ;;  %v3932_v44 = vld [vmem:[#allocation4 + $0x5a] sm:$0xf]  ;;  %v4453_v19 = vld [vmem:[#allocation4 + $0x2e] sm:$0xff] }
 0x2d0   : > { %6515 = vmatprep.subr.bf16.mxu1 %v6811_v29  ;;  %v3938_v39 = vpack.c.bf16 %v3932_v44, %v8516_v16  ;;  %v4463_v23 = vpack.c.bf16 %v4454_v46, %v4453_v19  ;;  %v4458_v44 = vld [vmem:[#allocation4 + $0x56] sm:$0xff]  ;;  %v6829_v19 = vld [vmem:[%s8967_s5 + $0x1a8] sm:$0xff]  }
 0x2d1   : > { %6548 = vmatpush3.bf16.msra.mxu0 %v6814_v22  ;;  %v6819_v22 = vld [vmem:[%s8967_s5 + $0x110] sm:$0xff]  }
 0x2d2   : > { %6549 = vmatprep.subr.bf16.mxu0 %v6816_v18  ;;  %v4281_v46 = vld [vmem:[#allocation4 + $0x4d] sm:$0xff] }
 0x2d3   : > { %6516 = vmatpush3.bf16.msra.mxu1 %v6811_v29  ;;  %v6821_v29 = vld [vmem:[%s8967_s5 + $0x108] sm:$0xff]  }
 0x2d4   : > { %6517 = vmatprep.subr.bf16.mxu1 %v6813_v63  ;;  %6510 = vmatmul.mubr.bf16.gmra.mxu0 %v4114_v31  ;;  %v6823_v31 = vld [vmem:[%s8967_s5 + $0x100] sm:$0xff]  }
 0x2d5   : > { %6550 = vmatpush3.bf16.msra.mxu0 %v6816_v18  ;;  %6557 = vmatprep.mubr.bf16.mxu0 %v4461_v52  ;;  %v4451_v18 = vld [vmem:[#allocation4 + $0x1e] sm:$0xff] }
 0x2d6   : > { %6478 = vmatmul.mubr.bf16.gmra.mxu1 %v3936_v41  ;;  %6551 = vmatprep.subr.bf16.mxu0 %v6818_v12  ;;  %v4462_v7 = vpack.c.bf16 %v4452_v24, %v4451_v18  ;;  %v6825_v52 = vld [vmem:[%s8967_s5 + $0x1b8] sm:$0xff]   ;;  %v4457_v41 = vld [vmem:[#allocation4 + $0x4e] sm:$0xff]  ;;  %v4280_v18 = vld [vmem:[#allocation4 + $0x45] sm:$0xff] }
 0x2d7   : > { %6481 = vmatprep.mubr.bf16.mxu1 %v3937_v36  ;;  %6518 = vmatpush3.bf16.msra.mxu1 %v6813_v63  ;;  %v6826_v63 = vld [vmem:[%s8967_s5 + $0x1f0] sm:$0xff]   ;;  %v4455_v36 = vld [vmem:[#allocation4 + $0x3e] sm:$0xff] }
 0x2d8   : > { %6519 = vmatprep.subr.bf16.mxu1 %v6815_v54  ;;  %v6832_v24 = vld [vmem:[%s8967_s5 + $0x1d8] sm:$0xff]  }
 0x2d9   : > { %6552 = vmatpush3.bf16.msra.mxu0 %v6818_v12  ;;  %v4456_v12 = vld [vmem:[#allocation4 + $0x46] sm:$0xff] }
 0x2da   : > { %6553 = vmatprep.subr.bf16.mxu0 %v6820_v21 }
 0x2db   : > { %6520 = vmatpush3.bf16.msra.mxu1 %v6815_v54  ;;  %v4276_v54 = vld [vmem:[#allocation4 + $0x25] sm:$0xff] }
 0x2dc   : > { %6521 = vmatprep.subr.bf16.mxu1 %v6817_v58 }
 0x2dd   : > { %6554 = vmatpush3.bf16.msra.mxu0 %v6820_v21  ;;  %v4277_v21 = vld [vmem:[#allocation4 + $0x2d] sm:$0xff] }
 0x2de   : > { %6482 = vmatmul.mubr.bf16.gmra.mxu1 %v3938_v39  ;;  %6555 = vmatprep.subr.bf16.mxu0 %v6822_v55  ;;  %v4465_v39 = vpack.c.bf16 %v4458_v44, %v4457_v41  ;;  %v6837_v44 = vld [vmem:[%s8967_s5 + $0x188] sm:$0xff]  }
 0x2df   : > { %6522 = vmatpush3.bf16.msra.mxu1 %v6817_v58  ;;  %6529 = vmatprep.mubr.bf16.mxu1 %v4285_v56  ;;  %v4464_v58 = vpack.c.bf16 %v4456_v12, %v4455_v36  ;;  %v6827_v56 = vld [vmem:[%s8967_s5 + $0x1b0] sm:$0xff]   ;;  %v6833_v36 = vld [vmem:[%s8967_s5 + $0x198] sm:$0xff]  }
 0x2e0   : > { %6523 = vmatprep.subr.bf16.mxu1 %v6819_v22  ;;  %v4282_v12 = vld [vmem:[#allocation4 + $0x55] sm:$0xff] }
 0x2e1   : > { %6556 = vmatpush3.bf16.msra.mxu0 %v6822_v55  ;;  %v4275_v55 = vld [vmem:[#allocation4 + $0x1d] sm:$0xff]  ;;  %v4289_v41 = vpack.c.bf16 %v4282_v12, %v4281_v46 }
 0x2e2   : > { %6597 = vmatprep.subr.bf16.mxu0 %v6824_v53  ;;  %v4286_v33 = vpack.c.bf16 %v4276_v54, %v4275_v55  ;;  %v6836_v54 = vld [vmem:[%s8967_s5 + $0x1c8] sm:$0xff]  }
 0x2e3   : > { %6524 = vmatpush3.bf16.msra.mxu1 %v6819_v22  ;;  %v4278_v22 = vld [vmem:[#allocation4 + $0x35] sm:$0xff] }
 0x2e4   : > { %6525 = vmatprep.subr.bf16.mxu1 %v6821_v29  ;;  %6558 = vmatmul.mubr.bf16.vlgmr.msra.gmra.mxu0 %v4462_v7  ;;  %v4459_v7 = vld [vmem:[#allocation4 + $0x5e] sm:$0xff] }
 0x2e5   : > { %6561 = vmatprep.mubr.bf16.mxu0 %v4463_v23  ;;  %6598 = vmatpush3.bf16.msra.mxu0 %v6824_v53  ;;  %v4287_v53 = vpack.c.bf16 %v4278_v22, %v4277_v21  ;;  %v6834_v23 = vld [vmem:[%s8967_s5 + $0x1d0] sm:$0xff]   ;;  %v4284_v21 = vld [vmem:[#allocation4 + $0x65] sm:$0xf] }
 0x2e6   : > { %6599 = vmatprep.subr.bf16.mxu0 %v6826_v63 }
 0x2e7   : > { %6526 = vmatpush3.bf16.msra.mxu1 %v6821_v29  ;;  %v4460_v29 = vld [vmem:[#allocation4 + $0x66] sm:$0xf] }
 0x2e8   : > { %6527 = vmatprep.subr.bf16.mxu1 %v6823_v31 }
 0x2e9   : > { %6600 = vmatpush3.bf16.msra.mxu0 %v6826_v63  ;;  %v4466_v63 = vpack.c.bf16 %v4460_v29, %v4459_v7 }
 0x2ea   : > { %6601 = vmatprep.subr.bf16.mxu0 %v6828_v34 }
 0x2eb   : > { %6528 = vmatpush3.bf16.msra.mxu1 %v6823_v31  ;;  %v4279_v31 = vld [vmem:[#allocation4 + $0x3d] sm:$0xff] }
 0x2ec   : > { %6569 = vmatprep.subr.bf16.mxu1 %v6825_v52  ;;  %6562 = vmatmul.mubr.bf16.gmra.mxu0 %v4464_v58  ;;  %v6835_v58 = vld [vmem:[%s8967_s5 + $0x190] sm:$0xff]  }
 0x2ed   : > { %6565 = vmatprep.mubr.bf16.mxu0 %v4465_v39  ;;  %6602 = vmatpush3.bf16.msra.mxu0 %v6828_v34  ;;  %v4288_v34 = vpack.c.bf16 %v4280_v18, %v4279_v31 }
 0x2ee   : > { %6530 = vmatmul.mubr.bf16.vlgmr.msra.gmra.mxu1 %v4286_v33  ;;  %6603 = vmatprep.subr.bf16.mxu0 %v6830_v27 }
 0x2ef   : > { %6533 = vmatprep.mubr.bf16.mxu1 %v4287_v53  ;;  %6570 = vmatpush3.bf16.msra.mxu1 %v6825_v52  ;;  %v6831_v52 = vld [vmem:[%s8967_s5 + $0x1a0] sm:$0xff]  }
 0x2f0   : > { %6571 = vmatprep.subr.bf16.mxu1 %v6827_v56 }
 0x2f1   : > { %6604 = vmatpush3.bf16.msra.mxu0 %v6830_v27  ;;  %v6839_v27 = vld [vmem:[%s8967_s5 + $0x180] sm:$0xff]  }
 0x2f2   : > { %6605 = vmatprep.subr.bf16.mxu0 %v6832_v24 }
 0x2f3   : > { %6572 = vmatpush3.bf16.msra.mxu1 %v6827_v56 }
 0x2f4   : > { %6573 = vmatprep.subr.bf16.mxu1 %v6829_v19  ;;  %6566 = vmatmul.mubr.bf16.gmra.mxu0 %v4466_v63 }
 0x2f5   : > { %6606 = vmatpush3.bf16.msra.mxu0 %v6832_v24  ;;  %6613 = vmatprep.mubr.bf16.mxu0 %v4813_v32  ;;  %v4290_v32 = vpack.c.bf16 %v4284_v21, %v4283_v3 }
 0x2f6   : > { %6534 = vmatmul.mubr.bf16.gmra.mxu1 %v4288_v34  ;;  %6607 = vmatprep.subr.bf16.mxu0 %v6834_v23 }
 0x2f7   : > { %6537 = vmatprep.mubr.bf16.mxu1 %v4289_v41  ;;  %6574 = vmatpush3.bf16.msra.mxu1 %v6829_v19 }
 0x2f8   : > { %6575 = vmatprep.subr.bf16.mxu1 %v6831_v52 }
 0x2f9   : > { %6608 = vmatpush3.bf16.msra.mxu0 %v6834_v23 }
 0x2fa   : > { %6609 = vmatprep.subr.bf16.mxu0 %v6836_v54 }
 0x2fb   : > { %6576 = vmatpush3.bf16.msra.mxu1 %v6831_v52 }
 0x2fc   : > { %6577 = vmatprep.subr.bf16.mxu1 %v6833_v36 }
 0x2fd   : > { %6610 = vmatpush3.bf16.msra.mxu0 %v6836_v54 }
 0x2fe   : > { %6538 = vmatmul.mubr.bf16.gmra.mxu1 %v4290_v32  ;;  %6611 = vmatprep.subr.bf16.mxu0 %v6838_v48 }
 0x2ff   : > { %6578 = vmatpush3.bf16.msra.mxu1 %v6833_v36  ;;  %6585 = vmatprep.mubr.bf16.mxu1 %v4637_v51  ;;  %v4809_v51 = vld [vmem:[#allocation4 + $0x59] sm:$0xff] }
 0x300   : > { %6579 = vmatprep.subr.bf16.mxu1 %v6835_v58  ;;  %v4817_v55 = vpack.c.bf16 %v4810_v35, %v4809_v51 }
 0x301   : > { %6612 = vmatpush3.bf16.msra.mxu0 %v6838_v48 }
 0x303   : > { %6580 = vmatpush3.bf16.msra.mxu1 %v6835_v58 }
 0x304   : > { %6581 = vmatprep.subr.bf16.mxu1 %v6837_v44  ;;  %6614 = vmatmul.mubr.bf16.vlgmr.msra.gmra.mxu0 %v4814_v37  ;;  %v4812_v37 = vld [vmem:[#allocation4 + $0x71] sm:$0xf] }
 0x305   : > { %6617 = vmatprep.mubr.bf16.mxu0 %v4815_v25  ;;  %v4818_v2 = vpack.c.bf16 %v4812_v37, %v4811_v1 }
 0x307   : > { %6582 = vmatpush3.bf16.msra.mxu1 %v6837_v44 }
 0x308   : > { %6583 = vmatprep.subr.bf16.mxu1 %v6839_v27 }
 0x30b   : > { %6584 = vmatpush3.bf16.msra.mxu1 %v6839_v27 }
 0x30c   : > { %6625 = vmatprep.subr.bf16.mxu1 %v6840_v5  ;;  %6618 = vmatmul.mubr.bf16.gmra.mxu0 %v4816_v30 }
 0x30d   : > { %6621 = vmatprep.mubr.bf16.mxu0 %v4817_v55 }
 0x30e   : > { %6586 = vmatmul.mubr.bf16.vlgmr.msra.gmra.mxu1 %v4638_v8  ;;  %v6845_v8 = vld [vmem:[%s8967_s5 + $0x210] sm:$0xff]  }
 0x30f   : > { %6589 = vmatprep.mubr.bf16.mxu1 %v4639_v49  ;;  %6626 = vmatpush3.bf16.msra.mxu1 %v6840_v5  ;;  %v6847_v49 = vld [vmem:[%s8967_s5 + $0x200] sm:$0xff]  }
 0x310   : > { %6627 = vmatprep.subr.bf16.mxu1 %v6841_v0 }
 0x313   : > { %6628 = vmatpush3.bf16.msra.mxu1 %v6841_v0 }
 0x314   : > { %6629 = vmatprep.subr.bf16.mxu1 %v6842_v50  ;;  %6622 = vmatmul.mubr.bf16.gmra.mxu0 %v4818_v2 }
 0x316   : > { %6590 = vmatmul.mubr.bf16.gmra.mxu1 %v4640_v60  ;;  %v4988_v60 = vld [vmem:[#allocation4 + $0x72] sm:$0xf] }
 0x317   : > { %6593 = vmatprep.mubr.bf16.mxu1 %v8479_v38  ;;  %6630 = vmatpush3.bf16.msra.mxu1 %v6842_v50  ;;  %v4994_v38 = vpack.c.bf16 %v4988_v60, %v4987_v62 }
 0x318   : > { %6631 = vmatprep.subr.bf16.mxu1 %v6843_v40 }
 0x31b   : > { %6632 = vmatpush3.bf16.msra.mxu1 %v6843_v40 }
 0x31c   : > { %6633 = vmatprep.subr.bf16.mxu1 %v6844_v13 }
 0x31e   : > { %6594 = vmatmul.mubr.bf16.gmra.mxu1 %v4642_v17 }
 0x31f   : > { %6634 = vmatpush3.bf16.msra.mxu1 %v6844_v13  ;;  %6641 = vmatprep.mubr.bf16.mxu1 %v4989_v10 }
 0x320   : > { %6635 = vmatprep.subr.bf16.mxu1 %v6845_v8 }
 0x323   : > { %6636 = vmatpush3.bf16.msra.mxu1 %v6845_v8 }
 0x324   : > { %6637 = vmatprep.subr.bf16.mxu1 %v6846_v43 }
 0x327   : > { %6638 = vmatpush3.bf16.msra.mxu1 %v6846_v43 }
 0x328   : > { %6639 = vmatprep.subr.bf16.mxu1 %v6847_v49 }
 0x32b   : > { %6640 = vmatpush3.bf16.msra.mxu1 %v6847_v49 }
 0x32e   : > { %6642 = vmatmul.mubr.bf16.vlgmr.msra.gmra.mxu1 %v4990_v42 }
 0x32f   : > { %6645 = vmatprep.mubr.bf16.mxu1 %v4991_v4 }
 0x336   : > { %6646 = vmatmul.mubr.bf16.gmra.mxu1 %v4992_v26 }
 0x337   : > { %6649 = vmatprep.mubr.bf16.mxu1 %v4993_v61 }
 0x33e   : > { %6650 = vmatmul.mubr.bf16.gmra.mxu1 %v4994_v38 }
 0x363   : > { %v8699_v10 = vpop.f32.mrf.mxu0 }
 0x365   : > { %v8701_v57 = vpop.f32.mrf.mxu0 }
 0x367   : > { %v8703_v6 = vpop.f32.mrf.mxu0 }
 0x369   : > { %v8705_v42 = vpop.f32.mrf.mxu0 }
 0x36c   : > { %v8707_v47 = vpop.f32.mrf.mxu0 }
 0x36e   : > { %v8709_v59 = vpop.f32.mrf.mxu1  ;;  %v8711_v15 = vpop.f32.mrf.mxu0 }
 0x370   : > { %v8713_v9 = vpop.f32.mrf.mxu1  ;;  %v8717_v25 = vpop.f32.mrf.mxu0 }
 0x372   : > { %v8715_v14 = vpop.f32.mrf.mxu1  ;;  %v8723_v16 = vpop.f32.mrf.mxu0 }
 0x374   : > { %v8719_v45 = vpop.f32.mrf.mxu1 }
 0x376   : > { %v8721_v30 = vpop.f32.mrf.mxu1 }
 0x378   : > { %v8725_v4 = vpop.f32.mrf.mxu1  ;;  %v8727_v26 = vpop.f32.mrf.mxu0 }
 0x37a   : > { %v8729_v39 = vpop.f32.mrf.mxu1  ;;  %v8731_v33 = vpop.f32.mrf.mxu0 }
 0x37c   : > { %v8733_v22 = vpop.f32.mrf.mxu1  ;;  %v8735_v56 = vpop.f32.mrf.mxu0 }
 0x37e   : > { %v8737_v53 = vpop.f32.mrf.mxu1  ;;  %v8739_v24 = vpop.f32.mrf.mxu0 }
 0x37f   : > { %9060 = vst [vmem:[#allocation10_spill] sm:$0xff] %v8739_v24 }
 0x380   : > { %v8741_v29 = vpop.f32.mrf.mxu1 }
 0x382   : > { %v8747_v7 = vpop.f32.mrf.mxu1 }
 0x384   : > { %v8743_v19 = vpop.f32.mrf.mxu0  ;;  %v8753_v23 = vpop.f32.mrf.mxu1 }
 0x386   : > { %v8745_v18 = vpop.f32.mrf.mxu0 }
 0x388   : > { %v8749_v46 = vpop.f32.mrf.mxu0 }
 0x38a   : > { %v8751_v63 = vpop.f32.mrf.mxu0 }
 0x38c   : > { %v8755_v31 = vpop.f32.mrf.mxu0 }
 0x38e   : > { %v6475_v34 = vpop.f32.mrf.mxu1  ;;  %v8757_v12 = vpop.f32.mrf.mxu0 }
 0x390   : > { %v4038_v52 = vpop.f32.mrf.mxu1  ;;  %v8759_v54 = vpop.f32.mrf.mxu0 }
 0x392   : > { %v6476_v41 = vpop.f32.mrf.mxu1  ;;  %v8763_v48 = vpop.f32.mrf.mxu0 }
 0x393   : > { %9061 = vst [vmem:[#allocation16_spill] sm:$0xff] %v8763_v48 }
 0x394   : > { %v4041_v36 = vpop.f32.mrf.mxu1  ;;  %v8769_v58 = vpop.f32.mrf.mxu0 }
 0x395   : > { %9062 = vst [vmem:[#allocation18_spill] sm:$0xff] %v8769_v58 }
 0x396   : > { %v8761_v21 = vpop.f32.mrf.mxu1  ;;  %v8773_v27 = vpop.f32.mrf.mxu0 }
 0x397   : > { %9063 = vst [vmem:[#allocation9_spill] sm:$0xff] %v8773_v27 }
 0x398   : > { %v8765_v3 = vpop.f32.mrf.mxu1  ;;  %v8777_v35 = vpop.f32.mrf.mxu0 }
 0x399   : > { %9064 = vst [vmem:[#allocation7_spill] sm:$0xff] %v8777_v35 }
 0x39a   : > { %v8767_v32 = vpop.f32.mrf.mxu1  ;;  %v8781_v55 = vpop.f32.mrf.mxu0 }
 0x39b   : > { %9065 = vst [vmem:[#allocation12_spill] sm:$0xff] %v8781_v55 }
 0x39c   : > { %v8771_v44 = vpop.f32.mrf.mxu1 }
 0x39e   : > { %v8775_v5 = vpop.f32.mrf.mxu1 }
 0x3a0   : > { %v8779_v51 = vpop.f32.mrf.mxu1 }
 0x3a2   : > { %v8783_v0 = vpop.f32.mrf.mxu1 }
 0x3a3   : > { %9066 = vst [vmem:[#allocation20_spill] sm:$0xff] %v8783_v0 }
 0x3a4   : > { %v6559_v1 = vpop.f32.mrf.mxu0  ;;  %v8785_v50 = vpop.f32.mrf.mxu1 }
 0x3a5   : > { %9067 = vst [vmem:[#allocation17_spill] sm:$0xff] %v8785_v50 }
 0x3a6   : > { %v8787_v37 = vpop.f32.mrf.mxu0 }
 0x3a8   : > { %v8789_v40 = vpop.f32.mrf.mxu0 }
 0x3aa   : > { %v8791_v17 = vpop.f32.mrf.mxu0 }
 0x3ac   : > { %v8793_v49 = vpop.f32.mrf.mxu0 }
 0x3ad   : > { %9068 = vst [vmem:[#allocation11_spill] sm:$0xff] %v8793_v49 }
 0x3ae   : > { %v6531_v2 = vpop.f32.mrf.mxu1  ;;  %v8799_v61 = vpop.f32.mrf.mxu0 }
 0x3af   : > { %9070 = vst [vmem:[#allocation22_spill] sm:$0xff] %v8799_v61 }
 0x3b0   : > { %v4390_v13 = vpop.f32.mrf.mxu1  ;;  %v8803_v60 = vpop.f32.mrf.mxu0 }
 0x3b1   : > { %9072 = vst [vmem:[#allocation13_spill] sm:$0xff] %v8803_v60 }
 0x3b2   : > { %v6532_v28 = vpop.f32.mrf.mxu1  ;;  %v8807_v55 = vpop.f32.mrf.mxu0 }
 0x3b3   : > { %9074 = vst [vmem:[#allocation14_spill] sm:$0xff] %v8807_v55 }
 0x3b4   : > { %v4393_v8 = vpop.f32.mrf.mxu1  ;;  %v8811_v50 = vpop.f32.mrf.mxu0 }
 0x3b5   : > { %9076 = vst [vmem:[#allocation24_spill] sm:$0xff] %v8811_v50 }
 0x3b6   : > { %v6535_v43 = vpop.f32.mrf.mxu1  ;;  %v8815_v0 = vpop.f32.mrf.mxu0 }
 0x3b7   : > { %9078 = vst [vmem:[#allocation15_spill] sm:$0xff] %v8815_v0  ;;  %v3883_v0 = vadd.f32 %v8699_v10, %v8709_v59  ;;  %v3899_v59 = vadd.f32 %v8707_v47, %v8721_v30 }
 0x3b8   : > { %v8795_v20 = vpop.f32.mrf.mxu1  ;;  %v8819_v61 = vpop.f32.mrf.mxu0 }
 0x3b9   : > { %9080 = vst [vmem:[#allocation25_spill] sm:$0xff] %v8819_v61  ;;  %v3875_v61 = vadd.f32 %v8701_v57, %v8713_v9 }
 0x3ba   : > { %v8797_v11 = vpop.f32.mrf.mxu1  ;;  %v8821_v60 = vpop.f32.mrf.mxu0 }
 0x3bb   : > { %9069 = vst [vmem:[#allocation19_spill] sm:$0xff] %v8797_v11  ;;  %9081 = vst [vmem:[#allocation26_spill] sm:$0xff] %v8821_v60  ;;  %v4087_v60 = vadd.f32 %v6475_v34, %v3883_v0 }
 0x3bc   : > { %v8801_v62 = vpop.f32.mrf.mxu1 }
 0x3bd   : > { %9071 = vst [vmem:[#allocation5_spill] sm:$0xff] %v8801_v62  ;;  %v4263_v10 = vadd.f32 %v8743_v19, %v4087_v60  ;;  %v3902_v19 = vadd.f32 %v8717_v25, %v8729_v39  ;;  %v3915_v25 = vadd.f32 %v8727_v26, %v8737_v53  ;;  %v3918_v26 = vadd.f32 %v8735_v56, %v8747_v7  ;;  %v9091_v7 = vld [vmem:[#allocation11_spill] sm:$0xff] }
 0x3be   : > { %v8805_v38 = vpop.f32.mrf.mxu1 }
 0x3bf   : > { %9073 = vst [vmem:[#allocation8_spill] sm:$0xff] %v8805_v38  ;;  %v4439_v9 = vadd.f32 %v6531_v2, %v4263_v10 }
 0x3c0   : > { %v8809_v35 = vpop.f32.mrf.mxu1 }
 0x3c1   : > { %9075 = vst [vmem:[#allocation21_spill] sm:$0xff] %v8809_v35 }
 0x3c2   : > { %v8813_v27 = vpop.f32.mrf.mxu1 }
 0x3c3   : > { %9077 = vst [vmem:[#allocation23_spill] sm:$0xff] %v8813_v27 }
 0x3c4   : > { %v8817_v58 = vpop.f32.mrf.mxu1  ;;  %v6615_v55 = vpop.f32.mrf.mxu0 }
 0x3c5   : > { %9079 = vst [vmem:[#allocation6_spill] sm:$0xff] %v8817_v58 }
 0x3c6   : > { %v8829_v50 = vpop.f32.mrf.mxu0 }
 0x3c7   : > { %9085 = vst [vmem:[#allocation30_spill] sm:$0xff] %v8829_v50 }
 0x3c8   : > { %v8839_v24 = vpop.f32.mrf.mxu0 }
 0x3ce   : > { %v6587_v49 = vpop.f32.mrf.mxu1 }
 0x3d0   : > { %v4742_v62 = vpop.f32.mrf.mxu1 }
 0x3d2   : > { %v6588_v48 = vpop.f32.mrf.mxu1 }
 0x3d4   : > { %v8823_v38 = vpop.f32.mrf.mxu1 }
 0x3d5   : > { %9082 = vst [vmem:[#allocation27_spill] sm:$0xff] %v8823_v38  ;;  %v4085_v38 = vadd.f32 %v4038_v52, %v3875_v61 }
 0x3d6   : > { %v8825_v11 = vpop.f32.mrf.mxu1 }
 0x3d7   : > { %9083 = vst [vmem:[#allocation28_spill] sm:$0xff] %v8825_v11  ;;  %v3886_v11 = vadd.f32 %v8703_v6, %v8715_v14  ;;  %v4261_v34 = vadd.f32 %v8745_v18, %v4085_v38  ;;  %v3891_v6 = vadd.f32 %v8711_v15, %v8725_v4  ;;  %v4091_v14 = vadd.f32 %v8761_v21, %v3899_v59  ;;  %v9096_v38 = vld [vmem:[#allocation5_spill] sm:$0xff] }
 0x3d8   : > { %v8827_v35 = vpop.f32.mrf.mxu1  ;;  %v3894_v15 = vadd.f32 %v8723_v16, %v8733_v22  ;;  %v4092_v4 = vadd.f32 %v8767_v32, %v3902_v19  ;;  %v3907_v16 = vadd.f32 %v8731_v33, %v8741_v29  ;;  %v4095_v22 = vadd.f32 %v8775_v5, %v3915_v25  ;;  %v9088_v5 = vld [vmem:[#allocation10_spill] sm:$0xff] }
 0x3d9   : > { %9084 = vst [vmem:[#allocation29_spill] sm:$0xff] %v8827_v35  ;;  %v4088_v50 = vadd.f32 %v6476_v41, %v3886_v11  ;;  %v4089_v47 = vadd.f32 %v8765_v3, %v3891_v6  ;;  %v4267_v21 = vadd.f32 %v8755_v31, %v4091_v14  ;;  %v9099_v14 = vld [vmem:[#allocation9_spill] sm:$0xff] }
 0x3da   : > { %v8831_v27 = vpop.f32.mrf.mxu1  ;;  %v4090_v0 = vadd.f32 %v8771_v44, %v3894_v15  ;;  %v4268_v44 = vadd.f32 %v8759_v54, %v4092_v4  ;;  %v8896_v54 = vld [vmem:[%s8968_s6] ss:$0 sm:$0xff] }
 0x3db   : > { %9086 = vst [vmem:[#allocation31_spill] sm:$0xff] %v8831_v27  ;;  %v3878_v27 = vadd.f32 %v8705_v42, %v8719_v45  ;;  %v4437_v42 = vadd.f32 %v4390_v13, %v4261_v34  ;;  %v4264_v45 = vadd.f32 %v8749_v46, %v4088_v50  ;;  %v3910_v13 = vadd.f32 %v9088_v5, %v8753_v23  ;;  %v9094_v23 = vld [vmem:[#allocation30_spill] sm:$0xff] }
 0x3dc   : > { %v8835_v58 = vpop.f32.mrf.mxu1 }
 0x3dd   : > { %9087 = vst [vmem:[#allocation32_spill] sm:$0xff] %v8835_v58  ;;  %v8850_v58 = vpop.f32.mrf.mxu0  ;;  %v4086_v57 = vadd.f32 %v4041_v36, %v3878_v27  ;;  %v4440_v41 = vadd.f32 %v6532_v28, %v4264_v45  ;;  %v4615_v36 = vadd.f32 %v6559_v1, %v4439_v9  ;;  %v4613_v3 = vadd.f32 %v8787_v37, %v4437_v42  ;;  %v9098_v9 = vld [vmem:[#allocation22_spill] sm:$0xff] }
 0x3de   : > { %v8843_v35 = vpop.f32.mrf.mxu1  ;;  %v4265_v1 = vadd.f32 %v8757_v12, %v4089_v47  ;;  %v4093_v12 = vadd.f32 %v8779_v51, %v3907_v16  ;;  %v9097_v59 = vld [vmem:[#allocation28_spill] sm:$0xff]  ;;  %v9104_v16 = vld [vmem:[#allocation21_spill] sm:$0xff] }
 0x3df   : > { %v8862_v30 = vpop.f32.mrf.mxu0  ;;  %v4262_v18 = vadd.f32 %v8751_v63, %v4086_v57  ;;  %v4791_v46 = vadd.f32 %v6587_v49, %v4615_v36  ;;  %v4443_v63 = vadd.f32 %v6535_v43, %v4267_v21  ;;  %v4789_v31 = vadd.f32 %v4742_v62, %v4613_v3  ;;  %v9095_v62 = vld [vmem:[#allocation20_spill] sm:$0xff] }
 0x3e0   : > { %v8856_v52 = vpop.f32.mrf.mxu1  ;;  %v4616_v32 = vadd.f32 %v8789_v40, %v4440_v41  ;;  %v4441_v53 = vadd.f32 %v8795_v20, %v4265_v1  ;;  %v9089_v40 = vld [vmem:[#allocation19_spill] sm:$0xff]  ;;  %v4096_v60 = vadd.f32 %v9095_v62, %v3918_v26  ;;  %v4269_v42 = vadd.f32 %v9099_v14, %v4093_v12  ;;  %v9100_v41 = vld [vmem:[#allocation17_spill] sm:$0xff]  ;;  %v9101_v36 = vld [vmem:[#allocation8_spill] sm:$0xff] }
 0x3e1   : > { %v4438_v39 = vadd.f32 %v4393_v8, %v4262_v18  ;;  %v4934_v50 = vpop.f32.mrf.mxu0  ;;  %v4967_v29 = vadd.f32 %v6615_v55, %v4791_v46  ;;  %v4444_v28 = vadd.f32 %v9089_v40, %v4268_v44  ;;  %v9090_v8 = vld [vmem:[#allocation16_spill] sm:$0xff]  ;;  %v4619_v43 = vadd.f32 %v9091_v7, %v4443_v63  ;;  %v9102_v4 = vld [vmem:[#allocation29_spill] sm:$0xff]  ;;  %v9106_v26 = vld [vmem:[#allocation14_spill] sm:$0xff] }
 0x3e2   : > { %v8869_v27 = vpop.f32.mrf.mxu1  ;;  %v4792_v2 = vadd.f32 %v6588_v48, %v4616_v32  ;;  %v4266_v56 = vadd.f32 %v9090_v8, %v4090_v0  ;;  %v9092_v48 = vld [vmem:[#allocation18_spill] sm:$0xff]  ;;  %v4965_v61 = vadd.f32 %v9094_v23, %v4789_v31  ;;  %v4617_v34 = vadd.f32 %v9098_v9, %v4441_v53  ;;  %v9105_v31 = vld [vmem:[#allocation7_spill] sm:$0xff]  ;;  %v9110_v7 = vld [vmem:[#allocation24_spill] sm:$0xff] }
 0x3e3   : > { %v4614_v33 = vadd.f32 %v8791_v17, %v4438_v39  ;;  %v6620_v49 = vpop.f32.mrf.mxu0  ;;  %v4271_v51 = vadd.f32 %v9092_v48, %v4095_v22  ;;  %v9093_v17 = vld [vmem:[#allocation27_spill] sm:$0xff]  ;;  %v4795_v57 = vadd.f32 %v9097_v59, %v4619_v43  ;;  %v4094_v18 = vadd.f32 %v9100_v41, %v3910_v13  ;;  %v9103_v39 = vld [vmem:[#allocation13_spill] sm:$0xff]  ;;  %v9112_v23 = vld [vmem:[#allocation6_spill] sm:$0xff] }
 0x3e4   : > { %v8884_v37 = vpop.f32.mrf.mxu1  ;;  %v4442_v10 = vadd.f32 %v9096_v38, %v4266_v56  ;;  %v4968_v47 = vadd.f32 %v8839_v24, %v4792_v2  ;;  %v4793_v21 = vadd.f32 %v9102_v4, %v4617_v34  ;;  %v4620_v46 = vadd.f32 %v9103_v39, %v4444_v28  ;;  %v9107_v2 = vld [vmem:[#allocation31_spill] sm:$0xff]  ;;  %v9109_v28 = vld [vmem:[#allocation12_spill] sm:$0xff]  ;;  %v9114_v14 = vld [vmem:[#allocation25_spill] sm:$0xff] }
 0x3e5   : > { %v4790_v55 = vadd.f32 %v9093_v17, %v4614_v33  ;;  %v4447_v15 = vadd.f32 %v9101_v36, %v4271_v51  ;;  %v4937_v25 = vpop.f32.mrf.mxu0  ;;  %v4445_v22 = vadd.f32 %v9104_v16, %v4269_v42  ;;  %v4272_v32 = vadd.f32 %v9105_v31, %v4096_v60  ;;  %v9108_v40 = vld [vmem:[#allocation23_spill] sm:$0xff]  ;;  %v9111_v51 = vld [vmem:[#allocation32_spill] sm:$0xff] }
 0x3e6   : > { %v4618_v53 = vadd.f32 %v9106_v26, %v4442_v10  ;;  %v4971_v12 = vadd.f32 %v8862_v30, %v4795_v57  ;;  %v4796_v33 = vadd.f32 %v9107_v2, %v4620_v46  ;;  %v4270_v8 = vadd.f32 %v9109_v28, %v4094_v18  ;;  %v9113_v60 = vld [vmem:[#allocation15_spill] sm:$0xff]  ;;  %v9115_v18 = vld [vmem:[#allocation26_spill] sm:$0xff] }
 0x3e7   : > { %v4966_v1 = vadd.f32 %v8850_v58, %v4790_v55  ;;  %v4448_v58 = vadd.f32 %v9108_v40, %v4272_v32  ;;  %v6623_v56 = vpop.f32.mrf.mxu0  ;;  %v4623_v43 = vadd.f32 %v9110_v7, %v4447_v15  ;;  %v4969_v48 = vadd.f32 %v4934_v50, %v4793_v21 }
 0x3e8   : > { %v4794_v17 = vadd.f32 %v9111_v51, %v4618_v53  ;;  %v4621_v38 = vadd.f32 %v9113_v60, %v4445_v22  ;;  %v4972_v9 = vadd.f32 %v6620_v49, %v4796_v33 }
 0x3e9   : > { %v4799_v62 = vadd.f32 %v8843_v35, %v4623_v43  ;;  %v4950_v34 = vpop.f32.mrf.mxu0  ;;  %v4624_v42 = vadd.f32 %v9114_v14, %v4448_v58 }
 0x3ea   : > { %v4970_v41 = vadd.f32 %v4937_v25, %v4794_v17 }
 0x3eb   : > { %v4975_v4 = vadd.f32 %v6623_v56, %v4799_v62  ;;  %v4800_v49 = vadd.f32 %v8869_v27, %v4624_v42  ;;  %v6624_v46 = vpop.f32.mrf.mxu0 }
 0x3ed   : > { %v4976_v32 = vadd.f32 %v6624_v46, %v4800_v49  ;;  %v4953_v26 = vpop.f32.mrf.mxu0 }
 0x3ee   : > { %v6643_v20 = vpop.f32.mrf.mxu1 }
 0x3ef   : > { %v5143_v11 = vadd.f32 %v6643_v20, %v4967_v29 }
 0x3f0   : > { %v5094_v6 = vpop.f32.mrf.mxu1 }
 0x3f1   : > { %v5162_v45 = vadd.f32 %v8896_v54, %v5143_v11  ;;  %v5141_v19 = vadd.f32 %v5094_v6, %v4965_v61  ;;  %v4446_v61 = vadd.f32 %v9112_v23, %v4270_v8  ;;  %v4797_v6 = vadd.f32 %v8856_v52, %v4621_v38 }
 0x3f2   : > { %v6644_v3 = vpop.f32.mrf.mxu1 }
 0x3f3   : > { %v5174_v0 = vmax.f32 %v5162_v45, 0.0  ;;  %v5160_v63 = vadd.f32 %v8896_v54, %v5141_v19  ;;  %v5144_v24 = vadd.f32 %v6644_v3, %v4968_v47  ;;  %v4622_v36 = vadd.f32 %v9115_v18, %v4446_v61 }
 0x3f4   : > { %v5097_v44 = vpop.f32.mrf.mxu1 }
 0x3f5   : > { %5186 = vst [vmem:[%s8916_s16 + $0xc] sm:$0xf] %v5174_v0  ;;  %v5172_v29 = vmax.f32 %v5160_v63, 0.0  ;;  %v5163_v5 = vadd.f32 %v8896_v54, %v5144_v24  ;;  %v5142_v13 = vadd.f32 %v5097_v44, %v4966_v1  ;;  %v4973_v0 = vadd.f32 %v4950_v34, %v4797_v6 }
 0x3f6   : > { %v6647_v20 = vpop.f32.mrf.mxu1  ;;  %v4798_v63 = vadd.f32 %v8884_v37, %v4622_v36 }
 0x3f7   : > { %5184 = vst [vmem:[%s8916_s16] sm:$0xff] %v5172_v29  ;;  %v5175_v30 = vmax.f32 %v5163_v5, 0.0  ;;  %v5161_v55 = vadd.f32 %v8896_v54, %v5142_v13  ;;  %v5147_v11 = vadd.f32 %v6647_v20, %v4971_v12 }
 0x3f8   : > { %v5110_v10 = vpop.f32.mrf.mxu1  ;;  %v4974_v2 = vadd.f32 %v4953_v26, %v4798_v63 }
 0x3f9   : > { %5187 = vst [vmem:[%s8916_s16 + $0x10] sm:$0xff] %v5175_v30  ;;  %v5173_v59 = vmax.f32 %v5161_v55, 0.0  ;;  %v5166_v57 = vadd.f32 %v8896_v54, %v5147_v11  ;;  %v5145_v50 = vadd.f32 %v5110_v10, %v4969_v48 }
 0x3fa   : > { %v6648_v45 = vpop.f32.mrf.mxu1 }
 0x3fb   : > { %5185 = vst [vmem:[%s8916_s16 + $0x4] sm:$0xf0] %v5173_v59  ;;  %v5178_v19 = vmax.f32 %v5166_v57, 0.0  ;;  %v5164_v35 = vadd.f32 %v8896_v54, %v5145_v50  ;;  %v5148_v47 = vadd.f32 %v6648_v45, %v4972_v9 }
 0x3fc   : > { %v5113_v15 = vpop.f32.mrf.mxu1 }
 0x3fd   : > { %5190 = vst [vmem:[%s8916_s16 + $0x20] sm:$0xff] %v5178_v19  ;;  %v5176_v21 = vmax.f32 %v5164_v35, 0.0  ;;  %v5167_v52 = vadd.f32 %v8896_v54, %v5148_v47  ;;  %v5146_v39 = vadd.f32 %v5113_v15, %v4970_v41 }
 0x3fe   : > { %v6651_v3 = vpop.f32.mrf.mxu1 }
 0x3ff   : > { %5188 = vst [vmem:[%s8916_s16 + $0x14] sm:$0xf0] %v5176_v21  ;;  %v5179_v25 = vmax.f32 %v5167_v52, 0.0  ;;  %v5165_v24 = vadd.f32 %v8896_v54, %v5146_v39  ;;  %v5151_v1 = vadd.f32 %v6651_v3, %v4975_v4 }
 0x400   : > { %v5126_v16 = vpop.f32.mrf.mxu1 }
 0x401   : > { %5191 = vst [vmem:[%s8916_s16 + $0x24] sm:$0xf0] %v5179_v25  ;;  %v5177_v27 = vmax.f32 %v5165_v24, 0.0  ;;  %v5170_v22 = vadd.f32 %v8896_v54, %v5151_v1  ;;  %v5149_v31 = vadd.f32 %v5126_v16, %v4973_v0 }
 0x402   : > { %v6652_v53 = vpop.f32.mrf.mxu1 }
 0x403   : > { %5189 = vst [vmem:[%s8916_s16 + $0x1c] sm:$0xf] %v5177_v27  ;;  %v5182_v37 = vmax.f32 %v5170_v22, 0.0  ;;  %v5168_v44 = vadd.f32 %v8896_v54, %v5149_v31  ;;  %v5152_v12 = vadd.f32 %v6652_v53, %v4976_v32 }
 0x404   : > { %v5129_v33 = vpop.f32.mrf.mxu1 }
 0x405   : > { %5194 = vst [vmem:[%s8916_s16 + $0x34] sm:$0xf0] %v5182_v37  ;;  %v5180_v29 = vmax.f32 %v5168_v44, 0.0  ;;  %v5171_v5 = vadd.f32 %v8896_v54, %v5152_v12  ;;  %v5150_v13 = vadd.f32 %v5129_v33, %v4974_v2 }
 0x407   : > { %5192 = vst [vmem:[%s8916_s16 + $0x2c] sm:$0xf] %v5180_v29  ;;  %v5183_v40 = vmax.f32 %v5171_v5, 0.0  ;;  %v5169_v58 = vadd.f32 %v8896_v54, %v5150_v13 }
 0x409   : > { %5195 = vst [vmem:[%s8916_s16 + $0x3c] sm:$0xf] %v5183_v40  ;;  %v5181_v28 = vmax.f32 %v5169_v58, 0.0 }
 0x40b   : > { %5193 = vst [vmem:[%s8916_s16 + $0x30] sm:$0xff] %v5181_v28 }
 0x40c PF: > { %s17_s24 = sadd.s32 1, %s6856_s24  }
 0x40d   : > { %p14_p4 = scmp.ge.s32.totalorder %s17_s24, 4  }
 0x40f   :  { %16 = sbr.rel (!%p14_p4) target bundleno = 1 (0x1), region = 94 }

</bundles_post_ra>
